<compile_context>
chip_gen: v5e
topology: v5e:2x2
jax: 0.10.0
libtpu: 0.0.40
codegen_flags: <defaults>
</compile_context>

<pallas_src>
import math

import jax
import jax.numpy as jnp
from jax import lax
from jax.experimental import pallas as pl
from jax.experimental.pallas import tpu as pltpu

QUERY_DIM = 768            # query_dim == cross_attention_dim == 768
HEADS = 8
DIM_HEAD = 64
INNER = HEADS * DIM_HEAD   # 512
SCALE = 1.0 / math.sqrt(DIM_HEAD)


def _aligner_kernel(char_ref, img_ref, wq_ref, wkv_ref, wo_ref, bo_ref, out_ref):
    """Per-batch cross-attention: query = single character embedding, K/V = image tokens."""
    char = char_ref[0].astype(jnp.bfloat16)    # (1, D)
    img = img_ref[0].astype(jnp.bfloat16)      # (S, D)

    # Projections: bf16 MXU inputs, f32 accumulation.  SCALE is pre-folded into Wq; Wk|Wv are
    # fused into a single matmul (one setup/drain sequence instead of two).
    q = jnp.dot(char, wq_ref[...], preferred_element_type=jnp.float32)    # (1, INNER)  scaled
    kv = jnp.dot(img, wkv_ref[...], preferred_element_type=jnp.float32)   # (S, 2*INNER)
    k = kv[:, :INNER]                                                     # (S, INNER) f32
    v = kv[:, INNER:]                                                     # (S, INNER) f32

    # Head-membership mask (HEADS, INNER): mask[h, i] = 1 iff channel i belongs to head h.
    # Built from iotas — no transposes, no concats, no per-head loop.
    head_lo = lax.broadcasted_iota(jnp.int32, (HEADS, INNER), 0) * DIM_HEAD
    lane_i = lax.broadcasted_iota(jnp.int32, (HEADS, INNER), 1)
    head_mask = ((lane_i >= head_lo) & (lane_i < head_lo + DIM_HEAD)).astype(jnp.float32)

    # All-head scores in one contraction: s[t, h] = <q_h, k_h[t]>   (attention core in f32)
    s = jnp.einsum("ti,hi->th", k * q, head_mask,
                   preferred_element_type=jnp.float32)                    # (S, HEADS)
    s = s - jnp.max(s, axis=0, keepdims=True)
    e = jnp.exp(s)
    p = e * pl.reciprocal(jnp.sum(e, axis=0, keepdims=True), approx=True)  # (S, HEADS) f32

    # PV without a head loop: expand p back to the (S, INNER) head layout via the same 0/1
    # mask (exact copy of the f32 probabilities), then VPU multiply + key-axis reduction.
    p_exp = jnp.einsum("th,hi->ti", p, head_mask,
                       preferred_element_type=jnp.float32)                # (S, INNER)
    attn = jnp.sum(p_exp * v, axis=0, keepdims=True)                      # (1, INNER)

    out_row = jnp.dot(attn.astype(jnp.bfloat16), wo_ref[...],
                      preferred_element_type=jnp.float32) + bo_ref[...]   # (1, D) f32

    # Every expanded query row is the identical char embedding -> one output row per batch.
    out_ref[0] = out_row.astype(out_ref.dtype)


def find_character_positions(captions):
    # TODO(synk): caption string parsing has no Pallas equivalent; it stays host-side Python
    # (mirroring aligner.find_character_embeddings) and only integer indices reach the device.
    positions = []
    for caption in captions:
        words = caption.lower().split()
        char_positions = [i for i, w in enumerate(words) if "character" in w]
        positions.append(char_positions[0] if char_positions else 0)
    return positions


def prepare_params(params):
    """One-time (param-load) weight prep: fold SCALE into Wq, fuse Wk|Wv, cast to bf16.

    Do this once and keep the result device-resident so per-call HBM traffic is only the
    activation tiles — no per-call f32->bf16 weight casts.
    """
    return {
        "wq_scaled": (params["wq"] * SCALE).astype(jnp.bfloat16),                       # (768, 512)
        "wkv": jnp.concatenate([params["wk"], params["wv"]], axis=1).astype(jnp.bfloat16),  # (768, 1024)
        "wo": params["wo"].astype(jnp.bfloat16),                                        # (512, 768)
        "bo": params["bo"].astype(jnp.float32),                                         # (1, 768)
    }


def aligner_forward(image_embeds, text_embeds, captions, prep):
    """image_embeds: (B, S, 768), text_embeds: (B, T, 768) float32, captions: list[str].

    `prep` is the output of prepare_params (persistent bf16 weights)."""
    B, S, D = image_embeds.shape
    assert D == QUERY_DIM and len(captions) == B

    pos = jnp.asarray(find_character_positions(captions), dtype=jnp.int32)
    char = text_embeds[jnp.arange(B), pos][:, None, :]        # (B, 1, D) character embeddings

    row = pl.pallas_call(
        _aligner_kernel,
        out_shape=jax.ShapeDtypeStruct((B, 1, D), jnp.float32),
        grid_spec=pltpu.PrefetchScalarGridSpec(
            num_scalar_prefetch=0,
            grid=(B,),
            in_specs=[
                pl.BlockSpec((1, 1, D), lambda b: (b, 0, 0)),       # char embedding (per batch)
                pl.BlockSpec((1, S, D), lambda b: (b, 0, 0)),       # image tokens   (per batch)
                pl.BlockSpec((D, INNER), lambda b: (0, 0)),         # Wq*SCALE  — VMEM-resident
                pl.BlockSpec((D, 2 * INNER), lambda b: (0, 0)),     # Wk|Wv fused
                pl.BlockSpec((INNER, D), lambda b: (0, 0)),         # Wo
                pl.BlockSpec((1, D), lambda b: (0, 0)),             # out bias (f32)
            ],
            out_specs=pl.BlockSpec((1, 1, D), lambda b: (b, 0, 0)),
        ),
        compiler_params=pltpu.CompilerParams(
            dimension_semantics=("parallel",),   # batch rows shard across TCs on v7x (B>=2)
            vmem_limit_bytes=32 << 20,           # ~3 MB bf16 weights + tiny activation tiles
        ),
    )(char, image_embeds, prep["wq_scaled"], prep["wkv"], prep["wo"], prep["bo"])

    # Module semantics return (B, S, D); all S rows are identical, so broadcast outside the
    # kernel (consumers that can use the (B,1,D) row directly should skip this).
    return jnp.broadcast_to(row, (B, S, D))


def init_params(key):
    k1, k2, k3, k4, k5 = jax.random.split(key, 5)
    s = 0.02
    return {
        # weights stored as (in, out) so the kernel computes x @ W
        "wq": (s * jax.random.normal(k1, (QUERY_DIM, INNER))).astype(jnp.float32),
        "wk": (s * jax.random.normal(k2, (QUERY_DIM, INNER))).astype(jnp.float32),
        "wv": (s * jax.random.normal(k3, (QUERY_DIM, INNER))).astype(jnp.float32),
        "wo": (s * jax.random.normal(k4, (INNER, QUERY_DIM))).astype(jnp.float32),
        "bo": (s * jax.random.normal(k5, (1, QUERY_DIM))).astype(jnp.float32),
    }


def _reference(image_embeds, text_embeds, captions, params):
    """Pure-JAX f32 reference matching the PyTorch module (expanded queries)."""
    B, S, D = image_embeds.shape
    pos = jnp.asarray(find_character_positions(captions), dtype=jnp.int32)
    char = text_embeds[jnp.arange(B), pos]                                 # (B, D)
    q = jnp.broadcast_to(char[:, None, :], (B, S, D)) @ params["wq"]       # (B, S, INNER)
    k = image_embeds @ params["wk"]
    v = image_embeds @ params["wv"]

    def heads(x):
        return x.reshape(B, S, HEADS, DIM_HEAD).transpose(0, 2, 1, 3)

    qh, kh, vh = heads(q), heads(k), heads(v)
    s = jnp.einsum("bhqd,bhkd->bhqk", qh, kh) * SCALE
    p = jax.nn.softmax(s, axis=-1)
    o = jnp.einsum("bhqk,bhkd->bhqd", p, vh)
    o = o.transpose(0, 2, 1, 3).reshape(B, S, HEADS * DIM_HEAD)
    return o @ params["wo"] + params["bo"][0]


if __name__ == "__main__":
    key = jax.random.PRNGKey(0)
    kp, ki, kt = jax.random.split(key, 3)

    # small shapes consistent with the module: batch=2, image seq=8, text seq=8, dim=768
    B, S, T, D = 2, 8, 8, QUERY_DIM
    captions = ["a smiling character holding a red balloon",
                "a dog running on the beach"]

    params = init_params(kp)
    prep = prepare_params(params)          # one-time bf16 weight prep (kept device-resident)
    image_embeds = jax.random.normal(ki, (B, S, D), jnp.float32)
    text_embeds = jax.random.normal(kt, (B, T, D), jnp.float32)

    out = aligner_forward(image_embeds, text_embeds, captions, prep)
    out = jax.block_until_ready(out)

    ref = _reference(image_embeds, text_embeds, captions, params)
    assert out.shape == (B, S, D)
    # projections use bf16 weights/activations on the MXU (f32 accumulation); attention core
    # (scores / softmax / PV) is f32 -> bf16-aware tolerance
    assert jnp.allclose(out, ref, atol=2e-2, rtol=2e-2), "mismatch vs JAX reference"

    print("KERNEL_OK")
</pallas_src>

<mosaic_0001>
module attributes {stable_mosaic.version = 11 : i64} {
  func.func @_aligner_kernel(%arg0: i32, %arg1: memref<1x1x768xf32, #tpu.memory_space<vmem>>, %arg2: memref<1x8x768xf32, #tpu.memory_space<vmem>>, %arg3: memref<768x512xbf16, #tpu.memory_space<vmem>>, %arg4: memref<768x1024xbf16, #tpu.memory_space<vmem>>, %arg5: memref<512x768xbf16, #tpu.memory_space<vmem>>, %arg6: memref<1x768xf32, #tpu.memory_space<vmem>>, %arg7: memref<1x1x768xf32, #tpu.memory_space<vmem>>) attributes {dimension_semantics = [#tpu.dimension_semantics<parallel>], iteration_bounds = array<i64: 2>, scalar_prefetch = 0 : i64, scratch_operands = 0 : i64, tpu.core_type = #tpu.core_type<tc>, window_params = [{transform_indices = @transform_0, window_bounds = array<i64: 1, 1, 768>}, {transform_indices = @transform_1, window_bounds = array<i64: 1, 8, 768>}, {pipeline_mode = #tpu.pipeline_mode<synchronous>, transform_indices = @transform_2, window_bounds = array<i64: 768, 512>}, {pipeline_mode = #tpu.pipeline_mode<synchronous>, transform_indices = @transform_3, window_bounds = array<i64: 768, 1024>}, {pipeline_mode = #tpu.pipeline_mode<synchronous>, transform_indices = @transform_4, window_bounds = array<i64: 512, 768>}, {pipeline_mode = #tpu.pipeline_mode<synchronous>, transform_indices = @transform_5, window_bounds = array<i64: 1, 768>}, {transform_indices = @transform_6, window_bounds = array<i64: 1, 1, 768>}]} {
    %c0 = arith.constant 0 : index
    %c0_0 = arith.constant 0 : index
    %c0_1 = arith.constant 0 : index
    %0 = vector.load %arg1[%c0, %c0_0, %c0_1] : memref<1x1x768xf32, #tpu.memory_space<vmem>>, vector<1x1x768xf32>
    %1 = vector.shape_cast %0 : vector<1x1x768xf32> to vector<1x768xf32>
    %2 = arith.truncf %1 : vector<1x768xf32> to vector<1x768xbf16>
    %c0_2 = arith.constant 0 : index
    %c0_3 = arith.constant 0 : index
    %c0_4 = arith.constant 0 : index
    %3 = vector.load %arg2[%c0_2, %c0_3, %c0_4] : memref<1x8x768xf32, #tpu.memory_space<vmem>>, vector<1x8x768xf32>
    %4 = vector.shape_cast %3 : vector<1x8x768xf32> to vector<8x768xf32>
    %5 = arith.truncf %4 : vector<8x768xf32> to vector<8x768xbf16>
    %c0_5 = arith.constant 0 : index
    %c0_6 = arith.constant 0 : index
    %6 = vector.load %arg3[%c0_5, %c0_6] : memref<768x512xbf16, #tpu.memory_space<vmem>>, vector<768x512xbf16>
    %cst = arith.constant dense<0.000000e+00> : vector<1x512xf32>
    %7 = tpu.matmul %2, %6, %cst {dimension_numbers = #tpu.dot_dimension_numbers<[1], [0], [0], [1], [0, 0, 1, 1], [], []>} : vector<1x768xbf16>, vector<768x512xbf16>, vector<1x512xf32> -> vector<1x512xf32>
    %c0_7 = arith.constant 0 : index
    %c0_8 = arith.constant 0 : index
    %8 = vector.load %arg4[%c0_7, %c0_8] : memref<768x1024xbf16, #tpu.memory_space<vmem>>, vector<768x1024xbf16>
    %cst_9 = arith.constant dense<0.000000e+00> : vector<8x1024xf32>
    %9 = tpu.matmul %5, %8, %cst_9 {dimension_numbers = #tpu.dot_dimension_numbers<[1], [0], [0], [1], [0, 0, 1, 1], [], []>} : vector<8x768xbf16>, vector<768x1024xbf16>, vector<8x1024xf32> -> vector<8x1024xf32>
    %10 = vector.extract_strided_slice %9 {offsets = [0, 0], sizes = [8, 512], strides = [1, 1]} : vector<8x1024xf32> to vector<8x512xf32>
    %11 = vector.extract_strided_slice %9 {offsets = [0, 512], sizes = [8, 512], strides = [1, 1]} : vector<8x1024xf32> to vector<8x512xf32>
    %12 = tpu.iota {dimensions = array<i32: 0>} : vector<8x512xi32>
    %c64_i32 = arith.constant 64 : i32
    %13 = vector.broadcast %c64_i32 : i32 to vector<8x512xi32>
    %14 = arith.muli %12, %13 : vector<8x512xi32>
    %15 = tpu.iota {dimensions = array<i32: 1>} : vector<8x512xi32>
    %16 = arith.cmpi sge, %15, %14 : vector<8x512xi32>
    %c64_i32_10 = arith.constant 64 : i32
    %17 = vector.broadcast %c64_i32_10 : i32 to vector<8x512xi32>
    %18 = arith.addi %14, %17 : vector<8x512xi32>
    %19 = arith.cmpi slt, %15, %18 : vector<8x512xi32>
    %20 = arith.andi %16, %19 : vector<8x512xi1>
    %21 = arith.extui %20 : vector<8x512xi1> to vector<8x512xi32>
    %22 = arith.sitofp %21 : vector<8x512xi32> to vector<8x512xf32>
    %23 = vector.broadcast %7 : vector<1x512xf32> to vector<8x512xf32>
    %24 = arith.mulf %10, %23 : vector<8x512xf32>
    "tpu.trace_start"() <{level = 10 : i32, message = "ti,hi->th"}> : () -> ()
    %cst_11 = arith.constant dense<0.000000e+00> : vector<8x8xf32>
    %25 = tpu.matmul %24, %22, %cst_11 {dimension_numbers = #tpu.dot_dimension_numbers<[1], [1], [0], [0], [0, 0, 1, 0], [], []>} : vector<8x512xf32>, vector<8x512xf32>, vector<8x8xf32> -> vector<8x8xf32>
    "tpu.trace_stop"() : () -> ()
    %cst_12 = arith.constant dense<0xFF800000> : vector<8xf32>
    %26 = vector.multi_reduction <maximumf>, %25, %cst_12 [0] : vector<8x8xf32> to vector<8xf32>
    %27 = vector.shape_cast %26 : vector<8xf32> to vector<1x8xf32>
    %28 = vector.broadcast %27 : vector<1x8xf32> to vector<8x8xf32>
    %29 = arith.subf %25, %28 : vector<8x8xf32>
    %30 = math.exp %29 : vector<8x8xf32>
    %cst_13 = arith.constant dense<0.000000e+00> : vector<8xf32>
    %31 = vector.multi_reduction <add>, %30, %cst_13 [0] : vector<8x8xf32> to vector<8xf32>
    %32 = vector.shape_cast %31 : vector<8xf32> to vector<1x8xf32>
    %33 = tpu.reciprocal %32 {approx = true} : vector<1x8xf32> -> vector<1x8xf32>
    %34 = vector.broadcast %33 : vector<1x8xf32> to vector<8x8xf32>
    %35 = arith.mulf %30, %34 : vector<8x8xf32>
    "tpu.trace_start"() <{level = 10 : i32, message = "th,hi->ti"}> : () -> ()
    %cst_14 = arith.constant dense<0.000000e+00> : vector<8x512xf32>
    %36 = tpu.matmul %35, %22, %cst_14 {dimension_numbers = #tpu.dot_dimension_numbers<[1], [0], [0], [1], [0, 0, 1, 1], [], []>} : vector<8x8xf32>, vector<8x512xf32>, vector<8x512xf32> -> vector<8x512xf32>
    "tpu.trace_stop"() : () -> ()
    %37 = arith.mulf %36, %11 : vector<8x512xf32>
    %cst_15 = arith.constant dense<0.000000e+00> : vector<512xf32>
    %38 = vector.multi_reduction <add>, %37, %cst_15 [0] : vector<8x512xf32> to vector<512xf32>
    %39 = vector.shape_cast %38 : vector<512xf32> to vector<1x512xf32>
    %40 = arith.truncf %39 : vector<1x512xf32> to vector<1x512xbf16>
    %c0_16 = arith.constant 0 : index
    %c0_17 = arith.constant 0 : index
    %41 = vector.load %arg5[%c0_16, %c0_17] : memref<512x768xbf16, #tpu.memory_space<vmem>>, vector<512x768xbf16>
    %cst_18 = arith.constant dense<0.000000e+00> : vector<1x768xf32>
    %42 = tpu.matmul %40, %41, %cst_18 {dimension_numbers = #tpu.dot_dimension_numbers<[1], [0], [0], [1], [0, 0, 1, 1], [], []>} : vector<1x512xbf16>, vector<512x768xbf16>, vector<1x768xf32> -> vector<1x768xf32>
    %c0_19 = arith.constant 0 : index
    %c0_20 = arith.constant 0 : index
    %43 = vector.load %arg6[%c0_19, %c0_20] : memref<1x768xf32, #tpu.memory_space<vmem>>, vector<1x768xf32>
    %44 = arith.addf %42, %43 : vector<1x768xf32>
    %c0_21 = arith.constant 0 : index
    %c0_22 = arith.constant 0 : index
    %c0_23 = arith.constant 0 : index
    %45 = vector.load %arg7[%c0_21, %c0_22, %c0_23] : memref<1x1x768xf32, #tpu.memory_space<vmem>>, vector<1x1x768xf32>
    %46 = vector.shape_cast %45 : vector<1x1x768xf32> to vector<1x768xf32>
    %47 = vector.shape_cast %44 : vector<1x768xf32> to vector<1x1x768xf32>
    tpu.vector_store %arg7[%c0_21, %c0_22, %c0_23], %47 {strides = array<i32>} : memref<1x1x768xf32, #tpu.memory_space<vmem>>, vector<1x1x768xf32>,
    return
  }
  func.func @transform_0(%arg0: i32) -> (i32, i32, i32) {
    %c0_i32 = arith.constant 0 : i32
    %c0_i32_0 = arith.constant 0 : i32
    %c0_i32_1 = arith.constant 0 : i32
    return %arg0, %c0_i32, %c0_i32_0 : i32, i32, i32
  }
  func.func @transform_1(%arg0: i32) -> (i32, i32, i32) {
    %c0_i32 = arith.constant 0 : i32
    %c0_i32_0 = arith.constant 0 : i32
    %c0_i32_1 = arith.constant 0 : i32
    return %arg0, %c0_i32, %c0_i32_0 : i32, i32, i32
  }
  func.func @transform_2(%arg0: i32) -> (i32, i32) {
    %c0_i32 = arith.constant 0 : i32
    %c0_i32_0 = arith.constant 0 : i32
    %c0_i32_1 = arith.constant 0 : i32
    return %c0_i32, %c0_i32_0 : i32, i32
  }
  func.func @transform_3(%arg0: i32) -> (i32, i32) {
    %c0_i32 = arith.constant 0 : i32
    %c0_i32_0 = arith.constant 0 : i32
    %c0_i32_1 = arith.constant 0 : i32
    return %c0_i32, %c0_i32_0 : i32, i32
  }
  func.func @transform_4(%arg0: i32) -> (i32, i32) {
    %c0_i32 = arith.constant 0 : i32
    %c0_i32_0 = arith.constant 0 : i32
    %c0_i32_1 = arith.constant 0 : i32
    return %c0_i32, %c0_i32_0 : i32, i32
  }
  func.func @transform_5(%arg0: i32) -> (i32, i32) {
    %c0_i32 = arith.constant 0 : i32
    %c0_i32_0 = arith.constant 0 : i32
    %c0_i32_1 = arith.constant 0 : i32
    return %c0_i32, %c0_i32_0 : i32, i32
  }
  func.func @transform_6(%arg0: i32) -> (i32, i32, i32) {
    %c0_i32 = arith.constant 0 : i32
    %c0_i32_0 = arith.constant 0 : i32
    %c0_i32_1 = arith.constant 0 : i32
    return %arg0, %c0_i32, %c0_i32_0 : i32, i32, i32
  }
}

</mosaic_0001>

<bundles_post_ra>
// kernel: tpu_custom_call.1
= control target key start
LH: loop header
LB: loop body
LE: loop exit
PB: predicated region body
PF: predicated region fallthrough
CT: control target
= control target key end

     0   :  { %s11456_s0 = inlined_call_operand.hbm [shape: f32[2,1,768], index: 0, kind: input, shape index: {}]   ;;  %s11457_s1 = inlined_call_operand.hbm [shape: f32[2,8,768], index: 1, kind: input, shape index: {}]   ;;  %s11458_s2 = inlined_call_operand.hbm [shape: bf16[768,512], index: 2, kind: input, shape index: {}]   ;;  %s11459_s3 = inlined_call_operand.hbm [shape: bf16[768,1024], index: 3, kind: input, shape index: {}]   ;;  %s11460_s4 = inlined_call_operand.hbm [shape: bf16[512,768], index: 4, kind: input, shape index: {}]   ;;  %s11461_s5 = inlined_call_operand.hbm [shape: f32[1,768], index: 5, kind: input, shape index: {}]   ;;  %s11462_s6 = inlined_call_operand.hbm [shape: f32[2,1,768], index: 6, kind: output, shape index: {}]  }
   0x1   :  { %11463 = sst [smem:[#allocation20_spill]] %s11456_s0 }
   0x2   :  { %11464 = sst [smem:[#allocation21_spill]] %s11458_s2 }
   0x3   :  { %11465 = sst [smem:[#allocation22_spill]] %s11459_s3 }
   0x4   :  { %11466 = sst [smem:[#allocation23_spill]] %s11460_s4 }
   0x5   :  { %11 = vsyncpa [#allocation3], 0 }
   0x6   :  { %13 = vsyncpa [#allocation3 + $0x1], 0 }
   0x7   :  { %14 = vsyncpa [#allocation6], 0 }
   0x8   :  { %16 = vsyncpa [#allocation6 + $0x1], 0 }
   0x9   :  { %17 = vsyncpa [#allocation9], 0 }
   0xa   :  { %18 = vsyncpa [#allocation12], 0 }
   0xb   :  { %19 = vsyncpa [#allocation4], 0 }
   0xc   :  { %21 = vsyncpa [#allocation4 + $0x1], 0  ;;  %s10992_s21 = smov 0   ;;  %s10994_s22 = smov 0  }
   0xd   :  { %s10996_s23 = smov 0   ;;  %s10998_s24 = smov 0  }
   0xe LB: > { %s11467_s2 = sld [smem:[#allocation21_spill]]  ;;  %s11016_s28 = sadd.s32 4294967295, %s10944_s24   ;;  %s10944_s24 = sphi %s10998_s24, %s11486_s24   ;;  %s10940_s23 = sphi %s10996_s23, %s11485_s23   ;;  %s10936_s22 = sphi %s10994_s22, %s11484_s22   ;;  %s10932_s21 = sphi %s10992_s21, %s11483_s21  }
   0xf   : > { %p6702_p0 = scmp.ge.s32.totalorder %s10944_s24, 1  ;;  %p48_p1 = scmp.eq.s32.totalorder %s11016_s28, 0 }
  0x10   : > { %p194_p2 = scmp.lt.s32.totalorder %s10944_s24, 3  ;;  %s10946_s30 = smov [#allocation7]  }
  0x11   : > { %s207_s7 = sshll.u32 %s10946_s30, 4  ;;  %s11469_s3 = sld [smem:[#allocation22_spill]]  ;;  %s208_s7 = int_to_ptr.vmem [resolvable:$true] %s207_s7 }
  0x12   : > { %p11021_p3 = pnand %p6702_p0, %p194_p2  ;;  %s10947_s12 = smov [#allocation8]  }
  0x13   : > { %s221_s13 = sshll.u32 %s10947_s12, 4  ;;  %s10948_s14 = smov 256   ;;  %s222_s13 = int_to_ptr.vmem [resolvable:$true] %s221_s13 }
  0x14   : > { %s205_s27 = sshll.u32 %s11467_s2, 4  ;;  %p10601_p4 = pneg %p11021_p3  ;;  %s206_s27 = int_to_ptr.hbm [resolvable:$true] %s205_s27 }
  0x15   : > { %s10949_s15 = smov 16   ;;  %s10950_s16 = smov 512  }
  0x16   : > { %p11033_p6 = pnand %p10601_p4, %p48_p1  ;;  %s10951_s17 = smov 32  }
  0x17   : > { %s219_s10 = sshll.u32 %s11469_s3, 4  ;;  %s11471_s4 = sld [smem:[#allocation23_spill]]  ;;  %s220_s10 = int_to_ptr.hbm [resolvable:$true] %s219_s10 }
  0x18   : > { %10604 = dma.hbm_to_vmem [thread:$0]  (!%p11033_p6), %s206_s27, 24576, %s208_s7, [#allocation6], %s10948_s14, %s10948_s14, %s10949_s15  }
  0x19   : > { %10607 = dma.hbm_to_vmem [thread:$0]  (!%p11033_p6), %s220_s10, 49152, %s222_s13, [#allocation9], %s10950_s16, %s10950_s16, %s10951_s17  }
  0x1a   : > { %s10952_s25 = smov [#allocation10]   ;;  %s248_s7 = sshll.u32 %s11461_s5, 4  ;;  %s249_s7 = int_to_ptr.hbm [resolvable:$true] %s248_s7 }
  0x1b   : > { %s235_s26 = sshll.u32 %s10952_s25, 4  ;;  %s10953_s8 = smov 384   ;;  %s236_s26 = int_to_ptr.vmem [resolvable:$true] %s235_s26 }
  0x1c   : > { %s10954_s9 = smov 24   ;;  %s10955_s10 = smov [#allocation11]  }
  0x1d   : > { %s233_s20 = sshll.u32 %s11471_s4, 4  ;;  %s250_s12 = sshll.u32 %s10955_s10, 4  ;;  %s234_s20 = int_to_ptr.hbm [resolvable:$true] %s233_s20  ;;  %s251_s12 = int_to_ptr.vmem [resolvable:$true] %s250_s12 }
  0x1e   : > { %10610 = dma.hbm_to_vmem [thread:$0]  (!%p11033_p6), %s234_s20, 24576, %s236_s26, [#allocation9], %s10953_s8, %s10953_s8, %s10954_s9  }
  0x1f   : > { %10613 = dma.hbm_to_vmem [thread:$0]  (!%p11033_p6), %s249_s7, 96, %s251_s12, [#allocation12]  }
  0x20   : > { %s6701_s13 = sadd.s32 4294967294, %s10944_s24   ;;  %s11053_s14 = sadd.s32 1, %s10944_s24  }
  0x21   : > { %s31_s15 = ssub.s32 %s10944_s24, %s11053_s14  ;;  %s34_s16 = sadd.s32 1, %s10940_s23 }
  0x22   : > { %p32_p7 = scmp.eq.s32.totalorder %s31_s15, 0  ;;  %p41_p8 = scmp.ne.s32.totalorder %s10940_s23, %s10936_s22 }
  0x23   : > { %p42_p9 = scmp.eq.s32.totalorder %s10944_s24, 0  ;;  %p47_p10 = scmp.ne.s32.totalorder %s10936_s22, %s10932_s21 }
  0x24   : > { %s11064_s17 = scalar_select %p32_p7, %s10940_s23, %s34_s16  }
  0x25   : > { %p43_p11 = por %p42_p9, %p41_p8  ;;  %p11068_p12 = por %p48_p1, %p47_p10 }
  0x26   : > { %p181_p13 = scmp.eq.s32.totalorder %s11016_s28, 1  ;;  %p187_p0 = scmp.eq.s32.totalorder %s6701_s13, 1 }
  0x27   : > { %p10629_p2 = scmp.lt.s32.totalorder %s10944_s24, 2  ;;  %s11075_s18 = sand.u32 1, %s10940_s23  }
  0x28   : > { %p11077_p4 = por %p181_p13, %p41_p8  ;;  %p11081_p6 = por %p187_p0, %p47_p10 }
  0x29   : > { %s10572_s25 = smul.u32 6, %s11075_s18  ;;  %p11087_p7 = pnand %p10629_p2, %p43_p11 }
  0x2a   : > { %s10573_s26 = smul.u32 6, %s10944_s24  ;;  %s11476_s0 = sld [smem:[#allocation20_spill]] }
  0x2b   : > { %s265_s10 = scalar_lea.vmem [#allocation2], %s10572_s25  ;;  %s262_s15 = scalar_lea.sflag [#allocation3], %s11075_s18 }
  0x2c   : > { %s273_s12 = sshll.u32 %s265_s10, 4  ;;  %p10806_p9 = pneg %p11087_p7  ;;  %s274_s12 = int_to_ptr.vmem [resolvable:$true] %s273_s12 }
  0x30   : > { %s269_s9 = scalar_lea.hbm %s11476_s0, %s10573_s26  ;;  %s10809_s26 = scalar_lea.hbm %s11476_s0, 12 }
  0x31   : > { %s271_s13 = sshll.u32 %s269_s9, 4  ;;  %s272_s13 = int_to_ptr.hbm [resolvable:$true] %s271_s13 }
  0x32   : > { %s10802_s16 = sshra.s32 %s272_s13, 4  ;;  %s10803_s16 = int_to_ptr.hbm [resolvable:$true] %s10802_s16 }
  0x33   : > { %s10804_s2 = scalar_lea.hbm %s10803_s16, 6  ;;  %p10810_p13 = scmp.lt.s32.totalorder %s10803_s16, %s11476_s0 }
  0x34   : > { %p10805_p8 = scmp.ne.s32.totalorder %s10803_s16, %s10804_s2  ;;  %p10811_p0 = scmp.lt.s32.totalorder %s10809_s26, %s10804_s2 }
  0x36   : > { %p10807_p10 = pnand %p10806_p9, %p10805_p8  ;;  %p10812_p2 = por %p10811_p0, %p10810_p13 }
  0x38   : > { %p10808_p11 = pneg %p10807_p10 }
  0x3a   : > { %p10813_p5 = pnand %p10812_p2, %p10808_p11 }
  0x3c   : > { %10816 = shalt.err (!%p10813_p5)
}
  0x3d   : > { %10617 = dma.hbm_to_vmem [thread:$0]  (!%p11087_p7), %s272_s13, 96, %s274_s12, %s262_s15  }
  0x3e   : > { %s10574_s8 = smul.u32 48, %s11075_s18  ;;  %s11477_s2 = sand.u32 1, %s10944_s24  }
  0x3f   : > { %s10575_s9 = smul.u32 48, %s10944_s24  ;;  %s281_s26 = scalar_lea.sflag [#allocation6], %s11477_s2 }
  0x40   : > { %s284_s4 = scalar_lea.vmem [#allocation5], %s10574_s8  ;;  %s10839_s13 = scalar_lea.hbm %s11457_s1, 96 }
  0x41   : > { %s289_s30 = scalar_lea.hbm %s11457_s1, %s10575_s9  ;;  %s293_s25 = sshll.u32 %s284_s4, 4  ;;  %s294_s25 = int_to_ptr.vmem [resolvable:$true] %s293_s25 }
  0x42   : > { %s291_s16 = sshll.u32 %s289_s30, 4  ;;  %s292_s16 = int_to_ptr.hbm [resolvable:$true] %s291_s16 }
  0x43   : > { %s10832_s7 = sshra.s32 %s292_s16, 4  ;;  %s10833_s7 = int_to_ptr.hbm [resolvable:$true] %s10832_s7 }
  0x44   : > { %s10834_s0 = scalar_lea.hbm %s10833_s7, 48  ;;  %p10840_p11 = scmp.lt.s32.totalorder %s10833_s7, %s11457_s1 }
  0x45   : > { %p10835_p5 = scmp.ne.s32.totalorder %s10833_s7, %s10834_s0  ;;  %p10841_p13 = scmp.lt.s32.totalorder %s10839_s13, %s10834_s0 }
  0x47   : > { %p10837_p8 = pnand %p10835_p5, %p10806_p9  ;;  %p10842_p0 = por %p10841_p13, %p10840_p11 }
  0x49   : > { %p10838_p10 = pneg %p10837_p8 }
  0x4b   : > { %p10843_p2 = pnand %p10842_p0, %p10838_p10 }
  0x4d   : > { %10846 = shalt.err (!%p10843_p2)
}
  0x4e   : > { %10620 = dma.hbm_to_vmem [thread:$0]  (!%p11087_p7), %s292_s16, 768, %s294_s25, %s281_s26  }
  0x4f   : > { %302 = sbr.rel (%p11021_p3) target bundleno = 1341 (0x53d), region = 44  ;;  %s11130_s4 = sand.u32 (!%p11021_p3), 1, %s10936_s22  }
  0x50   : > { %s10576_s9 = smul.u32 (!%p11021_p3), 6, %s11130_s4  ;;  %s305_s10 = scalar_lea.sflag (!%p11021_p3), [#allocation3], %s11130_s4 }
  0x52   : > { %s11136_s0 = scalar_lea.vmem (!%p11021_p3), [#allocation2], %s10576_s9 }
  0x54   : > { %10907 = dma.done.wait (%p11068_p12), %s305_s10, 96  }
  0x55   : > { %10909 = vsyncadd (%p11068_p12), %s305_s10, 4294967200  ;;  %s314_s29 = sand.u32 1, %s11016_s28   ;;  %s10577_s27 = smul.u32 48, %s11130_s4 }
  0x56   : > { %s315_s3 = scalar_lea.sflag [#allocation6], %s314_s29 }
  0x57   : > { %s11144_s30 = scalar_lea.vmem [#allocation5], %s10577_s27 }
  0x58   : > { %10911 = dma.done.wait (%p11068_p12), %s315_s3, 768  }
  0x59   : > { %10913 = vsyncadd (%p11068_p12), %s315_s3, 4294966528 }
  0x5a   : > { %10915 = dma.done.wait (%p48_p1), [#allocation6], 24576  }
  0x5b   : > { %10917 = vsyncadd (%p48_p1), [#allocation6], 4294942720 }
  0x5c   : > { %10919 = dma.done.wait (%p48_p1), [#allocation9], 73728  }
  0x5d   : > { %10921 = vsyncadd (%p48_p1), [#allocation9], 4294893568 }
  0x5e   : > { %10923 = dma.done.wait (%p48_p1), [#allocation12], 96  }
  0x5f   : > { %10925 = vsyncadd (%p48_p1), [#allocation12], 4294967200  ;;  %v6828_v0 = vld [vmem:[#allocation7 + $0xe0] sm:$0xf]  ;;  %v9834_v1 = vld [vmem:[#allocation7 + $0xec] sm:$0xf0] }
  0x60   : > { %v6956_v2 = vld [vmem:[#allocation7 + $0x1e0] sm:$0xf]  ;;  %v6829_v3 = vor.u32 %v9834_v1, %v6828_v0  ;;  %v9866_v4 = vld [vmem:[#allocation7 + $0x1ec] sm:$0xf0]  ;;  %vm4914_vm12 = vcmask 64512   ;;  %vm6538_vm13 = vcmask 1040384  }
  0x61   : > { %v7084_v5 = vld [vmem:[#allocation7 + $0x2e0] sm:$0xf]  ;;  %v9898_v6 = vld [vmem:[#allocation7 + $0x2ec] sm:$0xf0]  ;;  %v6957_v7 = vor.u32 %v9866_v4, %v6956_v2  ;;  %vm6540_vm14 = vcmask 1041408   ;;  %s10578_s11 = smul.u32 6, %s11016_s28 }
  0x62   : > { %v7085_v8 = vor.u32 %v9898_v6, %v7084_v5  ;;  %v7212_v9 = vld [vmem:[#allocation7 + $0x3e0] sm:$0xf]  ;;  %v9930_v10 = vld [vmem:[#allocation7 + $0x3ec] sm:$0xf0]  ;;  %1557 = vmatpush.bf16.msra.mxu0 %v6829_v3  ;;  %vm6542_vm15 = vcmask 1043459   ;;  %s372_s26 = scalar_lea.vmem [#allocation13], %s10576_s9 }
  0x63   : > { %v6812_v11 = vld [vmem:[#allocation7 + $0xc0] sm:$0xf]  ;;  %v7213_v12 = vor.u32 %v9930_v10, %v7212_v9  ;;  %v9830_v13 = vld [vmem:[#allocation7 + $0xcc] sm:$0xf0]  ;;  %1570 = vmatpush.bf16.msra.mxu1 %v6957_v7  ;;  %s6565_s2 = scalar_lea.hbm %s11462_s6, %s10578_s11  ;;  %s6567_s7 = sshll.u32 %s372_s26, 4  ;;  %s6568_s7 = int_to_ptr.vmem [resolvable:$true] %s6567_s7 }
  0x64   : > { %v6940_v14 = vld [vmem:[#allocation7 + $0x1c0] sm:$0xf]  ;;  %v9862_v15 = vld [vmem:[#allocation7 + $0x1cc] sm:$0xf0]  ;;  %1583 = vmatpush.bf16.msra.mxu2 %v7085_v8  ;;  %v6813_v16 = vor.u32 %v9830_v13, %v6812_v11  ;;  %s6569_s28 = sshll.u32 %s6565_s2, 4  ;;  %s6555_s18 = scalar_lea.sflag [#allocation4], %s11130_s4  ;;  %s6570_s28 = int_to_ptr.hbm [resolvable:$true] %s6569_s28 }
  0x65   : > { %v6941_v17 = vor.u32 %v9862_v15, %v6940_v14  ;;  %v7068_v18 = vld [vmem:[#allocation7 + $0x2c0] sm:$0xf]  ;;  %v9894_v19 = vld [vmem:[#allocation7 + $0x2cc] sm:$0xf0]  ;;  %1596 = vmatpush.bf16.msra.mxu3 %v7213_v12  ;;  %s10876_s12 = sshra.s32 %s6570_s28, 4  ;;  %s10882_s9 = scalar_lea.hbm %s11462_s6, 12  ;;  %s10877_s12 = int_to_ptr.hbm [resolvable:$true] %s10876_s12 }
  0x66   : > { %v7196_v20 = vld [vmem:[#allocation7 + $0x3c0] sm:$0xf]  ;;  %v7069_v21 = vor.u32 %v9894_v19, %v7068_v18  ;;  %v9926_v22 = vld [vmem:[#allocation7 + $0x3cc] sm:$0xf0]  ;;  %1558 = vmatpush.bf16.msra.mxu0 %v6813_v16  ;;  %s10878_s13 = scalar_lea.hbm %s10877_s12, 6  ;;  %p10883_p7 = scmp.lt.s32.totalorder %s10877_s12, %s11462_s6 }
  0x67   : > { %v6796_v23 = vld [vmem:[#allocation7 + $0xa0] sm:$0xf]  ;;  %v9826_v24 = vld [vmem:[#allocation7 + $0xac] sm:$0xf0]  ;;  %v7197_v25 = vor.u32 %v9926_v22, %v7196_v20  ;;  %1571 = vmatpush.bf16.msra.mxu1 %v6941_v17  ;;  %p10879_p1 = scmp.ne.s32.totalorder %s10877_s12, %s10878_s13  ;;  %p10884_p9 = scmp.lt.s32.totalorder %s10882_s9, %s10878_s13 }
  0x68   : > { %v6924_v26 = vld [vmem:[#allocation7 + $0x1a0] sm:$0xf]  ;;  %v9858_v27 = vld [vmem:[#allocation7 + $0x1ac] sm:$0xf0]  ;;  %v6797_v29 = vor.u32 %v9826_v24, %v6796_v23  ;;  %1584 = vmatpush.bf16.msra.mxu2 %v7069_v21 }
  0x69   : > { %v7052_v28 = vld [vmem:[#allocation7 + $0x2a0] sm:$0xf]  ;;  %v9890_v30 = vld [vmem:[#allocation7 + $0x2ac] sm:$0xf0]  ;;  %v6925_v33 = vor.u32 %v9858_v27, %v6924_v26  ;;  %1597 = vmatpush.bf16.msra.mxu3 %v7197_v25  ;;  %p10880_p3 = pnand %p10879_p1, %p11077_p4  ;;  %p10885_p5 = por %p10884_p9, %p10883_p7 }
  0x6a   : > { %v7180_v31 = vld [vmem:[#allocation7 + $0x3a0] sm:$0xf]  ;;  %v9922_v32 = vld [vmem:[#allocation7 + $0x3ac] sm:$0xf0]  ;;  %v7053_v34 = vor.u32 %v9890_v30, %v7052_v28  ;;  %1559 = vmatpush.bf16.msra.mxu0 %v6797_v29 }
  0x6b   : > { %v6780_v35 = vld [vmem:[#allocation7 + $0x80] sm:$0xf]  ;;  %v9822_v36 = vld [vmem:[#allocation7 + $0x8c] sm:$0xf0]  ;;  %v7181_v38 = vor.u32 %v9922_v32, %v7180_v31  ;;  %1572 = vmatpush.bf16.msra.mxu1 %v6925_v33  ;;  %v9832_v33 = vld [vmem:[#allocation7 + $0xe4] sm:$0xf]  ;;  %p10881_p12 = pneg %p10880_p3 }
  0x6c   : > { %v6908_v37 = vld [vmem:[#allocation7 + $0x180] sm:$0xf]  ;;  %v9854_v39 = vld [vmem:[#allocation7 + $0x18c] sm:$0xf0]  ;;  %v6781_v44 = vor.u32 %v9822_v36, %v6780_v35  ;;  %1585 = vmatpush.bf16.msra.mxu2 %v7053_v34  ;;  %v6830_v34 = vld [vmem:[#allocation7 + $0xf0] sm:$0xf0] }
  0x6d   : > { %v7036_v40 = vld [vmem:[#allocation7 + $0x280] sm:$0xf]  ;;  %v9886_v41 = vld [vmem:[#allocation7 + $0x28c] sm:$0xf0]  ;;  %v6909_v45 = vor.u32 %v9854_v39, %v6908_v37  ;;  %1598 = vmatpush.bf16.msra.mxu3 %v7181_v38  ;;  %v9864_v37 = vld [vmem:[#allocation7 + $0x1e4] sm:$0xf]  ;;  %p10886_p8 = pnand %p10885_p5, %p10881_p12 }
  0x6e   : > { %v7164_v42 = vld [vmem:[#allocation7 + $0x380] sm:$0xf]  ;;  %v9918_v43 = vld [vmem:[#allocation7 + $0x38c] sm:$0xf0]  ;;  %v7037_v46 = vor.u32 %v9886_v41, %v7036_v40  ;;  %1560 = vmatpush.bf16.msra.mxu0 %v6781_v44  ;;  %v6958_v38 = vld [vmem:[#allocation7 + $0x1f0] sm:$0xf0] }
  0x6f   : > { %v6764_v47 = vld [vmem:[#allocation7 + $0x60] sm:$0xf]  ;;  %v9818_v48 = vld [vmem:[#allocation7 + $0x6c] sm:$0xf0]  ;;  %v7165_v50 = vor.u32 %v9918_v43, %v7164_v42  ;;  %1573 = vmatpush.bf16.msra.mxu1 %v6909_v45  ;;  %v6833_v42 = vor.u32 %v9832_v33, %v6830_v34 }
  0x70   : > { %v6892_v49 = vld [vmem:[#allocation7 + $0x160] sm:$0xf]  ;;  %v9850_v51 = vld [vmem:[#allocation7 + $0x16c] sm:$0xf0]  ;;  %v6765_v56 = vor.u32 %v9818_v48, %v6764_v47  ;;  %1586 = vmatpush.bf16.msra.mxu2 %v7037_v46  ;;  %v6961_v46 = vor.u32 %v9864_v37, %v6958_v38  ;;  %v9828_v48 = vld [vmem:[#allocation7 + $0xc4] sm:$0xf] }
  0x71   : > { %v7020_v52 = vld [vmem:[#allocation7 + $0x260] sm:$0xf]  ;;  %v9882_v53 = vld [vmem:[#allocation7 + $0x26c] sm:$0xf0]  ;;  %v6893_v57 = vor.u32 %v9850_v51, %v6892_v49  ;;  %1599 = vmatpush.bf16.msra.mxu3 %v7165_v50  ;;  %v6814_v49 = vld [vmem:[#allocation7 + $0xd0] sm:$0xf0] }
  0x72   : > { %v7148_v54 = vld [vmem:[#allocation7 + $0x360] sm:$0xf]  ;;  %v9914_v55 = vld [vmem:[#allocation7 + $0x36c] sm:$0xf0]  ;;  %v7021_v58 = vor.u32 %v9882_v53, %v7020_v52  ;;  %1561 = vmatpush.bf16.msra.mxu0 %v6765_v56  ;;  %v9860_v50 = vld [vmem:[#allocation7 + $0x1c4] sm:$0xf] }
  0x73   : > { %v6748_v59 = vld [vmem:[#allocation7 + $0x40] sm:$0xf]  ;;  %v9814_v60 = vld [vmem:[#allocation7 + $0x4c] sm:$0xf0]  ;;  %v7149_v62 = vor.u32 %v9914_v55, %v7148_v54  ;;  %1574 = vmatpush.bf16.msra.mxu1 %v6893_v57  ;;  %v6942_v51 = vld [vmem:[#allocation7 + $0x1d0] sm:$0xf0]  ;;  %v6817_v55 = vor.u32 %v9828_v48, %v6814_v49 }
  0x74   : > { %v6876_v61 = vld [vmem:[#allocation7 + $0x140] sm:$0xf]  ;;  %v9846_v63 = vld [vmem:[#allocation7 + $0x14c] sm:$0xf0]  ;;  %v6749_v4 = vor.u32 %v9814_v60, %v6748_v59  ;;  %1587 = vmatpush.bf16.msra.mxu2 %v7021_v58  ;;  %v6945_v59 = vor.u32 %v9860_v50, %v6942_v51  ;;  %v9824_v60 = vld [vmem:[#allocation7 + $0xa4] sm:$0xf] }
  0x75   : > { %v7004_v0 = vld [vmem:[#allocation7 + $0x240] sm:$0xf]  ;;  %v9878_v1 = vld [vmem:[#allocation7 + $0x24c] sm:$0xf0]  ;;  %v6877_v5 = vor.u32 %v9846_v63, %v6876_v61  ;;  %1600 = vmatpush.bf16.msra.mxu3 %v7149_v62  ;;  %v6798_v61 = vld [vmem:[#allocation7 + $0xb0] sm:$0xf0] }
  0x76   : > { %v7132_v2 = vld [vmem:[#allocation7 + $0x340] sm:$0xf]  ;;  %v9910_v3 = vld [vmem:[#allocation7 + $0x34c] sm:$0xf0]  ;;  %v7005_v6 = vor.u32 %v9878_v1, %v7004_v0  ;;  %1562 = vmatpush.bf16.msra.mxu0 %v6749_v4  ;;  %v9856_v62 = vld [vmem:[#allocation7 + $0x1a4] sm:$0xf] }
  0x77   : > { %v6732_v7 = vld [vmem:[#allocation7 + $0x20] sm:$0xf]  ;;  %v9810_v8 = vld [vmem:[#allocation7 + $0x2c] sm:$0xf0]  ;;  %v7133_v10 = vor.u32 %v9910_v3, %v7132_v2  ;;  %1575 = vmatpush.bf16.msra.mxu1 %v6877_v5  ;;  %v6926_v63 = vld [vmem:[#allocation7 + $0x1b0] sm:$0xf0]  ;;  %v6801_v5 = vor.u32 %v9824_v60, %v6798_v61 }
  0x78   : > { %v6860_v9 = vld [vmem:[#allocation7 + $0x120] sm:$0xf]  ;;  %v9842_v11 = vld [vmem:[#allocation7 + $0x12c] sm:$0xf0]  ;;  %v6733_v16 = vor.u32 %v9810_v8, %v6732_v7  ;;  %1588 = vmatpush.bf16.msra.mxu2 %v7005_v6  ;;  %v11163_v4 = vld [vmem:[%s11136_s0] sm:$0x3f] }
  0x79   : > { %v6988_v12 = vld [vmem:[#allocation7 + $0x220] sm:$0xf]  ;;  %v9874_v13 = vld [vmem:[#allocation7 + $0x22c] sm:$0xf0]  ;;  %v6861_v19 = vor.u32 %v9842_v11, %v6860_v9  ;;  %1601 = vmatpush.bf16.msra.mxu3 %v7133_v10  ;;  %v377_v7 = vperm.slane %v11163_v4, 2  ;;  %v375_v8 = vperm.slane %v11163_v4, 0  ;;  %v6929_v10 = vor.u32 %v9856_v62, %v6926_v63 }
  0x7a   : > { %v7116_v14 = vld [vmem:[#allocation7 + $0x320] sm:$0xf]  ;;  %v9906_v15 = vld [vmem:[#allocation7 + $0x32c] sm:$0xf0]  ;;  %v6989_v20 = vor.u32 %v9874_v13, %v6988_v12  ;;  %1563 = vmatpush.bf16.msra.mxu0 %v6733_v16  ;;  %v378_v9 = vperm.slane %v11163_v4, 3  ;;  %v379_v60 = vperm.slane %v11163_v4, 4 }
  0x7b   : > { %v6716_v17 = vld [vmem:[#allocation7] sm:$0xf]  ;;  %v9806_v18 = vld [vmem:[#allocation7 + $0xc] sm:$0xf0]  ;;  %v7117_v24 = vor.u32 %v9906_v15, %v7116_v14  ;;  %1576 = vmatpush.bf16.msra.mxu1 %v6861_v19  ;;  %v9820_v12 = vld [vmem:[#allocation7 + $0x84] sm:$0xf]  ;;  %v11168_v16 = vpack.c.bf16 %v377_v7, %v377_v7 }
  0x7c   : > { %v6844_v21 = vld [vmem:[#allocation7 + $0x100] sm:$0xf]  ;;  %v9838_v22 = vld [vmem:[#allocation7 + $0x10c] sm:$0xf0]  ;;  %v6717_v31 = vor.u32 %v9806_v18, %v6716_v17  ;;  %1589 = vmatpush.bf16.msra.mxu2 %v6989_v20  ;;  %v6782_v13 = vld [vmem:[#allocation7 + $0x90] sm:$0xf0]  ;;  %v11170_v17 = vpack.c.bf16 %v375_v8, %v375_v8  ;;  %v11172_v18 = vpack.c.bf16 %v378_v9, %v378_v9 }
  0x7d   : > { %v6972_v23 = vld [vmem:[#allocation7 + $0x200] sm:$0xf]  ;;  %v9870_v25 = vld [vmem:[#allocation7 + $0x20c] sm:$0xf0]  ;;  %v6845_v35 = vor.u32 %v9838_v22, %v6844_v21  ;;  %1602 = vmatpush.bf16.msra.mxu3 %v7117_v24  ;;  %v9852_v14 = vld [vmem:[#allocation7 + $0x184] sm:$0xf]  ;;  %v6785_v22 = vor.u32 %v9820_v12, %v6782_v13 }
  0x7e   : > { %v7100_v26 = vld [vmem:[#allocation7 + $0x300] sm:$0xf]  ;;  %v9902_v27 = vld [vmem:[#allocation7 + $0x30c] sm:$0xf0]  ;;  %v6973_v36 = vor.u32 %v9870_v25, %v6972_v23  ;;  %1564 = vmatpush.bf16.msra.mxu0 %v6717_v31  ;;  %v6910_v15 = vld [vmem:[#allocation7 + $0x190] sm:$0xf0] }
  0x7f   : > { %v7340_v28 = vld [vmem:[#allocation7 + $0x4e0] sm:$0xf]  ;;  %v9962_v29 = vld [vmem:[#allocation7 + $0x4ec] sm:$0xf0]  ;;  %v7101_v39 = vor.u32 %v9902_v27, %v7100_v26  ;;  %1577 = vmatpush.bf16.msra.mxu1 %v6845_v35  ;;  %v376_v20 = vperm.slane %v11163_v4, 1  ;;  %v6913_v26 = vor.u32 %v9852_v14, %v6910_v15 }
  0x80   : > { %v7468_v30 = vld [vmem:[#allocation7 + $0x5e0] sm:$0xf]  ;;  %v9994_v32 = vld [vmem:[#allocation7 + $0x5ec] sm:$0xf0]  ;;  %v7341_v40 = vor.u32 %v9962_v29, %v7340_v28  ;;  %1590 = vmatpush.bf16.msra.mxu2 %v6973_v36  ;;  %v9816_v28 = vld [vmem:[#allocation7 + $0x64] sm:$0xf] }
  0x81   : > { %v7469_v41 = vor.u32 %v9994_v32, %v7468_v30  ;;  %v7324_v43 = vld [vmem:[#allocation7 + $0x4c0] sm:$0xf]  ;;  %v9958_v44 = vld [vmem:[#allocation7 + $0x4cc] sm:$0xf0]  ;;  %1603 = vmatpush.bf16.msra.mxu3 %v7101_v39  ;;  %v6766_v29 = vld [vmem:[#allocation7 + $0x70] sm:$0xf0]  ;;  %v11176_v30 = vpack.c.bf16 %v376_v20, %v376_v20  ;;  %1565 = vmatmul.bf16.vlgmr.msra.gmra.mxu0 %v11170_v17 }
  0x82   : > { %v7452_v45 = vld [vmem:[#allocation7 + $0x5c0] sm:$0xf]  ;;  %v9990_v47 = vld [vmem:[#allocation7 + $0x5cc] sm:$0xf0]  ;;  %1609 = vmatpush.bf16.msrb.mxu0 %v7341_v40  ;;  %v7325_v52 = vor.u32 %v9958_v44, %v7324_v43  ;;  %v9848_v31 = vld [vmem:[#allocation7 + $0x164] sm:$0xf]  ;;  %v6769_v35 = vor.u32 %v9816_v28, %v6766_v29 }
  0x83   : > { %v7308_v53 = vld [vmem:[#allocation7 + $0x4a0] sm:$0xf]  ;;  %1622 = vmatpush.bf16.msrb.mxu1 %v7469_v41  ;;  %v7453_v54 = vor.u32 %v9990_v47, %v7452_v45  ;;  %v9954_v56 = vld [vmem:[#allocation7 + $0x4ac] sm:$0xf0]  ;;  %1591 = vmatmul.bf16.vlgmr.msra.gmra.mxu2 %v11168_v16  ;;  %v6894_v32 = vld [vmem:[#allocation7 + $0x170] sm:$0xf0] }
  0x84   : > { %1635 = vmatpush.bf16.msrb.mxu2 %v6833_v42  ;;  %v7436_v57 = vld [vmem:[#allocation7 + $0x5a0] sm:$0xf]  ;;  %v9986_v58 = vld [vmem:[#allocation7 + $0x5ac] sm:$0xf0]  ;;  %v7309_v0 = vor.u32 %v9954_v56, %v7308_v53  ;;  %1604 = vmatmul.bf16.vlgmr.msra.gmra.mxu3 %v11172_v18  ;;  %v6897_v39 = vor.u32 %v9848_v31, %v6894_v32  ;;  %v9812_v41 = vld [vmem:[#allocation7 + $0x44] sm:$0xf] }
  0x85   : > { %1648 = vmatpush.bf16.msrb.mxu3 %v6961_v46  ;;  %v7437_v1 = vor.u32 %v9986_v58, %v7436_v57  ;;  %v7292_v2 = vld [vmem:[#allocation7 + $0x480] sm:$0xf]  ;;  %v9950_v3 = vld [vmem:[#allocation7 + $0x48c] sm:$0xf0]  ;;  %1578 = vmatmul.bf16.vlgmr.msra.gmra.mxu1 %v11176_v30  ;;  %v6750_v42 = vld [vmem:[#allocation7 + $0x50] sm:$0xf0] }
  0x86   : > { %1610 = vmatpush.bf16.msrb.mxu0 %v7325_v52  ;;  %v7420_v6 = vld [vmem:[#allocation7 + $0x580] sm:$0xf]  ;;  %v9982_v11 = vld [vmem:[#allocation7 + $0x58c] sm:$0xf0]  ;;  %v7293_v19 = vor.u32 %v9950_v3, %v7292_v2  ;;  %v9844_v43 = vld [vmem:[#allocation7 + $0x144] sm:$0xf]  ;;  %v6753_v47 = vor.u32 %v9812_v41, %v6750_v42 }
  0x87   : > { %1623 = vmatpush.bf16.msrb.mxu1 %v7453_v54  ;;  %v7421_v21 = vor.u32 %v9982_v11, %v7420_v6  ;;  %v7276_v23 = vld [vmem:[#allocation7 + $0x460] sm:$0xf]  ;;  %v9946_v24 = vld [vmem:[#allocation7 + $0x46c] sm:$0xf0]  ;;  %v6878_v44 = vld [vmem:[#allocation7 + $0x150] sm:$0xf0] }
  0x88   : > { %1636 = vmatpush.bf16.msrb.mxu2 %v6817_v55  ;;  %v7404_v25 = vld [vmem:[#allocation7 + $0x560] sm:$0xf]  ;;  %v9978_v27 = vld [vmem:[#allocation7 + $0x56c] sm:$0xf0]  ;;  %v7277_v33 = vor.u32 %v9946_v24, %v7276_v23  ;;  %v6881_v51 = vor.u32 %v9844_v43, %v6878_v44  ;;  %v9808_v53 = vld [vmem:[#allocation7 + $0x24] sm:$0xf] }
  0x89   : > { %1649 = vmatpush.bf16.msrb.mxu3 %v6945_v59  ;;  %v7405_v34 = vor.u32 %v9978_v27, %v7404_v25  ;;  %v7260_v36 = vld [vmem:[#allocation7 + $0x440] sm:$0xf]  ;;  %v9942_v37 = vld [vmem:[#allocation7 + $0x44c] sm:$0xf0]  ;;  %v6734_v54 = vld [vmem:[#allocation7 + $0x30] sm:$0xf0] }
  0x8a   : > { %1611 = vmatpush.bf16.msrb.mxu0 %v7309_v0  ;;  %v7388_v38 = vld [vmem:[#allocation7 + $0x540] sm:$0xf]  ;;  %v9974_v40 = vld [vmem:[#allocation7 + $0x54c] sm:$0xf0]  ;;  %v7261_v45 = vor.u32 %v9942_v37, %v7260_v36  ;;  %v9840_v55 = vld [vmem:[#allocation7 + $0x124] sm:$0xf]  ;;  %v6737_v62 = vor.u32 %v9808_v53, %v6734_v54 }
  0x8b   : > { %1624 = vmatpush.bf16.msrb.mxu1 %v7437_v1  ;;  %v7389_v46 = vor.u32 %v9974_v40, %v7388_v38  ;;  %v7244_v48 = vld [vmem:[#allocation7 + $0x420] sm:$0xf]  ;;  %v9938_v49 = vld [vmem:[#allocation7 + $0x42c] sm:$0xf0]  ;;  %v6862_v56 = vld [vmem:[#allocation7 + $0x130] sm:$0xf0] }
  0x8c   : > { %1637 = vmatpush.bf16.msrb.mxu2 %v6801_v5  ;;  %v7372_v50 = vld [vmem:[#allocation7 + $0x520] sm:$0xf]  ;;  %v9970_v52 = vld [vmem:[#allocation7 + $0x52c] sm:$0xf0]  ;;  %v7245_v57 = vor.u32 %v9938_v49, %v7244_v48  ;;  %v9804_v1 = vld [vmem:[#allocation7 + $0x4] sm:$0xf]  ;;  %v6865_v2 = vor.u32 %v9840_v55, %v6862_v56 }
  0x8d   : > { %1650 = vmatpush.bf16.msrb.mxu3 %v6929_v10  ;;  %v7228_v58 = vld [vmem:[#allocation7 + $0x400] sm:$0xf]  ;;  %v9934_v59 = vld [vmem:[#allocation7 + $0x40c] sm:$0xf0]  ;;  %v7373_v61 = vor.u32 %v9970_v52, %v7372_v50  ;;  %v6718_v3 = vld [vmem:[#allocation7 + $0x10] sm:$0xf0] }
  0x8e   : > { %1612 = vmatpush.bf16.msrb.mxu0 %v7293_v19  ;;  %v7356_v63 = vld [vmem:[#allocation7 + $0x500] sm:$0xf]  ;;  %v9966_v0 = vld [vmem:[#allocation7 + $0x50c] sm:$0xf0]  ;;  %v9836_v5 = vld [vmem:[#allocation7 + $0x104] sm:$0xf]  ;;  %v7229_v10 = vor.u32 %v9934_v59, %v7228_v58  ;;  %v6721_v15 = vor.u32 %v9804_v1, %v6718_v3 }
  0x8f   : > { %1625 = vmatpush.bf16.msrb.mxu1 %v7421_v21  ;;  %v6846_v6 = vld [vmem:[#allocation7 + $0x110] sm:$0xf0]  ;;  %v9896_v7 = vld [vmem:[#allocation7 + $0x2e4] sm:$0xf]  ;;  %v7357_v14 = vor.u32 %v9966_v0, %v7356_v63  ;;  %v380_v21 = vperm.slane %v11163_v4, 5 }
  0x90   : > { %1638 = vmatpush.bf16.msrb.mxu2 %v6785_v22  ;;  %v7086_v8 = vld [vmem:[#allocation7 + $0x2f0] sm:$0xf0]  ;;  %v9928_v9 = vld [vmem:[#allocation7 + $0x3e4] sm:$0xf]  ;;  %v6849_v22 = vor.u32 %v9836_v5, %v6846_v6 }
  0x91   : > { %1651 = vmatpush.bf16.msrb.mxu3 %v6913_v26  ;;  %v7214_v11 = vld [vmem:[#allocation7 + $0x3f0] sm:$0xf0]  ;;  %v9960_v12 = vld [vmem:[#allocation7 + $0x4e4] sm:$0xf]  ;;  %v7089_v23 = vor.u32 %v9896_v7, %v7086_v8  ;;  %v11185_v4 = vpack.c.bf16 %v380_v21, %v380_v21 }
  0x92   : > { %1613 = vmatpush.bf16.msrb.mxu0 %v7277_v33  ;;  %v7342_v13 = vld [vmem:[#allocation7 + $0x4f0] sm:$0xf0]  ;;  %v9992_v19 = vld [vmem:[#allocation7 + $0x5e4] sm:$0xf]  ;;  %v7217_v24 = vor.u32 %v9928_v9, %v7214_v11 }
  0x93   : > { %1626 = vmatpush.bf16.msrb.mxu1 %v7405_v34  ;;  %v7470_v20 = vld [vmem:[#allocation7 + $0x5f0] sm:$0xf0]  ;;  %v7345_v25 = vor.u32 %v9960_v12, %v7342_v13  ;;  %v9892_v26 = vld [vmem:[#allocation7 + $0x2c4] sm:$0xf]  ;;  %v11183_v34 = vpack.c.bf16 %v379_v60, %v379_v60 }
  0x94   : > { %1639 = vmatpush.bf16.msrb.mxu2 %v6769_v35  ;;  %v7070_v27 = vld [vmem:[#allocation7 + $0x2d0] sm:$0xf0]  ;;  %v9924_v28 = vld [vmem:[#allocation7 + $0x3c4] sm:$0xf]  ;;  %v7473_v29 = vor.u32 %v9992_v19, %v7470_v20 }
  0x95   : > { %1652 = vmatpush.bf16.msrb.mxu3 %v6897_v39  ;;  %v7198_v31 = vld [vmem:[#allocation7 + $0x3d0] sm:$0xf0]  ;;  %v9956_v32 = vld [vmem:[#allocation7 + $0x4c4] sm:$0xf]  ;;  %v7073_v37 = vor.u32 %v9892_v26, %v7070_v27 }
  0x96   : > { %1614 = vmatpush.bf16.msrb.mxu0 %v7261_v45  ;;  %v7326_v33 = vld [vmem:[#allocation7 + $0x4d0] sm:$0xf0]  ;;  %v9988_v35 = vld [vmem:[#allocation7 + $0x5c4] sm:$0xf]  ;;  %v7201_v38 = vor.u32 %v9924_v28, %v7198_v31 }
  0x97   : > { %1627 = vmatpush.bf16.msrb.mxu1 %v7389_v46  ;;  %v7454_v36 = vld [vmem:[#allocation7 + $0x5d0] sm:$0xf0]  ;;  %v7329_v39 = vor.u32 %v9956_v32, %v7326_v33  ;;  %v9888_v40 = vld [vmem:[#allocation7 + $0x2a4] sm:$0xf] }
  0x98   : > { %1640 = vmatpush.bf16.msrb.mxu2 %v6753_v47  ;;  %v7054_v41 = vld [vmem:[#allocation7 + $0x2b0] sm:$0xf0]  ;;  %v9920_v42 = vld [vmem:[#allocation7 + $0x3a4] sm:$0xf]  ;;  %v7457_v43 = vor.u32 %v9988_v35, %v7454_v36 }
  0x99   : > { %1653 = vmatpush.bf16.msrb.mxu3 %v6881_v51  ;;  %v7182_v44 = vld [vmem:[#allocation7 + $0x3b0] sm:$0xf0]  ;;  %v9952_v45 = vld [vmem:[#allocation7 + $0x4a4] sm:$0xf]  ;;  %v7057_v49 = vor.u32 %v9888_v40, %v7054_v41 }
  0x9a   : > { %1615 = vmatpush.bf16.msrb.mxu0 %v7245_v57  ;;  %v7310_v46 = vld [vmem:[#allocation7 + $0x4b0] sm:$0xf0]  ;;  %v9984_v47 = vld [vmem:[#allocation7 + $0x5a4] sm:$0xf]  ;;  %v7185_v50 = vor.u32 %v9920_v42, %v7182_v44 }
  0x9b   : > { %1628 = vmatpush.bf16.msrb.mxu1 %v7373_v61  ;;  %v7438_v48 = vld [vmem:[#allocation7 + $0x5b0] sm:$0xf0]  ;;  %v7313_v51 = vor.u32 %v9952_v45, %v7310_v46  ;;  %v9884_v52 = vld [vmem:[#allocation7 + $0x284] sm:$0xf] }
  0x9c   : > { %1641 = vmatpush.bf16.msrb.mxu2 %v6737_v62  ;;  %v7038_v53 = vld [vmem:[#allocation7 + $0x290] sm:$0xf0]  ;;  %v9916_v54 = vld [vmem:[#allocation7 + $0x384] sm:$0xf]  ;;  %v7441_v55 = vor.u32 %v9984_v47, %v7438_v48 }
  0x9d   : > { %1654 = vmatpush.bf16.msrb.mxu3 %v6865_v2  ;;  %v7166_v56 = vld [vmem:[#allocation7 + $0x390] sm:$0xf0]  ;;  %v9948_v57 = vld [vmem:[#allocation7 + $0x484] sm:$0xf]  ;;  %v7041_v61 = vor.u32 %v9884_v52, %v7038_v53  ;;  %v9835_v52 = vld [vmem:[#allocation7 + $0xf4] sm:$0xf0] }
  0x9e   : > { %1616 = vmatpush.bf16.msrb.mxu0 %v7229_v10  ;;  %v7294_v58 = vld [vmem:[#allocation7 + $0x490] sm:$0xf0]  ;;  %v9980_v59 = vld [vmem:[#allocation7 + $0x584] sm:$0xf]  ;;  %v7169_v62 = vor.u32 %v9916_v54, %v7166_v56  ;;  %v6964_v53 = vld [vmem:[#allocation7 + $0x1e8] sm:$0xf] }
  0x9f   : > { %1629 = vmatpush.bf16.msrb.mxu1 %v7357_v14  ;;  %v7422_v60 = vld [vmem:[#allocation7 + $0x590] sm:$0xf0]  ;;  %v7297_v63 = vor.u32 %v9948_v57, %v7294_v58  ;;  %v9880_v0 = vld [vmem:[#allocation7 + $0x264] sm:$0xf]  ;;  %v7092_v56 = vld [vmem:[#allocation7 + $0x2e8] sm:$0xf] }
  0xa0   : > { %1642 = vmatpush.bf16.msrb.mxu2 %v6721_v15  ;;  %v7022_v1 = vld [vmem:[#allocation7 + $0x270] sm:$0xf0]  ;;  %v9912_v2 = vld [vmem:[#allocation7 + $0x364] sm:$0xf]  ;;  %v7425_v3 = vor.u32 %v9980_v59, %v7422_v60  ;;  %v9899_v57 = vld [vmem:[#allocation7 + $0x2f4] sm:$0xf0] }
  0xa1   : > { %1655 = vmatpush.bf16.msrb.mxu3 %v6849_v22  ;;  %1617 = vmatmul.bf16.vlgmr.msrb.gmra.mxu0 %v11183_v34  ;;  %v7150_v5 = vld [vmem:[#allocation7 + $0x370] sm:$0xf0]  ;;  %v9944_v6 = vld [vmem:[#allocation7 + $0x464] sm:$0xf]  ;;  %v7025_v10 = vor.u32 %v9880_v0, %v7022_v1  ;;  %v7220_v60 = vld [vmem:[#allocation7 + $0x3e8] sm:$0xf]  ;;  %v7093_v1 = vor.u32 %v9899_v57, %v7092_v56 }
  0xa2   : > { %1661 = vmatpush.bf16.msra.mxu0 %v7089_v23  ;;  %1630 = vmatmul.bf16.vlgmr.msrb.gmra.mxu1 %v11185_v4  ;;  %v7278_v7 = vld [vmem:[#allocation7 + $0x470] sm:$0xf0]  ;;  %v9976_v8 = vld [vmem:[#allocation7 + $0x564] sm:$0xf]  ;;  %v7153_v11 = vor.u32 %v9912_v2, %v7150_v5  ;;  %v6820_v2 = vld [vmem:[#allocation7 + $0xc8] sm:$0xf] }
  0xa3   : > { %1674 = vmatpush.bf16.msra.mxu1 %v7217_v24  ;;  %1643 = vmatmul.bf16.vlgmr.msrb.gmra.mxu2 %v11170_v17  ;;  %v7406_v9 = vld [vmem:[#allocation7 + $0x570] sm:$0xf0]  ;;  %v7281_v12 = vor.u32 %v9944_v6, %v7278_v7  ;;  %v9876_v13 = vld [vmem:[#allocation7 + $0x244] sm:$0xf]  ;;  %v6948_v5 = vld [vmem:[#allocation7 + $0x1c8] sm:$0xf] }
  0xa4   : > { %1687 = vmatpush.bf16.msra.mxu2 %v7345_v25  ;;  %1656 = vmatmul.bf16.vlgmr.msrb.gmra.mxu3 %v11176_v30  ;;  %v7006_v14 = vld [vmem:[#allocation7 + $0x250] sm:$0xf0]  ;;  %v9908_v15 = vld [vmem:[#allocation7 + $0x344] sm:$0xf]  ;;  %v7409_v19 = vor.u32 %v9976_v8, %v7406_v9  ;;  %v9863_v7 = vld [vmem:[#allocation7 + $0x1d4] sm:$0xf0] }
  0xa5   : > { %1700 = vmatpush.bf16.msra.mxu3 %v7473_v29  ;;  %v7134_v20 = vld [vmem:[#allocation7 + $0x350] sm:$0xf0]  ;;  %v9940_v21 = vld [vmem:[#allocation7 + $0x444] sm:$0xf]  ;;  %v7009_v25 = vor.u32 %v9876_v13, %v7006_v14  ;;  %v7076_v8 = vld [vmem:[#allocation7 + $0x2c8] sm:$0xf]  ;;  %v6949_v13 = vor.u32 %v9863_v7, %v6948_v5 }
  0xa6   : > { %1662 = vmatpush.bf16.msra.mxu0 %v7073_v37  ;;  %v7262_v22 = vld [vmem:[#allocation7 + $0x450] sm:$0xf0]  ;;  %v9972_v23 = vld [vmem:[#allocation7 + $0x544] sm:$0xf]  ;;  %v7137_v26 = vor.u32 %v9908_v15, %v7134_v20  ;;  %v9895_v9 = vld [vmem:[#allocation7 + $0x2d4] sm:$0xf0] }
  0xa7   : > { %1675 = vmatpush.bf16.msra.mxu1 %v7201_v38  ;;  %v7390_v24 = vld [vmem:[#allocation7 + $0x550] sm:$0xf0]  ;;  %v7265_v27 = vor.u32 %v9940_v21, %v7262_v22  ;;  %v9872_v28 = vld [vmem:[#allocation7 + $0x224] sm:$0xf]  ;;  %v7077_v14 = vor.u32 %v9895_v9, %v7076_v8  ;;  %v6804_v15 = vld [vmem:[#allocation7 + $0xa8] sm:$0xf] }
  0xa8   : > { %1688 = vmatpush.bf16.msra.mxu2 %v7329_v39  ;;  %v6990_v29 = vld [vmem:[#allocation7 + $0x230] sm:$0xf0]  ;;  %v9904_v31 = vld [vmem:[#allocation7 + $0x324] sm:$0xf]  ;;  %v7393_v32 = vor.u32 %v9972_v23, %v7390_v24  ;;  %v6932_v20 = vld [vmem:[#allocation7 + $0x1a8] sm:$0xf] }
  0xa9   : > { %1701 = vmatpush.bf16.msra.mxu3 %v7457_v43  ;;  %v7118_v33 = vld [vmem:[#allocation7 + $0x330] sm:$0xf0]  ;;  %v9936_v35 = vld [vmem:[#allocation7 + $0x424] sm:$0xf]  ;;  %v6993_v39 = vor.u32 %v9872_v28, %v6990_v29  ;;  %v9859_v22 = vld [vmem:[#allocation7 + $0x1b4] sm:$0xf0] }
  0xaa   : > { %1663 = vmatpush.bf16.msra.mxu0 %v7057_v49  ;;  %v7246_v36 = vld [vmem:[#allocation7 + $0x430] sm:$0xf0]  ;;  %v9968_v37 = vld [vmem:[#allocation7 + $0x524] sm:$0xf]  ;;  %v7121_v42 = vor.u32 %v9904_v31, %v7118_v33  ;;  %v7060_v23 = vld [vmem:[#allocation7 + $0x2a8] sm:$0xf]  ;;  %v6933_v28 = vor.u32 %v9859_v22, %v6932_v20 }
  0xab   : > { %1676 = vmatpush.bf16.msra.mxu1 %v7185_v50  ;;  %v7374_v38 = vld [vmem:[#allocation7 + $0x530] sm:$0xf0]  ;;  %v9868_v40 = vld [vmem:[#allocation7 + $0x204] sm:$0xf]  ;;  %v7249_v43 = vor.u32 %v9936_v35, %v7246_v36  ;;  %v9891_v24 = vld [vmem:[#allocation7 + $0x2b4] sm:$0xf0] }
  0xac   : > { %1689 = vmatpush.bf16.msra.mxu2 %v7313_v51  ;;  %v6974_v41 = vld [vmem:[#allocation7 + $0x210] sm:$0xf0]  ;;  %v9900_v44 = vld [vmem:[#allocation7 + $0x304] sm:$0xf]  ;;  %v7377_v47 = vor.u32 %v9968_v37, %v7374_v38  ;;  %v6836_v51 = vld [vmem:[#allocation7 + $0xe8] sm:$0xf]  ;;  %v7061_v29 = vor.u32 %v9891_v24, %v7060_v23 }
  0xad   : > { %1702 = vmatpush.bf16.msra.mxu3 %v7441_v55  ;;  %v7102_v45 = vld [vmem:[#allocation7 + $0x310] sm:$0xf0]  ;;  %v9932_v46 = vld [vmem:[#allocation7 + $0x404] sm:$0xf]  ;;  %v6977_v54 = vor.u32 %v9868_v40, %v6974_v41  ;;  %v9867_v55 = vld [vmem:[#allocation7 + $0x1f4] sm:$0xf0] }
  0xae   : > { %1664 = vmatpush.bf16.msra.mxu0 %v7041_v61  ;;  %v7230_v48 = vld [vmem:[#allocation7 + $0x410] sm:$0xf0]  ;;  %v9964_v49 = vld [vmem:[#allocation7 + $0x504] sm:$0xf]  ;;  %v7105_v58 = vor.u32 %v9900_v44, %v7102_v45  ;;  %v9931_v61 = vld [vmem:[#allocation7 + $0x3f4] sm:$0xf0]  ;;  %v6965_v0 = vor.u32 %v9867_v55, %v6964_v53 }
  0xaf   : > { %1677 = vmatpush.bf16.msra.mxu1 %v7169_v62  ;;  %v7358_v50 = vld [vmem:[#allocation7 + $0x510] sm:$0xf0]  ;;  %v7233_v59 = vor.u32 %v9932_v46, %v7230_v48  ;;  %v7221_v6 = vor.u32 %v9931_v61, %v7220_v60  ;;  %v6788_v31 = vld [vmem:[#allocation7 + $0x88] sm:$0xf]  ;;  %v9855_v36 = vld [vmem:[#allocation7 + $0x194] sm:$0xf0] }
  0xb0   : > { %1690 = vmatpush.bf16.msra.mxu2 %v7297_v63  ;;  %v7361_v62 = vor.u32 %v9964_v49, %v7358_v50  ;;  %v6837_v63 = vor.u32 %v9835_v52, %v6836_v51  ;;  %v6916_v33 = vld [vmem:[#allocation7 + $0x188] sm:$0xf]  ;;  %v9887_v38 = vld [vmem:[#allocation7 + $0x294] sm:$0xf0] }
  0xb1   : > { %1703 = vmatpush.bf16.msra.mxu3 %v7425_v3  ;;  %v9831_v3 = vld [vmem:[#allocation7 + $0xd4] sm:$0xf0]  ;;  %v7044_v37 = vld [vmem:[#allocation7 + $0x288] sm:$0xf] }
  0xb2   : > { %1665 = vmatpush.bf16.msra.mxu0 %v7025_v10  ;;  %v7204_v10 = vld [vmem:[#allocation7 + $0x3c8] sm:$0xf]  ;;  %v9919_v40 = vld [vmem:[#allocation7 + $0x394] sm:$0xf0] }
  0xb3   : > { %1678 = vmatpush.bf16.msra.mxu1 %v7153_v11  ;;  %v9927_v11 = vld [vmem:[#allocation7 + $0x3d4] sm:$0xf0]  ;;  %v6772_v44 = vld [vmem:[#allocation7 + $0x68] sm:$0xf] }
  0xb4   : > { %1691 = vmatpush.bf16.msra.mxu2 %v7281_v12  ;;  %v6821_v12 = vor.u32 %v9831_v3, %v6820_v2  ;;  %v7205_v21 = vor.u32 %v9927_v11, %v7204_v10  ;;  %v9819_v45 = vld [vmem:[#allocation7 + $0x74] sm:$0xf0]  ;;  %v6900_v46 = vld [vmem:[#allocation7 + $0x168] sm:$0xf] }
  0xb5   : > { %1704 = vmatpush.bf16.msra.mxu3 %v7409_v19  ;;  %v9827_v19 = vld [vmem:[#allocation7 + $0xb4] sm:$0xf0]  ;;  %v7028_v49 = vld [vmem:[#allocation7 + $0x268] sm:$0xf]  ;;  %v6773_v53 = vor.u32 %v9819_v45, %v6772_v44 }
  0xb6   : > { %1666 = vmatpush.bf16.msra.mxu0 %v7009_v25  ;;  %v7188_v25 = vld [vmem:[#allocation7 + $0x3a8] sm:$0xf]  ;;  %v9851_v48 = vld [vmem:[#allocation7 + $0x174] sm:$0xf0] }
  0xb7   : > { %1679 = vmatpush.bf16.msra.mxu1 %v7137_v26  ;;  %v9923_v26 = vld [vmem:[#allocation7 + $0x3b4] sm:$0xf0]  ;;  %v7156_v51 = vld [vmem:[#allocation7 + $0x368] sm:$0xf] }
  0xb8   : > { %1692 = vmatpush.bf16.msra.mxu2 %v7265_v27  ;;  %v6805_v27 = vor.u32 %v9827_v19, %v6804_v15  ;;  %v7189_v35 = vor.u32 %v9923_v26, %v7188_v25  ;;  %v9883_v50 = vld [vmem:[#allocation7 + $0x274] sm:$0xf0]  ;;  %v6756_v56 = vld [vmem:[#allocation7 + $0x48] sm:$0xf] }
  0xb9   : > { %1705 = vmatpush.bf16.msra.mxu3 %v7393_v32  ;;  %v9823_v32 = vld [vmem:[#allocation7 + $0x94] sm:$0xf0]  ;;  %v7029_v55 = vor.u32 %v9883_v50, %v7028_v49  ;;  %v7012_v61 = vld [vmem:[#allocation7 + $0x248] sm:$0xf] }
  0xba   : > { %1667 = vmatpush.bf16.msra.mxu0 %v6993_v39  ;;  %v7172_v39 = vld [vmem:[#allocation7 + $0x388] sm:$0xf]  ;;  %v6789_v41 = vor.u32 %v9823_v32, %v6788_v31  ;;  %v9915_v52 = vld [vmem:[#allocation7 + $0x374] sm:$0xf0] }
  0xbb   : > { %1680 = vmatpush.bf16.msra.mxu1 %v7121_v42  ;;  %v6917_v42 = vor.u32 %v9855_v36, %v6916_v33  ;;  %v9815_v57 = vld [vmem:[#allocation7 + $0x54] sm:$0xf0]  ;;  %v6740_v5 = vld [vmem:[#allocation7 + $0x28] sm:$0xf]  ;;  %v9833_v36 = vld [vmem:[#allocation7 + $0xec] sm:$0xf] }
  0xbc   : > { %1693 = vmatpush.bf16.msra.mxu2 %v7249_v43  ;;  %v7045_v43 = vor.u32 %v9887_v38, %v7044_v37  ;;  %v9847_v60 = vld [vmem:[#allocation7 + $0x154] sm:$0xf0]  ;;  %v6868_v7 = vld [vmem:[#allocation7 + $0x128] sm:$0xf]  ;;  %v6838_v37 = vld [vmem:[#allocation7 + $0xf8] sm:$0xf0] }
  0xbd   : > { %1706 = vmatpush.bf16.msra.mxu3 %v7377_v47  ;;  %v7173_v47 = vor.u32 %v9919_v40, %v7172_v39  ;;  %v9843_v9 = vld [vmem:[#allocation7 + $0x134] sm:$0xf0]  ;;  %v6996_v10 = vld [vmem:[#allocation7 + $0x228] sm:$0xf]  ;;  %v9865_v40 = vld [vmem:[#allocation7 + $0x1ec] sm:$0xf]  ;;  %v6841_v45 = vor.u32 %v9833_v36, %v6838_v37 }
  0xbe   : > { %1668 = vmatpush.bf16.msra.mxu0 %v6977_v54  ;;  %v6901_v54 = vor.u32 %v9851_v48, %v6900_v46  ;;  %v9875_v11 = vld [vmem:[#allocation7 + $0x234] sm:$0xf0]  ;;  %v6724_v15 = vld [vmem:[#allocation7 + $0x8] sm:$0xf]  ;;  %v6869_v20 = vor.u32 %v9843_v9, %v6868_v7 }
  0xbf   : > { %1681 = vmatpush.bf16.msra.mxu1 %v7105_v58  ;;  %v6884_v58 = vld [vmem:[#allocation7 + $0x148] sm:$0xf]  ;;  %v9807_v19 = vld [vmem:[#allocation7 + $0x14] sm:$0xf0] }
  0xc0   : > { %1694 = vmatpush.bf16.msra.mxu2 %v7233_v59  ;;  %v7157_v59 = vor.u32 %v9915_v52, %v7156_v51  ;;  %v6885_v2 = vor.u32 %v9847_v60, %v6884_v58  ;;  %v6852_v22 = vld [vmem:[#allocation7 + $0x108] sm:$0xf]  ;;  %v9839_v23 = vld [vmem:[#allocation7 + $0x114] sm:$0xf0]  ;;  %v6725_v33 = vor.u32 %v9807_v19, %v6724_v15  ;;  %v9829_v51 = vld [vmem:[#allocation7 + $0xcc] sm:$0xf] }
  0xc1   : > { %1707 = vmatpush.bf16.msra.mxu3 %v7361_v62  ;;  %1669 = vmatmul.bf16.vlgmr.msra.gmra.mxu0 %v11168_v16  ;;  %v9879_v62 = vld [vmem:[#allocation7 + $0x254] sm:$0xf0]  ;;  %v6980_v24 = vld [vmem:[#allocation7 + $0x208] sm:$0xf]  ;;  %v6853_v38 = vor.u32 %v9839_v23, %v6852_v22  ;;  %v6822_v52 = vld [vmem:[#allocation7 + $0xd8] sm:$0xf0] }
  0xc2   : > { %1713 = vmatpush.bf16.msrb.mxu0 %v6837_v63  ;;  %1682 = vmatmul.bf16.vlgmr.msra.gmra.mxu1 %v11172_v18  ;;  %v7140_v63 = vld [vmem:[#allocation7 + $0x348] sm:$0xf]  ;;  %v7013_v3 = vor.u32 %v9879_v62, %v7012_v61  ;;  %v9871_v26 = vld [vmem:[#allocation7 + $0x214] sm:$0xf0]  ;;  %v6918_v15 = vld [vmem:[#allocation7 + $0x198] sm:$0xf0] }
  0xc3   : > { %1726 = vmatpush.bf16.msrb.mxu1 %v6965_v0  ;;  %1695 = vmatmul.bf16.vlgmr.msra.gmra.mxu2 %v11183_v34  ;;  %v9911_v0 = vld [vmem:[#allocation7 + $0x354] sm:$0xf0]  ;;  %v7476_v32 = vld [vmem:[#allocation7 + $0x5e8] sm:$0xf]  ;;  %v6981_v39 = vor.u32 %v9871_v26, %v6980_v24 }
  0xc4   : > { %1739 = vmatpush.bf16.msrb.mxu2 %v7093_v1  ;;  %1708 = vmatmul.bf16.vlgmr.msra.gmra.mxu3 %v11185_v4  ;;  %v6757_v1 = vor.u32 %v9815_v57, %v6756_v56  ;;  %v7141_v8 = vor.u32 %v9911_v0, %v7140_v63  ;;  %v9963_v31 = vld [vmem:[#allocation7 + $0x4f4] sm:$0xf0]  ;;  %v7332_v46 = vld [vmem:[#allocation7 + $0x4c8] sm:$0xf]  ;;  %v6825_v57 = vor.u32 %v9829_v51, %v6822_v52  ;;  %v9825_v63 = vld [vmem:[#allocation7 + $0xac] sm:$0xf] }
  0xc5   : > { %1752 = vmatpush.bf16.msrb.mxu3 %v7221_v6  ;;  %v9811_v6 = vld [vmem:[#allocation7 + $0x34] sm:$0xf0]  ;;  %v7460_v48 = vld [vmem:[#allocation7 + $0x5c8] sm:$0xf]  ;;  %v6806_v0 = vld [vmem:[#allocation7 + $0xb8] sm:$0xf0] }
  0xc6   : > { %1714 = vmatpush.bf16.msrb.mxu0 %v6821_v12  ;;  %v7124_v12 = vld [vmem:[#allocation7 + $0x328] sm:$0xf]  ;;  %v9991_v50 = vld [vmem:[#allocation7 + $0x5d4] sm:$0xf0] }
  0xc7   : > { %1727 = vmatpush.bf16.msrb.mxu1 %v6949_v13  ;;  %v9907_v13 = vld [vmem:[#allocation7 + $0x334] sm:$0xf0]  ;;  %v7461_v56 = vor.u32 %v9991_v50, %v7460_v48  ;;  %v7316_v58 = vld [vmem:[#allocation7 + $0x4a8] sm:$0xf] }
  0xc8   : > { %1740 = vmatpush.bf16.msrb.mxu2 %v7077_v14  ;;  %v6741_v14 = vor.u32 %v9811_v6, %v6740_v5  ;;  %v7125_v25 = vor.u32 %v9907_v13, %v7124_v12  ;;  %v7444_v60 = vld [vmem:[#allocation7 + $0x5a8] sm:$0xf]  ;;  %v9987_v62 = vld [vmem:[#allocation7 + $0x5b4] sm:$0xf0]  ;;  %v6809_v6 = vor.u32 %v9825_v63, %v6806_v0  ;;  %v9821_v12 = vld [vmem:[#allocation7 + $0x8c] sm:$0xf] }
  0xc9   : > { %1753 = vmatpush.bf16.msrb.mxu3 %v7205_v21  ;;  %v6997_v21 = vor.u32 %v9875_v11, %v6996_v10  ;;  %v7445_v5 = vor.u32 %v9987_v62, %v7444_v60  ;;  %v7300_v7 = vld [vmem:[#allocation7 + $0x488] sm:$0xf]  ;;  %v9983_v11 = vld [vmem:[#allocation7 + $0x594] sm:$0xf0]  ;;  %v6790_v13 = vld [vmem:[#allocation7 + $0x98] sm:$0xf0] }
  0xca   : > { %1715 = vmatpush.bf16.msrb.mxu0 %v6805_v27  ;;  %v7108_v27 = vld [vmem:[#allocation7 + $0x308] sm:$0xf]  ;;  %v9947_v23 = vld [vmem:[#allocation7 + $0x474] sm:$0xf0]  ;;  %v9805_v0 = vld [vmem:[#allocation7 + $0xc] sm:$0xf] }
  0xcb   : > { %1728 = vmatpush.bf16.msrb.mxu1 %v6933_v28  ;;  %v9903_v28 = vld [vmem:[#allocation7 + $0x314] sm:$0xf0]  ;;  %v7428_v9 = vld [vmem:[#allocation7 + $0x588] sm:$0xf] }
  0xcc   : > { %1741 = vmatpush.bf16.msrb.mxu2 %v7061_v29  ;;  %v7348_v29 = vld [vmem:[#allocation7 + $0x4e8] sm:$0xf]  ;;  %v9979_v26 = vld [vmem:[#allocation7 + $0x574] sm:$0xf0] }
  0xcd   : > { %1754 = vmatpush.bf16.msrb.mxu3 %v7189_v35  ;;  %v9995_v35 = vld [vmem:[#allocation7 + $0x5f4] sm:$0xf0]  ;;  %v7284_v22 = vld [vmem:[#allocation7 + $0x468] sm:$0xf] }
  0xce   : > { %1716 = vmatpush.bf16.msrb.mxu0 %v6789_v41  ;;  %v6966_v41 = vld [vmem:[#allocation7 + $0x1f8] sm:$0xf0]  ;;  %v7477_v44 = vor.u32 %v9995_v35, %v7476_v32  ;;  %v7412_v24 = vld [vmem:[#allocation7 + $0x568] sm:$0xf]  ;;  %v7285_v32 = vor.u32 %v9947_v23, %v7284_v22  ;;  %v9943_v37 = vld [vmem:[#allocation7 + $0x454] sm:$0xf0] }
  0xcf   : > { %1729 = vmatpush.bf16.msrb.mxu1 %v6917_v42  ;;  %v7109_v42 = vor.u32 %v9903_v28, %v7108_v27  ;;  %v6969_v49 = vor.u32 %v9865_v40, %v6966_v41  ;;  %v9817_v27 = vld [vmem:[#allocation7 + $0x6c] sm:$0xf]  ;;  %v6774_v28 = vld [vmem:[#allocation7 + $0x78] sm:$0xf0]  ;;  %v7268_v36 = vld [vmem:[#allocation7 + $0x448] sm:$0xf] }
  0xd0   : > { %1742 = vmatpush.bf16.msrb.mxu2 %v7045_v43  ;;  %v7349_v43 = vor.u32 %v9963_v31, %v7348_v29  ;;  %v9849_v29 = vld [vmem:[#allocation7 + $0x16c] sm:$0xf]  ;;  %v6902_v31 = vld [vmem:[#allocation7 + $0x178] sm:$0xf0]  ;;  %v6777_v35 = vor.u32 %v9817_v27, %v6774_v28  ;;  %v9975_v40 = vld [vmem:[#allocation7 + $0x554] sm:$0xf0] }
  0xd1   : > { %1755 = vmatpush.bf16.msrb.mxu3 %v7173_v47  ;;  %v9959_v47 = vld [vmem:[#allocation7 + $0x4d4] sm:$0xf0]  ;;  %v9813_v41 = vld [vmem:[#allocation7 + $0x4c] sm:$0xf]  ;;  %v7252_v48 = vld [vmem:[#allocation7 + $0x428] sm:$0xf] }
  0xd2   : > { %1717 = vmatpush.bf16.msrb.mxu0 %v6773_v53  ;;  %v9861_v53 = vld [vmem:[#allocation7 + $0x1cc] sm:$0xf]  ;;  %v7380_v50 = vld [vmem:[#allocation7 + $0x528] sm:$0xf]  ;;  %v9971_v52 = vld [vmem:[#allocation7 + $0x534] sm:$0xf0] }
  0xd3   : > { %1730 = vmatpush.bf16.msrb.mxu1 %v6901_v54  ;;  %v6950_v54 = vld [vmem:[#allocation7 + $0x1d8] sm:$0xf0]  ;;  %v7381_v60 = vor.u32 %v9971_v52, %v7380_v50  ;;  %v7364_v62 = vld [vmem:[#allocation7 + $0x508] sm:$0xf]  ;;  %v9967_v63 = vld [vmem:[#allocation7 + $0x514] sm:$0xf0] }
  0xd4   : > { %1743 = vmatpush.bf16.msrb.mxu2 %v7029_v55  ;;  %v7333_v55 = vor.u32 %v9959_v47, %v7332_v46  ;;  %v6953_v61 = vor.u32 %v9861_v53, %v6950_v54  ;;  %v9809_v53 = vld [vmem:[#allocation7 + $0x2c] sm:$0xf]  ;;  %v6742_v54 = vld [vmem:[#allocation7 + $0x38] sm:$0xf0] }
  0xd5   : > { %1756 = vmatpush.bf16.msrb.mxu3 %v7157_v59  ;;  %v9955_v59 = vld [vmem:[#allocation7 + $0x4b4] sm:$0xf0]  ;;  %v7206_v28 = vld [vmem:[#allocation7 + $0x3d8] sm:$0xf0]  ;;  %v9885_v50 = vld [vmem:[#allocation7 + $0x28c] sm:$0xf] }
  0xd6   : > { %1718 = vmatpush.bf16.msrb.mxu0 %v6757_v1  ;;  %v9857_v1 = vld [vmem:[#allocation7 + $0x1ac] sm:$0xf] }
  0xd7   : > { %1731 = vmatpush.bf16.msrb.mxu1 %v6885_v2  ;;  %v6934_v2 = vld [vmem:[#allocation7 + $0x1b8] sm:$0xf0]  ;;  %v9917_v52 = vld [vmem:[#allocation7 + $0x38c] sm:$0xf] }
  0xd8   : > { %1744 = vmatpush.bf16.msrb.mxu2 %v7013_v3  ;;  %v7317_v3 = vor.u32 %v9955_v59, %v7316_v58  ;;  %v6937_v10 = vor.u32 %v9857_v1, %v6934_v2  ;;  %v7236_v58 = vld [vmem:[#allocation7 + $0x408] sm:$0xf]  ;;  %v9935_v59 = vld [vmem:[#allocation7 + $0x414] sm:$0xf0]  ;;  %v6726_v2 = vld [vmem:[#allocation7 + $0x18] sm:$0xf0] }
  0xd9   : > { %1757 = vmatpush.bf16.msrb.mxu3 %v7141_v8  ;;  %v9951_v8 = vld [vmem:[#allocation7 + $0x494] sm:$0xf0] }
  0xda   : > { %1719 = vmatpush.bf16.msrb.mxu0 %v6741_v14  ;;  %v9853_v14 = vld [vmem:[#allocation7 + $0x18c] sm:$0xf]  ;;  %v7301_v19 = vor.u32 %v9951_v8, %v7300_v7  ;;  %v7094_v7 = vld [vmem:[#allocation7 + $0x2f8] sm:$0xf0] }
  0xdb   : > { %1732 = vmatpush.bf16.msrb.mxu1 %v6869_v20  ;;  %v7429_v20 = vor.u32 %v9983_v11, %v7428_v9  ;;  %v9929_v8 = vld [vmem:[#allocation7 + $0x3ec] sm:$0xf]  ;;  %v7237_v9 = vor.u32 %v9935_v59, %v7236_v58  ;;  %v7430_v58 = vld [vmem:[#allocation7 + $0x598] sm:$0xf0] }
  0xdc   : > { %1745 = vmatpush.bf16.msrb.mxu2 %v6997_v21  ;;  %v6793_v21 = vor.u32 %v9821_v12, %v6790_v13  ;;  %v9961_v11 = vld [vmem:[#allocation7 + $0x4ec] sm:$0xf]  ;;  %v7350_v12 = vld [vmem:[#allocation7 + $0x4f8] sm:$0xf0]  ;;  %v7365_v13 = vor.u32 %v9967_v63, %v7364_v62 }
  0xdd   : > { %1758 = vmatpush.bf16.msrb.mxu3 %v7125_v25  ;;  %v6921_v25 = vor.u32 %v9853_v14, %v6918_v15  ;;  %v6729_v14 = vor.u32 %v9805_v0, %v6726_v2  ;;  %v9993_v15 = vld [vmem:[#allocation7 + $0x5ec] sm:$0xf]  ;;  %v7353_v23 = vor.u32 %v9961_v11, %v7350_v12  ;;  %v7158_v0 = vld [vmem:[#allocation7 + $0x378] sm:$0xf0] }
  0xde   : > { %1720 = vmatpush.bf16.msrb.mxu0 %v6725_v33  ;;  %v7413_v33 = vor.u32 %v9979_v26, %v7412_v24  ;;  %v9893_v24 = vld [vmem:[#allocation7 + $0x2cc] sm:$0xf]  ;;  %v7286_v2 = vld [vmem:[#allocation7 + $0x478] sm:$0xf0] }
  0xdf   : > { %1733 = vmatpush.bf16.msrb.mxu1 %v6853_v38  ;;  %v7396_v38 = vld [vmem:[#allocation7 + $0x548] sm:$0xf]  ;;  %v9925_v26 = vld [vmem:[#allocation7 + $0x3cc] sm:$0xf] }
  0xe0   : > { %1746 = vmatpush.bf16.msrb.mxu2 %v6981_v39  ;;  %v6905_v39 = vor.u32 %v9849_v29, %v6902_v31  ;;  %v7397_v46 = vor.u32 %v9975_v40, %v7396_v38  ;;  %v9957_v29 = vld [vmem:[#allocation7 + $0x4cc] sm:$0xf]  ;;  %v7334_v31 = vld [vmem:[#allocation7 + $0x4d8] sm:$0xf0] }
  0xe1   : > { %1759 = vmatpush.bf16.msrb.mxu3 %v7109_v42  ;;  %1721 = vmatmul.bf16.vlgmr.msrb.gmra.mxu0 %v11170_v17  ;;  %v6758_v42 = vld [vmem:[#allocation7 + $0x58] sm:$0xf0]  ;;  %v9889_v38 = vld [vmem:[#allocation7 + $0x2ac] sm:$0xf] }
  0xe2   : > { %1765 = vmatpush.bf16.msra.mxu0 %v7349_v43  ;;  %1734 = vmatmul.bf16.vlgmr.msrb.gmra.mxu1 %v11176_v30  ;;  %v9845_v43 = vld [vmem:[#allocation7 + $0x14c] sm:$0xf]  ;;  %v6761_v47 = vor.u32 %v9813_v41, %v6758_v42  ;;  %v7190_v42 = vld [vmem:[#allocation7 + $0x3b8] sm:$0xf0] }
  0xe3   : > { %1778 = vmatpush.bf16.msra.mxu1 %v7477_v44  ;;  %1747 = vmatmul.bf16.vlgmr.msrb.gmra.mxu2 %v11168_v16  ;;  %v6886_v44 = vld [vmem:[#allocation7 + $0x158] sm:$0xf0]  ;;  %v9921_v40 = vld [vmem:[#allocation7 + $0x3ac] sm:$0xf] }
  0xe4   : > { %1791 = vmatpush.bf16.msra.mxu2 %v6841_v45  ;;  %1760 = vmatmul.bf16.vlgmr.msrb.gmra.mxu3 %v11172_v18  ;;  %v7269_v45 = vor.u32 %v9943_v37, %v7268_v36  ;;  %v6889_v51 = vor.u32 %v9845_v43, %v6886_v44  ;;  %v7209_v36 = vor.u32 %v9925_v26, %v7206_v28  ;;  %v9953_v43 = vld [vmem:[#allocation7 + $0x4ac] sm:$0xf]  ;;  %v7318_v44 = vld [vmem:[#allocation7 + $0x4b8] sm:$0xf0] }
  0xe5   : > { %1804 = vmatpush.bf16.msra.mxu3 %v6969_v49  ;;  %v9939_v49 = vld [vmem:[#allocation7 + $0x434] sm:$0xf0]  ;;  %v7337_v37 = vor.u32 %v9957_v29, %v7334_v31  ;;  %v9913_v62 = vld [vmem:[#allocation7 + $0x36c] sm:$0xf]  ;;  %v6998_v26 = vld [vmem:[#allocation7 + $0x238] sm:$0xf0] }
  0xe6   : > { %1766 = vmatpush.bf16.msra.mxu0 %v7333_v55  ;;  %v9841_v55 = vld [vmem:[#allocation7 + $0x12c] sm:$0xf]  ;;  %v7126_v31 = vld [vmem:[#allocation7 + $0x338] sm:$0xf0] }
  0xe7   : > { %1779 = vmatpush.bf16.msra.mxu1 %v7461_v56  ;;  %v6870_v56 = vld [vmem:[#allocation7 + $0x138] sm:$0xf0]  ;;  %v9909_v11 = vld [vmem:[#allocation7 + $0x34c] sm:$0xf] }
  0xe8   : > { %1792 = vmatpush.bf16.msra.mxu2 %v6825_v57  ;;  %v7253_v57 = vor.u32 %v9939_v49, %v7252_v48  ;;  %v6873_v1 = vor.u32 %v9841_v55, %v6870_v56  ;;  %v7193_v48 = vor.u32 %v9921_v40, %v7190_v42  ;;  %v7321_v49 = vor.u32 %v9953_v43, %v7318_v44  ;;  %v9949_v55 = vld [vmem:[#allocation7 + $0x48c] sm:$0xf]  ;;  %v7302_v56 = vld [vmem:[#allocation7 + $0x498] sm:$0xf0] }
  0xe9   : > { %1805 = vmatpush.bf16.msra.mxu3 %v6953_v61  ;;  %v6745_v61 = vor.u32 %v9809_v53, %v6742_v54  ;;  %v7174_v54 = vld [vmem:[#allocation7 + $0x398] sm:$0xf0]  ;;  %v9901_v43 = vld [vmem:[#allocation7 + $0x30c] sm:$0xf] }
  0xea   : > { %1767 = vmatpush.bf16.msra.mxu0 %v7317_v3  ;;  %v9837_v3 = vld [vmem:[#allocation7 + $0x10c] sm:$0xf]  ;;  %v7177_v59 = vor.u32 %v9917_v52, %v7174_v54  ;;  %v6982_v40 = vld [vmem:[#allocation7 + $0x218] sm:$0xf0]  ;;  %v10056_v54 = vld [vmem:[#allocation8 + $0x1dc] sm:$0xf0] }
  0xeb   : > { %1780 = vmatpush.bf16.msra.mxu1 %v7445_v5  ;;  %v6854_v5 = vld [vmem:[#allocation7 + $0x118] sm:$0xf0] }
  0xec   : > { %1793 = vmatpush.bf16.msra.mxu2 %v6809_v6  ;;  %v9897_v6 = vld [vmem:[#allocation7 + $0x2ec] sm:$0xf]  ;;  %v7110_v44 = vld [vmem:[#allocation7 + $0x318] sm:$0xf0] }
  0xed   : > { %1806 = vmatpush.bf16.msra.mxu3 %v6937_v10  ;;  %v7222_v10 = vld [vmem:[#allocation7 + $0x3f8] sm:$0xf0] }
  0xee   : > { %1768 = vmatpush.bf16.msra.mxu0 %v7301_v19  ;;  %v7478_v19 = vld [vmem:[#allocation7 + $0x5f8] sm:$0xf0]  ;;  %v7225_v22 = vor.u32 %v9929_v8, %v7222_v10 }
  0xef   : > { %1781 = vmatpush.bf16.msra.mxu1 %v7429_v20  ;;  %v6857_v20 = vor.u32 %v9837_v3, %v6854_v5  ;;  %v7481_v27 = vor.u32 %v9993_v15, %v7478_v19  ;;  %v9977_v3 = vld [vmem:[#allocation7 + $0x56c] sm:$0xf]  ;;  %v7414_v5 = vld [vmem:[#allocation7 + $0x578] sm:$0xf0] }
  0xf0   : > { %1794 = vmatpush.bf16.msra.mxu2 %v6793_v21  ;;  %v7097_v21 = vor.u32 %v9897_v6, %v7094_v7  ;;  %v7161_v7 = vor.u32 %v9913_v62, %v7158_v0  ;;  %v7014_v10 = vld [vmem:[#allocation7 + $0x258] sm:$0xf0]  ;;  %v7417_v12 = vor.u32 %v9977_v3, %v7414_v5  ;;  %v9973_v19 = vld [vmem:[#allocation7 + $0x54c] sm:$0xf]  ;;  %v8476_v62 = vld [vmem:[#allocation8 + $0x7c0] sm:$0xf] }
  0xf1   : > { %1807 = vmatpush.bf16.msra.mxu3 %v6921_v25  ;;  %v7078_v25 = vld [vmem:[#allocation7 + $0x2d8] sm:$0xf0] }
  0xf2   : > { %1769 = vmatpush.bf16.msra.mxu0 %v7285_v32  ;;  %v9989_v32 = vld [vmem:[#allocation7 + $0x5cc] sm:$0xf]  ;;  %v7270_v15 = vld [vmem:[#allocation7 + $0x458] sm:$0xf0] }
  0xf3   : > { %1782 = vmatpush.bf16.msra.mxu1 %v7413_v33  ;;  %v7462_v33 = vld [vmem:[#allocation7 + $0x5d8] sm:$0xf0] }
  0xf4   : > { %1795 = vmatpush.bf16.msra.mxu2 %v6777_v35  ;;  %v7081_v35 = vor.u32 %v9893_v24, %v7078_v25  ;;  %v7465_v41 = vor.u32 %v9989_v32, %v7462_v33  ;;  %v9873_v25 = vld [vmem:[#allocation7 + $0x22c] sm:$0xf]  ;;  %v7254_v33 = vld [vmem:[#allocation7 + $0x438] sm:$0xf0] }
  0xf5   : > { %1808 = vmatpush.bf16.msra.mxu3 %v6905_v39  ;;  %v7062_v39 = vld [vmem:[#allocation7 + $0x2b8] sm:$0xf0]  ;;  %v9937_v32 = vld [vmem:[#allocation7 + $0x42c] sm:$0xf] }
  0xf6   : > { %1770 = vmatpush.bf16.msra.mxu0 %v7269_v45  ;;  %v9985_v45 = vld [vmem:[#allocation7 + $0x5ac] sm:$0xf]  ;;  %v7257_v42 = vor.u32 %v9937_v32, %v7254_v33  ;;  %v10232_v32 = vld [vmem:[#allocation8 + $0x75c] sm:$0xf0] }
  0xf7   : > { %1783 = vmatpush.bf16.msra.mxu1 %v7397_v46  ;;  %v7446_v46 = vld [vmem:[#allocation7 + $0x5b8] sm:$0xf0] }
  0xf8   : > { %1796 = vmatpush.bf16.msra.mxu2 %v6761_v47  ;;  %v7065_v47 = vor.u32 %v9889_v38, %v7062_v39  ;;  %v7449_v53 = vor.u32 %v9985_v45, %v7446_v46  ;;  %v7001_v38 = vor.u32 %v9873_v25, %v6998_v26  ;;  %v9869_v39 = vld [vmem:[#allocation7 + $0x20c] sm:$0xf]  ;;  %v7900_v25 = vld [vmem:[#allocation8 + $0x340] sm:$0xf] }
  0xf9   : > { %1809 = vmatpush.bf16.msra.mxu3 %v6889_v51  ;;  %v7046_v51 = vld [vmem:[#allocation7 + $0x298] sm:$0xf0]  ;;  %v9933_v45 = vld [vmem:[#allocation7 + $0x40c] sm:$0xf] }
  0xfa   : > { %1771 = vmatpush.bf16.msra.mxu0 %v7253_v57  ;;  %v9981_v57 = vld [vmem:[#allocation7 + $0x58c] sm:$0xf] }
  0xfb   : > { %1784 = vmatpush.bf16.msra.mxu1 %v7381_v60  ;;  %v9881_v60 = vld [vmem:[#allocation7 + $0x26c] sm:$0xf]  ;;  %v7433_v63 = vor.u32 %v9981_v57, %v7430_v58  ;;  %v10120_v57 = vld [vmem:[#allocation8 + $0x3dc] sm:$0xf0] }
  0xfc   : > { %1797 = vmatpush.bf16.msra.mxu2 %v6745_v61  ;;  %v7030_v61 = vld [vmem:[#allocation7 + $0x278] sm:$0xf0]  ;;  %v8220_v58 = vld [vmem:[#allocation8 + $0x5c0] sm:$0xf] }
  0xfd   : > { %1810 = vmatpush.bf16.msra.mxu3 %v6873_v1  ;;  %v9945_v1 = vld [vmem:[#allocation7 + $0x46c] sm:$0xf]  ;;  %v7033_v6 = vor.u32 %v9881_v60, %v7030_v61  ;;  %v7113_v60 = vor.u32 %v9901_v43, %v7110_v44 }
  0xfe   : > { %1772 = vmatpush.bf16.msra.mxu0 %v7237_v9  ;;  %v7289_v8 = vor.u32 %v9945_v1, %v7286_v2  ;;  %v9877_v9 = vld [vmem:[#allocation7 + $0x24c] sm:$0xf] }
  0xff   : > { %1785 = vmatpush.bf16.msra.mxu1 %v7365_v13  ;;  %v7142_v13 = vld [vmem:[#allocation7 + $0x358] sm:$0xf0] }
 0x100   : > { %1798 = vmatpush.bf16.msra.mxu2 %v6729_v14  ;;  %v9941_v14 = vld [vmem:[#allocation7 + $0x44c] sm:$0xf] }
 0x101   : > { %1811 = vmatpush.bf16.msra.mxu3 %v6857_v20  ;;  %1773 = vmatmul.bf16.vlgmr.msra.gmra.mxu0 %v11183_v34  ;;  %v7398_v20 = vld [vmem:[#allocation7 + $0x558] sm:$0xf0]  ;;  %v7273_v24 = vor.u32 %v9941_v14, %v7270_v15  ;;  %v10240_v14 = vld [vmem:[#allocation8 + $0x79c] sm:$0xf0] }
 0x102   : > { %1817 = vmatpush.bf16.msrb.mxu0 %v7097_v21  ;;  %1786 = vmatmul.bf16.vlgmr.msra.gmra.mxu1 %v11185_v4  ;;  %v7017_v21 = vor.u32 %v9877_v9, %v7014_v10  ;;  %v1579_v28 = vpop.f32.mrf.mxu1  ;;  %v7401_v29 = vor.u32 %v9973_v19, %v7398_v20  ;;  %v10112_v10 = vld [vmem:[#allocation8 + $0x39c] sm:$0xf0] }
 0x103   : > { %1830 = vmatpush.bf16.msrb.mxu1 %v7225_v22  ;;  %1799 = vmatmul.bf16.vlgmr.msra.gmra.mxu2 %v11170_v17  ;;  %v7049_v17 = vor.u32 %v9885_v50, %v7046_v51  ;;  %v1566_v22 = vpop.f32.mrf.mxu0  ;;  %v7366_v50 = vld [vmem:[#allocation7 + $0x518] sm:$0xf0] }
 0x104   : > { %1843 = vmatpush.bf16.msrb.mxu2 %v7353_v23  ;;  %1812 = vmatmul.bf16.vlgmr.msra.gmra.mxu3 %v11176_v30  ;;  %v7305_v30 = vor.u32 %v9949_v55, %v7302_v56  ;;  %v7145_v23 = vor.u32 %v9909_v11, %v7142_v13  ;;  %v7964_v55 = vld [vmem:[#allocation8 + $0x3c0] sm:$0xf]  ;;  %v6985_v56 = vor.u32 %v9869_v39, %v6982_v40 }
 0x105   : > { %1856 = vmatpush.bf16.msrb.mxu3 %v7481_v27  ;;  %v9905_v27 = vld [vmem:[#allocation7 + $0x32c] sm:$0xf]  ;;  %v7965_v3 = vor.u32 %v10120_v57, %v7964_v55  ;;  %v8188_v11 = vld [vmem:[#allocation8 + $0x580] sm:$0xf] }
 0x106   : > { %1818 = vmatpush.bf16.msrb.mxu0 %v7081_v35  ;;  %v1580_v35 = vadd.f32 %v1579_v28, %v1566_v22  ;;  %v1592_v46 = vpop.f32.mrf.mxu2  ;;  %v8444_v13 = vld [vmem:[#allocation8 + $0x780] sm:$0xf] }
 0x107   : > { %1831 = vmatpush.bf16.msrb.mxu1 %v7209_v36  ;;  %v9969_v36 = vld [vmem:[#allocation7 + $0x52c] sm:$0xf]  ;;  %v1605_v52 = vpop.f32.mrf.mxu3  ;;  %v8445_v26 = vor.u32 %v10240_v14, %v8444_v13  ;;  %v8156_v28 = vld [vmem:[#allocation8 + $0x540] sm:$0xf] }
 0x108   : > { %1844 = vmatpush.bf16.msrb.mxu2 %v7337_v37  ;;  %v7382_v37 = vld [vmem:[#allocation7 + $0x538] sm:$0xf0]  ;;  %v1593_v51 = vadd.f32 %v1592_v46, %v1580_v35  ;;  %v10096_v40 = vld [vmem:[#allocation8 + $0x31c] sm:$0xf0] }
 0x109   : > { %1857 = vmatpush.bf16.msrb.mxu3 %v7465_v41  ;;  %v7129_v41 = vor.u32 %v9905_v27, %v7126_v31  ;;  %v10104_v27 = vld [vmem:[#allocation8 + $0x35c] sm:$0xf0] }
 0x10a   : > { %1819 = vmatpush.bf16.msrb.mxu0 %v7065_v47  ;;  %v7385_v47 = vor.u32 %v9969_v36, %v7382_v37  ;;  %v1581_v0 = vpop.f32.mrf.mxu1  ;;  %v8412_v31 = vld [vmem:[#allocation8 + $0x740] sm:$0xf]  ;;  %v7901_v35 = vor.u32 %v10104_v27, %v7900_v25 }
 0x10b   : > { %1832 = vmatpush.bf16.msrb.mxu1 %v7193_v48  ;;  %v7238_v48 = vld [vmem:[#allocation7 + $0x418] sm:$0xf0]  ;;  %v7612_v37 = vld [vmem:[#allocation8 + $0x100] sm:$0xf]  ;;  %v8413_v39 = vor.u32 %v10232_v32, %v8412_v31 }
 0x10c   : > { %1845 = vmatpush.bf16.msrb.mxu2 %v7321_v49  ;;  %v9965_v49 = vld [vmem:[#allocation7 + $0x50c] sm:$0xf]  ;;  %v7241_v61 = vor.u32 %v9933_v45, %v7238_v48  ;;  %v7580_v48 = vld [vmem:[#allocation8 + $0xc0] sm:$0xf] }
 0x10d   : > { %1858 = vmatpush.bf16.msrb.mxu3 %v7449_v53  ;;  %v7708_v53 = vld [vmem:[#allocation8 + $0x1c0] sm:$0xf]  ;;  %v7369_v1 = vor.u32 %v9965_v49, %v7366_v50 }
 0x10e   : > { %1820 = vmatpush.bf16.msrb.mxu0 %v7049_v17  ;;  %v10184_v17 = vld [vmem:[#allocation8 + $0x5dc] sm:$0xf0]  ;;  %v7709_v2 = vor.u32 %v10056_v54, %v7708_v53  ;;  %v1594_v15 = vpop.f32.mrf.mxu2 }
 0x10f   : > { %1833 = vmatpush.bf16.msrb.mxu1 %v7177_v59  ;;  %v11203_v59 = vadd.f32 %v1605_v52, %v1593_v51  ;;  %v8221_v5 = vor.u32 %v10184_v17, %v8220_v58  ;;  %v1607_v20 = vpop.f32.mrf.mxu3  ;;  %v10024_v49 = vld [vmem:[#allocation8 + $0xdc] sm:$0xf0] }
 0x110   : > { %1846 = vmatpush.bf16.msrb.mxu2 %v7305_v30  ;;  %v1568_v30 = vpop.f32.mrf.mxu0  ;;  %v7836_v50 = vld [vmem:[#allocation8 + $0x2c0] sm:$0xf]  ;;  %v7581_v58 = vor.u32 %v10024_v49, %v7580_v48 }
 0x111   : > { %1859 = vmatpush.bf16.msrb.mxu3 %v7433_v63  ;;  %v10248_v63 = vld [vmem:[#allocation8 + $0x7dc] sm:$0xf0] }
 0x112   : > { %1821 = vmatpush.bf16.msrb.mxu0 %v7033_v6  ;;  %v7676_v6 = vld [vmem:[#allocation8 + $0x180] sm:$0xf]  ;;  %v8477_v9 = vor.u32 %v10248_v63, %v8476_v62 }
 0x113   : > { %1834 = vmatpush.bf16.msrb.mxu1 %v7161_v7  ;;  %v10048_v7 = vld [vmem:[#allocation8 + $0x19c] sm:$0xf0] }
 0x114   : > { %1847 = vmatpush.bf16.msrb.mxu2 %v7289_v8  ;;  %v7932_v8 = vld [vmem:[#allocation8 + $0x380] sm:$0xf]  ;;  %v7677_v19 = vor.u32 %v10048_v7, %v7676_v6 }
 0x115   : > { %1860 = vmatpush.bf16.msrb.mxu3 %v7417_v12  ;;  %v10176_v12 = vld [vmem:[#allocation8 + $0x59c] sm:$0xf0] }
 0x116   : > { %1822 = vmatpush.bf16.msrb.mxu0 %v7017_v21  ;;  %v7933_v21 = vor.u32 %v10112_v10, %v7932_v8  ;;  %v8189_v22 = vor.u32 %v10176_v12, %v8188_v11  ;;  %v10088_v52 = vld [vmem:[#allocation8 + $0x2dc] sm:$0xf0] }
 0x117   : > { %1835 = vmatpush.bf16.msrb.mxu1 %v7145_v23  ;;  %v7644_v23 = vld [vmem:[#allocation8 + $0x140] sm:$0xf]  ;;  %v7837_v17 = vor.u32 %v10088_v52, %v7836_v50  ;;  %v394_v52 = vld [vmem:[%s11144_s30 + $0x8] sm:$0xff] }
 0x118   : > { %1848 = vmatpush.bf16.msrb.mxu2 %v7273_v24  ;;  %v10040_v24 = vld [vmem:[#allocation8 + $0x15c] sm:$0xf0] }
 0x119   : > { %1861 = vmatpush.bf16.msrb.mxu3 %v7401_v29  ;;  %v10168_v29 = vld [vmem:[#allocation8 + $0x55c] sm:$0xf0]  ;;  %v7645_v33 = vor.u32 %v10040_v24, %v7644_v23 }
 0x11a   : > { %1823 = vmatpush.bf16.msrb.mxu0 %v7001_v38  ;;  %v8157_v36 = vor.u32 %v10168_v29, %v8156_v28  ;;  %v10032_v38 = vld [vmem:[#allocation8 + $0x11c] sm:$0xf0] }
 0x11b   : > { %1836 = vmatpush.bf16.msrb.mxu1 %v7129_v41  ;;  %v8124_v41 = vld [vmem:[#allocation8 + $0x500] sm:$0xf]  ;;  %v7613_v44 = vor.u32 %v10032_v38, %v7612_v37 }
 0x11c   : > { %1849 = vmatpush.bf16.msrb.mxu2 %v7257_v42  ;;  %v8380_v42 = vld [vmem:[#allocation8 + $0x700] sm:$0xf] }
 0x11d   : > { %1862 = vmatpush.bf16.msrb.mxu3 %v7385_v47  ;;  %v8092_v53 = vld [vmem:[#allocation8 + $0x4c0] sm:$0xf] }
 0x11e   : > { %1824 = vmatpush.bf16.msrb.mxu0 %v6985_v56  ;;  %v1618_v43 = vpop.f32.mrf.mxu0  ;;  %v10152_v54 = vld [vmem:[#allocation8 + $0x4dc] sm:$0xf0] }
 0x11f   : > { %1837 = vmatpush.bf16.msrb.mxu1 %v7113_v60  ;;  %v1619_v45 = vadd.f32 %v1618_v43, %v11203_v59  ;;  %v8348_v56 = vld [vmem:[#allocation8 + $0x6c0] sm:$0xf]  ;;  %v8093_v59 = vor.u32 %v10152_v54, %v8092_v53  ;;  %v10052_v43 = vld [vmem:[#allocation8 + $0x1c4] sm:$0xf] }
 0x120   : > { %1850 = vmatpush.bf16.msrb.mxu2 %v7241_v61  ;;  %v10216_v57 = vld [vmem:[#allocation8 + $0x6dc] sm:$0xf0] }
 0x121   : > { %1863 = vmatpush.bf16.msrb.mxu3 %v7369_v1  ;;  %1825 = vmatmul.bf16.vlgmr.msrb.gmra.mxu0 %v11168_v16  ;;  %v10160_v16 = vld [vmem:[#allocation8 + $0x51c] sm:$0xf0]  ;;  %v8349_v62 = vor.u32 %v10216_v57, %v8348_v56 }
 0x122   : > { %4173 = vmatpush.bf16.msra.mxu0 %v7709_v2  ;;  %1838 = vmatmul.bf16.vlgmr.msrb.gmra.mxu1 %v11172_v18  ;;  %v1631_v18 = vpop.f32.mrf.mxu1  ;;  %v8125_v47 = vor.u32 %v10160_v16, %v8124_v41  ;;  %v7548_v30 = vld [vmem:[#allocation8 + $0x80] sm:$0xf] }
 0x123   : > { %4186 = vmatpush.bf16.msra.mxu1 %v7965_v3  ;;  %1851 = vmatmul.bf16.vlgmr.msrb.gmra.mxu2 %v11183_v34  ;;  %v7868_v34 = vld [vmem:[#allocation8 + $0x300] sm:$0xf]  ;;  %v11210_v55 = vadd.f32 %v1631_v18, %v1619_v45 }
 0x124   : > { %4199 = vmatpush.bf16.msra.mxu2 %v8221_v5  ;;  %1864 = vmatmul.bf16.vlgmr.msrb.gmra.mxu3 %v11185_v4  ;;  %v10224_v4 = vld [vmem:[#allocation8 + $0x71c] sm:$0xf0]  ;;  %v7869_v46 = vor.u32 %v10096_v40, %v7868_v34 }
 0x125   : > { %4212 = vmatpush.bf16.msra.mxu3 %v8477_v9  ;;  %v8381_v51 = vor.u32 %v10224_v4, %v8380_v42  ;;  %v10016_v60 = vld [vmem:[#allocation8 + $0x9c] sm:$0xf0] }
 0x126   : > { %4174 = vmatpush.bf16.msra.mxu0 %v7677_v19  ;;  %v7804_v61 = vld [vmem:[#allocation8 + $0x280] sm:$0xf]  ;;  %v1644_v2 = vpop.f32.mrf.mxu2  ;;  %v1620_v7 = vpop.f32.mrf.mxu0  ;;  %v7549_v8 = vor.u32 %v10016_v60, %v7548_v30  ;;  %v10044_v60 = vld [vmem:[#allocation8 + $0x184] sm:$0xf] }
 0x127   : > { %4187 = vmatpush.bf16.msra.mxu1 %v7933_v21  ;;  %v10080_v63 = vld [vmem:[#allocation8 + $0x29c] sm:$0xf0]  ;;  %v1657_v6 = vpop.f32.mrf.mxu3 }
 0x128   : > { %4200 = vmatpush.bf16.msra.mxu2 %v8189_v22  ;;  %v8060_v0 = vld [vmem:[#allocation8 + $0x480] sm:$0xf]  ;;  %v11212_v9 = vadd.f32 %v1657_v6, %v1644_v2  ;;  %v7805_v11 = vor.u32 %v10080_v63, %v7804_v61  ;;  %v7678_v61 = vld [vmem:[#allocation8 + $0x1a0] sm:$0xf0] }
 0x129   : > { %4213 = vmatpush.bf16.msra.mxu3 %v8445_v26  ;;  %v10144_v1 = vld [vmem:[#allocation8 + $0x49c] sm:$0xf0]  ;;  %v10108_v63 = vld [vmem:[#allocation8 + $0x384] sm:$0xf]  ;;  %v7681_v7 = vor.u32 %v10044_v60, %v7678_v61 }
 0x12a   : > { %4175 = vmatpush.bf16.msra.mxu0 %v7645_v33  ;;  %v8316_v3 = vld [vmem:[#allocation8 + $0x680] sm:$0xf]  ;;  %v1633_v10 = vpop.f32.mrf.mxu1  ;;  %v8061_v12 = vor.u32 %v10144_v1, %v8060_v0  ;;  %v7934_v0 = vld [vmem:[#allocation8 + $0x3a0] sm:$0xf0]  ;;  %v11220_v1 = vpack.c.bf16 %v394_v52, %v394_v52 }
 0x12b   : > { %4188 = vmatpush.bf16.msra.mxu1 %v7901_v35  ;;  %v10208_v5 = vld [vmem:[#allocation8 + $0x69c] sm:$0xf0] }
 0x12c   : > { %4201 = vmatpush.bf16.msra.mxu2 %v8157_v36  ;;  %v7516_v13 = vld [vmem:[#allocation8 + $0x40] sm:$0xf]  ;;  %v8317_v19 = vor.u32 %v10208_v5, %v8316_v3 }
 0x12d   : > { %4214 = vmatpush.bf16.msra.mxu3 %v8413_v39  ;;  %v10008_v14 = vld [vmem:[#allocation8 + $0x5c] sm:$0xf0] }
 0x12e   : > { %4176 = vmatpush.bf16.msra.mxu0 %v7613_v44  ;;  %v7772_v15 = vld [vmem:[#allocation8 + $0x240] sm:$0xf]  ;;  %v7517_v25 = vor.u32 %v10008_v14, %v7516_v13  ;;  %v1646_v34 = vpop.f32.mrf.mxu2  ;;  %v7710_v44 = vld [vmem:[#allocation8 + $0x1e0] sm:$0xf0] }
 0x12f   : > { %4189 = vmatpush.bf16.msra.mxu1 %v7869_v46  ;;  %v10072_v20 = vld [vmem:[#allocation8 + $0x25c] sm:$0xf0]  ;;  %v1659_v16 = vpop.f32.mrf.mxu3  ;;  %v10116_v46 = vld [vmem:[#allocation8 + $0x3c4] sm:$0xf]  ;;  %v7713_v56 = vor.u32 %v10052_v43, %v7710_v44 }
 0x130   : > { %4202 = vmatpush.bf16.msra.mxu2 %v8125_v47  ;;  %v8028_v21 = vld [vmem:[#allocation8 + $0x440] sm:$0xf]  ;;  %v7773_v28 = vor.u32 %v10072_v20, %v7772_v15  ;;  %v7966_v47 = vld [vmem:[#allocation8 + $0x3e0] sm:$0xf0] }
 0x131   : > { %4215 = vmatpush.bf16.msra.mxu3 %v8381_v51  ;;  %v10136_v22 = vld [vmem:[#allocation8 + $0x45c] sm:$0xf0]  ;;  %v10036_v14 = vld [vmem:[#allocation8 + $0x144] sm:$0xf] }
 0x132   : > { %4177 = vmatpush.bf16.msra.mxu0 %v7581_v58  ;;  %v8284_v23 = vld [vmem:[#allocation8 + $0x640] sm:$0xf]  ;;  %v8029_v29 = vor.u32 %v10136_v22, %v8028_v21  ;;  %v7646_v15 = vld [vmem:[#allocation8 + $0x160] sm:$0xf0] }
 0x133   : > { %4190 = vmatpush.bf16.msra.mxu1 %v7837_v17  ;;  %v10200_v24 = vld [vmem:[#allocation8 + $0x65c] sm:$0xf0]  ;;  %v396_v17 = vld [vmem:[%s11144_s30 + $0x18] sm:$0xff]  ;;  %v7902_v20 = vld [vmem:[#allocation8 + $0x360] sm:$0xf0] }
 0x134   : > { %4203 = vmatpush.bf16.msra.mxu2 %v8093_v59  ;;  %v7484_v26 = vld [vmem:[#allocation8] sm:$0xf]  ;;  %v8285_v35 = vor.u32 %v10200_v24, %v8284_v23  ;;  %v7969_v59 = vor.u32 %v10116_v46, %v7966_v47  ;;  %v11224_v5 = vpack.c.bf16 %v396_v17, %v396_v17  ;;  %v7649_v23 = vor.u32 %v10036_v14, %v7646_v15  ;;  %v10020_v43 = vld [vmem:[#allocation8 + $0xc4] sm:$0xf] }
 0x135   : > { %4216 = vmatpush.bf16.msra.mxu3 %v8349_v62  ;;  %v10000_v27 = vld [vmem:[#allocation8 + $0x1c] sm:$0xf0]  ;;  %v7582_v44 = vld [vmem:[#allocation8 + $0xe0] sm:$0xf0] }
 0x136   : > { %4178 = vmatpush.bf16.msra.mxu0 %v7549_v8  ;;  %v7740_v31 = vld [vmem:[#allocation8 + $0x200] sm:$0xf]  ;;  %v7485_v42 = vor.u32 %v10000_v27, %v7484_v26  ;;  %v7518_v14 = vld [vmem:[#allocation8 + $0x60] sm:$0xf0] }
 0x137   : > { %4191 = vmatpush.bf16.msra.mxu1 %v7805_v11  ;;  %v10064_v32 = vld [vmem:[#allocation8 + $0x21c] sm:$0xf0]  ;;  %v10068_v15 = vld [vmem:[#allocation8 + $0x244] sm:$0xf] }
 0x138   : > { %4204 = vmatpush.bf16.msra.mxu2 %v8061_v12  ;;  %v7996_v33 = vld [vmem:[#allocation8 + $0x400] sm:$0xf]  ;;  %v7741_v45 = vor.u32 %v10064_v32, %v7740_v31  ;;  %v7937_v12 = vor.u32 %v10108_v63, %v7934_v0  ;;  %v7614_v31 = vld [vmem:[#allocation8 + $0x120] sm:$0xf0] }
 0x139   : > { %4217 = vmatpush.bf16.msra.mxu3 %v8317_v19  ;;  %v10128_v36 = vld [vmem:[#allocation8 + $0x41c] sm:$0xf0]  ;;  %v10100_v19 = vld [vmem:[#allocation8 + $0x344] sm:$0xf] }
 0x13a   : > { %v8252_v37 = vld [vmem:[#allocation8 + $0x600] sm:$0xf]  ;;  %4179 = vmatpush.bf16.msra.mxu0 %v7517_v25  ;;  %v7997_v18 = vor.u32 %v10128_v36, %v7996_v33  ;;  %v7905_v27 = vor.u32 %v10100_v19, %v7902_v20  ;;  %v10092_v32 = vld [vmem:[#allocation8 + $0x304] sm:$0xf] }
 0x13b   : > { %v10192_v38 = vld [vmem:[#allocation8 + $0x61c] sm:$0xf0]  ;;  %4192 = vmatpush.bf16.msra.mxu1 %v7773_v28  ;;  %v7870_v33 = vld [vmem:[#allocation8 + $0x320] sm:$0xf0] }
 0x13c   : > { %v8732_v39 = vld [vmem:[#allocation8 + $0x9c0] sm:$0xf]  ;;  %4205 = vmatpush.bf16.msra.mxu2 %v8029_v29  ;;  %v8253_v49 = vor.u32 %v10192_v38, %v8252_v37  ;;  %v10028_v29 = vld [vmem:[#allocation8 + $0x104] sm:$0xf] }
 0x13d   : > { %v10312_v40 = vld [vmem:[#allocation8 + $0x9dc] sm:$0xf0]  ;;  %4218 = vmatpush.bf16.msra.mxu3 %v8285_v35  ;;  %v7617_v38 = vor.u32 %v10028_v29, %v7614_v31  ;;  %v7774_v19 = vld [vmem:[#allocation8 + $0x260] sm:$0xf0] }
 0x13e   : > { %v8988_v41 = vld [vmem:[#allocation8 + $0xbc0] sm:$0xf]  ;;  %v8733_v50 = vor.u32 %v10312_v40, %v8732_v39  ;;  %4180 = vmatpush.bf16.msra.mxu0 %v7485_v42  ;;  %v1670_v36 = vpop.f32.mrf.mxu0  ;;  %v7873_v42 = vor.u32 %v10092_v32, %v7870_v33  ;;  %v7777_v29 = vor.u32 %v10068_v15, %v7774_v19  ;;  %v7486_v31 = vld [vmem:[#allocation8 + $0x20] sm:$0xf0] }
 0x13f   : > { %v10376_v4 = vld [vmem:[#allocation8 + $0xbdc] sm:$0xf0]  ;;  %4193 = vmatpush.bf16.msra.mxu1 %v7741_v45  ;;  %v1683_v16 = vpop.f32.mrf.mxu1  ;;  %v10084_v45 = vld [vmem:[#allocation8 + $0x2c4] sm:$0xf] }
 0x140   : > { %v393_v48 = vld [vmem:[%s11144_s30] sm:$0xff]  ;;  %v395_v53 = vld [vmem:[%s11144_s30 + $0x10] sm:$0xff]  ;;  %v8989_v54 = vor.u32 %v10376_v4, %v8988_v41  ;;  %4206 = vmatpush.bf16.msra.mxu2 %v7997_v18  ;;  %v1671_v41 = vadd.f32 %v1670_v36, %v11212_v9 }
 0x141   : > { %v8700_v51 = vld [vmem:[#allocation8 + $0x980] sm:$0xf]  ;;  %v11218_v62 = vpack.c.bf16 %v393_v48, %v393_v48  ;;  %v11222_v2 = vpack.c.bf16 %v395_v53, %v395_v53  ;;  %4219 = vmatpush.bf16.msra.mxu3 %v8253_v49  ;;  %v7838_v18 = vld [vmem:[#allocation8 + $0x2e0] sm:$0xf0]  ;;  %v7585_v49 = vor.u32 %v10020_v43, %v7582_v44 }
 0x142   : > { %v10304_v57 = vld [vmem:[#allocation8 + $0x99c] sm:$0xf0]  ;;  %4225 = vmatpush.bf16.msrb.mxu0 %v8733_v50  ;;  %4194 = vmatmul.bf16.vlgmr.msra.gmra.mxu1 %v11220_v1  ;;  %v1684_v46 = vadd.f32 %v1683_v16, %v1671_v41  ;;  %v7841_v9 = vor.u32 %v10084_v45, %v7838_v18  ;;  %v10060_v32 = vld [vmem:[#allocation8 + $0x204] sm:$0xf] }
 0x143   : > { %v8956_v58 = vld [vmem:[#allocation8 + $0xb80] sm:$0xf]  ;;  %v8701_v3 = vor.u32 %v10304_v57, %v8700_v51  ;;  %4238 = vmatpush.bf16.msrb.mxu1 %v8989_v54  ;;  %4181 = vmatmul.bf16.vlgmr.msra.gmra.mxu0 %v11218_v62  ;;  %v7550_v57 = vld [vmem:[#allocation8 + $0xa0] sm:$0xf0] }
 0x144   : > { %v10368_v30 = vld [vmem:[#allocation8 + $0xb9c] sm:$0xf0]  ;;  %4251 = vmatpush.bf16.msrb.mxu2 %v7713_v56  ;;  %4220 = vmatmul.bf16.vlgmr.msra.gmra.mxu3 %v11224_v5  ;;  %v10012_v56 = vld [vmem:[#allocation8 + $0x84] sm:$0xf] }
 0x145   : > { %v8957_v6 = vor.u32 %v10368_v30, %v8956_v58  ;;  %v8668_v8 = vld [vmem:[#allocation8 + $0x940] sm:$0xf]  ;;  %4264 = vmatpush.bf16.msrb.mxu3 %v7969_v59  ;;  %4207 = vmatmul.bf16.vlgmr.msra.gmra.mxu2 %v11222_v2  ;;  %v10076_v59 = vld [vmem:[#allocation8 + $0x284] sm:$0xf] }
 0x146   : > { %v10296_v10 = vld [vmem:[#allocation8 + $0x95c] sm:$0xf0]  ;;  %4226 = vmatpush.bf16.msrb.mxu0 %v8701_v3  ;;  %v1696_v53 = vpop.f32.mrf.mxu2  ;;  %v7806_v30 = vld [vmem:[#allocation8 + $0x2a0] sm:$0xf0]  ;;  %v1672_v63 = vpop.f32.mrf.mxu0  ;;  %v7553_v3 = vor.u32 %v10012_v56, %v7550_v57 }
 0x147   : > { %v8924_v11 = vld [vmem:[#allocation8 + $0xb40] sm:$0xf]  ;;  %v8669_v21 = vor.u32 %v10296_v10, %v8668_v8  ;;  %4239 = vmatpush.bf16.msrb.mxu1 %v8957_v6  ;;  %v1697_v58 = vadd.f32 %v1696_v53, %v1684_v46  ;;  %v1709_v17 = vpop.f32.mrf.mxu3  ;;  %v1685_v10 = vpop.f32.mrf.mxu1  ;;  %v7742_v33 = vld [vmem:[#allocation8 + $0x220] sm:$0xf0]  ;;  %v398_v46 = vld [vmem:[%s11144_s30 + $0x28] sm:$0xff] }
 0x148   : > { %v10360_v13 = vld [vmem:[#allocation8 + $0xb5c] sm:$0xf0]  ;;  %4252 = vmatpush.bf16.msrb.mxu2 %v7681_v7  ;;  %v10180_v36 = vld [vmem:[#allocation8 + $0x5c4] sm:$0xf]  ;;  %v7745_v45 = vor.u32 %v10060_v32, %v7742_v33  ;;  %v11237_v57 = vpack.c.bf16 %v398_v46, %v398_v46 }
 0x149   : > { %v8925_v22 = vor.u32 %v10360_v13, %v8924_v11  ;;  %v8636_v24 = vld [vmem:[#allocation8 + $0x900] sm:$0xf]  ;;  %4265 = vmatpush.bf16.msrb.mxu3 %v7937_v12  ;;  %v11231_v61 = vadd.f32 %v1709_v17, %v1697_v58  ;;  %v7809_v11 = vor.u32 %v10076_v59, %v7806_v30  ;;  %v10004_v13 = vld [vmem:[#allocation8 + $0x44] sm:$0xf] }
 0x14a   : > { %v10288_v25 = vld [vmem:[#allocation8 + $0x91c] sm:$0xf0]  ;;  %4227 = vmatpush.bf16.msrb.mxu0 %v8669_v21  ;;  %v8734_v41 = vld [vmem:[#allocation8 + $0x9e0] sm:$0xf0] }
 0x14b   : > { %v8892_v26 = vld [vmem:[#allocation8 + $0xb00] sm:$0xf]  ;;  %v8637_v35 = vor.u32 %v10288_v25, %v8636_v24  ;;  %4240 = vmatpush.bf16.msrb.mxu1 %v8925_v22  ;;  %v7521_v24 = vor.u32 %v10004_v13, %v7518_v14  ;;  %v8990_v43 = vld [vmem:[#allocation8 + $0xbe0] sm:$0xf0] }
 0x14c   : > { %v10352_v28 = vld [vmem:[#allocation8 + $0xb1c] sm:$0xf0]  ;;  %4253 = vmatpush.bf16.msrb.mxu2 %v7649_v23  ;;  %v8702_v56 = vld [vmem:[#allocation8 + $0x9a0] sm:$0xf0] }
 0x14d   : > { %v8893_v37 = vor.u32 %v10352_v28, %v8892_v26  ;;  %v8604_v34 = vld [vmem:[#allocation8 + $0x8c0] sm:$0xf]  ;;  %4266 = vmatpush.bf16.msrb.mxu3 %v7905_v27  ;;  %v9996_v27 = vld [vmem:[#allocation8 + $0x4] sm:$0xf] }
 0x14e   : > { %v10280_v39 = vld [vmem:[#allocation8 + $0x8dc] sm:$0xf0]  ;;  %4228 = vmatpush.bf16.msrb.mxu0 %v8637_v35  ;;  %v1698_v28 = vpop.f32.mrf.mxu2  ;;  %v10364_v58 = vld [vmem:[#allocation8 + $0xb84] sm:$0xf] }
 0x14f   : > { %v8860_v40 = vld [vmem:[#allocation8 + $0xac0] sm:$0xf]  ;;  %v8605_v47 = vor.u32 %v10280_v39, %v8604_v34  ;;  %4241 = vmatpush.bf16.msrb.mxu1 %v8893_v37  ;;  %v1711_v35 = vpop.f32.mrf.mxu3  ;;  %v8222_v37 = vld [vmem:[#allocation8 + $0x5e0] sm:$0xf0] }
 0x150   : > { %v10344_v4 = vld [vmem:[#allocation8 + $0xadc] sm:$0xf0]  ;;  %4254 = vmatpush.bf16.msrb.mxu2 %v7617_v38  ;;  %v10244_v38 = vld [vmem:[#allocation8 + $0x7c4] sm:$0xf]  ;;  %v8225_v18 = vor.u32 %v10180_v36, %v8222_v37 }
 0x151   : > { %v8861_v48 = vor.u32 %v10344_v4, %v8860_v40  ;;  %v8572_v50 = vld [vmem:[#allocation8 + $0x880] sm:$0xf]  ;;  %4267 = vmatpush.bf16.msrb.mxu3 %v7873_v42  ;;  %v8478_v39 = vld [vmem:[#allocation8 + $0x7e0] sm:$0xf0]  ;;  %v7489_v42 = vor.u32 %v9996_v27, %v7486_v31 }
 0x152   : > { %v10272_v51 = vld [vmem:[#allocation8 + $0x89c] sm:$0xf0]  ;;  %4229 = vmatpush.bf16.msrb.mxu0 %v8605_v47  ;;  %v10308_v40 = vld [vmem:[#allocation8 + $0x9c4] sm:$0xf]  ;;  %v8481_v47 = vor.u32 %v10244_v38, %v8478_v39 }
 0x153   : > { %v8828_v52 = vld [vmem:[#allocation8 + $0xa80] sm:$0xf]  ;;  %v8573_v60 = vor.u32 %v10272_v51, %v8572_v50  ;;  %4242 = vmatpush.bf16.msrb.mxu1 %v8861_v48  ;;  %v10372_v4 = vld [vmem:[#allocation8 + $0xbc4] sm:$0xf]  ;;  %v8737_v48 = vor.u32 %v10308_v40, %v8734_v41 }
 0x154   : > { %v10336_v54 = vld [vmem:[#allocation8 + $0xa9c] sm:$0xf0]  ;;  %4255 = vmatpush.bf16.msrb.mxu2 %v7585_v49  ;;  %v10172_v49 = vld [vmem:[#allocation8 + $0x584] sm:$0xf] }
 0x155   : > { %v8829_v0 = vor.u32 %v10336_v54, %v8828_v52  ;;  %v8540_v6 = vld [vmem:[#allocation8 + $0x840] sm:$0xf]  ;;  %4268 = vmatpush.bf16.msrb.mxu3 %v7841_v9  ;;  %v8190_v50 = vld [vmem:[#allocation8 + $0x5a0] sm:$0xf0]  ;;  %v8993_v52 = vor.u32 %v10372_v4, %v8990_v43 }
 0x156   : > { %v10264_v7 = vld [vmem:[#allocation8 + $0x85c] sm:$0xf0]  ;;  %4230 = vmatpush.bf16.msrb.mxu0 %v8573_v60  ;;  %v10236_v51 = vld [vmem:[#allocation8 + $0x784] sm:$0xf]  ;;  %v8193_v59 = vor.u32 %v10172_v49, %v8190_v50 }
 0x157   : > { %v8796_v8 = vld [vmem:[#allocation8 + $0xa40] sm:$0xf]  ;;  %v8541_v20 = vor.u32 %v10264_v7, %v8540_v6  ;;  %4243 = vmatpush.bf16.msrb.mxu1 %v8829_v0  ;;  %v8446_v9 = vld [vmem:[#allocation8 + $0x7a0] sm:$0xf0] }
 0x158   : > { %v10328_v12 = vld [vmem:[#allocation8 + $0xa5c] sm:$0xf0]  ;;  %4256 = vmatpush.bf16.msrb.mxu2 %v7553_v3  ;;  %v10300_v54 = vld [vmem:[#allocation8 + $0x984] sm:$0xf]  ;;  %v8449_v30 = vor.u32 %v10236_v51, %v8446_v9 }
 0x159   : > { %v8508_v21 = vld [vmem:[#allocation8 + $0x800] sm:$0xf]  ;;  %v8797_v23 = vor.u32 %v10328_v12, %v8796_v8  ;;  %4269 = vmatpush.bf16.msrb.mxu3 %v7809_v11  ;;  %v8958_v17 = vld [vmem:[#allocation8 + $0xba0] sm:$0xf0]  ;;  %v8705_v60 = vor.u32 %v10300_v54, %v8702_v56 }
 0x15a   : > { %v10256_v22 = vld [vmem:[#allocation8 + $0x81c] sm:$0xf0]  ;;  %4231 = vmatpush.bf16.msrb.mxu0 %v8541_v20  ;;  %v10164_v63 = vld [vmem:[#allocation8 + $0x544] sm:$0xf]  ;;  %v8961_v6 = vor.u32 %v10364_v58, %v8958_v17 }
 0x15b   : > { %v8764_v25 = vld [vmem:[#allocation8 + $0xa00] sm:$0xf]  ;;  %v8509_v34 = vor.u32 %v10256_v22, %v8508_v21  ;;  %4244 = vmatpush.bf16.msrb.mxu1 %v8797_v23  ;;  %v8158_v0 = vld [vmem:[#allocation8 + $0x560] sm:$0xf0] }
 0x15c   : > { %v10320_v26 = vld [vmem:[#allocation8 + $0xa1c] sm:$0xf0]  ;;  %4257 = vmatpush.bf16.msrb.mxu2 %v7521_v24  ;;  %v10228_v3 = vld [vmem:[#allocation8 + $0x744] sm:$0xf]  ;;  %v8161_v13 = vor.u32 %v10164_v63, %v8158_v0 }
 0x15d   : > { %v8765_v16 = vor.u32 %v10320_v26, %v8764_v25  ;;  %v397_v44 = vld [vmem:[%s11144_s30 + $0x20] sm:$0xff]  ;;  %4270 = vmatpush.bf16.msrb.mxu3 %v7777_v29 }
 0x15e   : > { %4232 = vmatpush.bf16.msrb.mxu0 %v8509_v34  ;;  %v11235_v53 = vpack.c.bf16 %v397_v44, %v397_v44  ;;  %v8414_v7 = vld [vmem:[#allocation8 + $0x760] sm:$0xf0]  ;;  %v1722_v29 = vpop.f32.mrf.mxu0 }
 0x15f   : > { %4245 = vmatpush.bf16.msrb.mxu1 %v8765_v16  ;;  %v10292_v8 = vld [vmem:[#allocation8 + $0x944] sm:$0xf]  ;;  %v8417_v14 = vor.u32 %v10228_v3, %v8414_v7  ;;  %v1735_v37 = vpop.f32.mrf.mxu1 }
 0x160   : > { %4258 = vmatpush.bf16.msrb.mxu2 %v7489_v42  ;;  %v8670_v10 = vld [vmem:[#allocation8 + $0x960] sm:$0xf0]  ;;  %v1736_v41 = vadd.f32 %v1735_v37, %v1722_v29  ;;  %v10121_v37 = vld [vmem:[#allocation8 + $0x3e4] sm:$0xf0] }
 0x161   : > { %4271 = vmatpush.bf16.msrb.mxu3 %v7745_v45  ;;  %4233 = vmatmul.bf16.vlgmr.msrb.gmra.mxu0 %v11235_v53  ;;  %v10356_v11 = vld [vmem:[#allocation8 + $0xb44] sm:$0xf]  ;;  %v8673_v15 = vor.u32 %v10292_v8, %v8670_v10 }
 0x162   : > { %4277 = vmatpush.bf16.msra.mxu0 %v8225_v18  ;;  %4246 = vmatmul.bf16.vlgmr.msrb.gmra.mxu1 %v11237_v57  ;;  %v8926_v12 = vld [vmem:[#allocation8 + $0xb60] sm:$0xf0] }
 0x163   : > { %4290 = vmatpush.bf16.msra.mxu1 %v8481_v47  ;;  %4259 = vmatmul.bf16.vlgmr.msrb.gmra.mxu2 %v11218_v62  ;;  %v10156_v19 = vld [vmem:[#allocation8 + $0x504] sm:$0xf]  ;;  %v8929_v22 = vor.u32 %v10356_v11, %v8926_v12 }
 0x164   : > { %4303 = vmatpush.bf16.msra.mxu2 %v8737_v48  ;;  %4272 = vmatmul.bf16.vlgmr.msrb.gmra.mxu3 %v11220_v1  ;;  %v8126_v20 = vld [vmem:[#allocation8 + $0x520] sm:$0xf0] }
 0x165   : > { %4316 = vmatpush.bf16.msra.mxu3 %v8993_v52  ;;  %v10220_v21 = vld [vmem:[#allocation8 + $0x704] sm:$0xf]  ;;  %v8129_v28 = vor.u32 %v10156_v19, %v8126_v20 }
 0x166   : > { %4278 = vmatpush.bf16.msra.mxu0 %v8193_v59  ;;  %v8382_v23 = vld [vmem:[#allocation8 + $0x720] sm:$0xf0]  ;;  %v1748_v47 = vpop.f32.mrf.mxu2  ;;  %v1724_v59 = vpop.f32.mrf.mxu0 }
 0x167   : > { %4291 = vmatpush.bf16.msra.mxu1 %v8449_v30  ;;  %v10284_v24 = vld [vmem:[#allocation8 + $0x904] sm:$0xf]  ;;  %v8385_v31 = vor.u32 %v10220_v21, %v8382_v23  ;;  %v1749_v52 = vadd.f32 %v1748_v47, %v1736_v41  ;;  %v1761_v9 = vpop.f32.mrf.mxu3  ;;  %v8484_v41 = vld [vmem:[#allocation8 + $0x7c8] sm:$0xf] }
 0x168   : > { %4304 = vmatpush.bf16.msra.mxu2 %v8705_v60  ;;  %v8638_v25 = vld [vmem:[#allocation8 + $0x920] sm:$0xf0]  ;;  %v10041_v59 = vld [vmem:[#allocation8 + $0x164] sm:$0xf0] }
 0x169   : > { %4317 = vmatpush.bf16.msra.mxu3 %v8961_v6  ;;  %v10348_v26 = vld [vmem:[#allocation8 + $0xb04] sm:$0xf]  ;;  %v8641_v32 = vor.u32 %v10284_v24, %v8638_v25  ;;  %v11243_v17 = vadd.f32 %v1761_v9, %v1749_v52  ;;  %v1737_v6 = vpop.f32.mrf.mxu1  ;;  %v10241_v52 = vld [vmem:[#allocation8 + $0x7a4] sm:$0xf0] }
 0x16a   : > { %v8894_v27 = vld [vmem:[#allocation8 + $0xb20] sm:$0xf0]  ;;  %4279 = vmatpush.bf16.msra.mxu0 %v8161_v13  ;;  %v8420_v6 = vld [vmem:[#allocation8 + $0x748] sm:$0xf] }
 0x16b   : > { %4292 = vmatpush.bf16.msra.mxu1 %v8417_v14  ;;  %v10148_v33 = vld [vmem:[#allocation8 + $0x4c4] sm:$0xf]  ;;  %v8897_v38 = vor.u32 %v10348_v26, %v8894_v27 }
 0x16c   : > { %4305 = vmatpush.bf16.msra.mxu2 %v8673_v15  ;;  %v8094_v35 = vld [vmem:[#allocation8 + $0x4e0] sm:$0xf0] }
 0x16d   : > { %v10212_v36 = vld [vmem:[#allocation8 + $0x6c4] sm:$0xf]  ;;  %4318 = vmatpush.bf16.msra.mxu3 %v8929_v22  ;;  %v8097_v4 = vor.u32 %v10148_v33, %v8094_v35  ;;  %v10057_v33 = vld [vmem:[#allocation8 + $0x1e4] sm:$0xf0] }
 0x16e   : > { %v8350_v34 = vld [vmem:[#allocation8 + $0x6e0] sm:$0xf0]  ;;  %4280 = vmatpush.bf16.msra.mxu0 %v8129_v28  ;;  %v1750_v25 = vpop.f32.mrf.mxu2  ;;  %v7972_v35 = vld [vmem:[#allocation8 + $0x3c8] sm:$0xf] }
 0x16f   : > { %v10276_v39 = vld [vmem:[#allocation8 + $0x8c4] sm:$0xf]  ;;  %4293 = vmatpush.bf16.msra.mxu1 %v8385_v31  ;;  %v8353_v43 = vor.u32 %v10212_v36, %v8350_v34  ;;  %v1763_v31 = vpop.f32.mrf.mxu3  ;;  %v10185_v34 = vld [vmem:[#allocation8 + $0x5e4] sm:$0xf0] }
 0x170   : > { %v8606_v40 = vld [vmem:[#allocation8 + $0x8e0] sm:$0xf0]  ;;  %4306 = vmatpush.bf16.msra.mxu2 %v8641_v32  ;;  %v7716_v32 = vld [vmem:[#allocation8 + $0x1c8] sm:$0xf] }
 0x171   : > { %v10340_v16 = vld [vmem:[#allocation8 + $0xac4] sm:$0xf]  ;;  %v8609_v44 = vor.u32 %v10276_v39, %v8606_v40  ;;  %4319 = vmatpush.bf16.msra.mxu3 %v8897_v38  ;;  %v8228_v38 = vld [vmem:[#allocation8 + $0x5c8] sm:$0xf] }
 0x172   : > { %v8862_v42 = vld [vmem:[#allocation8 + $0xae0] sm:$0xf0]  ;;  %4281 = vmatpush.bf16.msra.mxu0 %v8097_v4  ;;  %v7717_v4 = vor.u32 %v10057_v33, %v7716_v32  ;;  %v7588_v31 = vld [vmem:[#allocation8 + $0xc8] sm:$0xf] }
 0x173   : > { %v10140_v45 = vld [vmem:[#allocation8 + $0x484] sm:$0xf]  ;;  %v8865_v48 = vor.u32 %v10340_v16, %v8862_v42  ;;  %4294 = vmatpush.bf16.msra.mxu1 %v8353_v43  ;;  %v10249_v16 = vld [vmem:[#allocation8 + $0x7e4] sm:$0xf0]  ;;  %v7973_v43 = vor.u32 %v10121_v37, %v7972_v35 }
 0x174   : > { %v8062_v18 = vld [vmem:[#allocation8 + $0x4a0] sm:$0xf0]  ;;  %4307 = vmatpush.bf16.msra.mxu2 %v8609_v44  ;;  %v8229_v44 = vor.u32 %v10185_v34, %v8228_v38  ;;  %v8485_v47 = vor.u32 %v10249_v16, %v8484_v41  ;;  %v10025_v32 = vld [vmem:[#allocation8 + $0xe4] sm:$0xf0] }
 0x175   : > { %v10204_v46 = vld [vmem:[#allocation8 + $0x684] sm:$0xf]  ;;  %v8065_v58 = vor.u32 %v10140_v45, %v8062_v18  ;;  %4320 = vmatpush.bf16.msra.mxu3 %v8865_v48  ;;  %v7684_v45 = vld [vmem:[#allocation8 + $0x188] sm:$0xf]  ;;  %v7589_v41 = vor.u32 %v10025_v32, %v7588_v31 }
 0x176   : > { %v8318_v49 = vld [vmem:[#allocation8 + $0x6a0] sm:$0xf0]  ;;  %v10049_v18 = vld [vmem:[#allocation8 + $0x1a4] sm:$0xf0] }
 0x177   : > { %v10268_v50 = vld [vmem:[#allocation8 + $0x884] sm:$0xf]  ;;  %v8321_v30 = vor.u32 %v10204_v46, %v8318_v49  ;;  %4282 = vmatpush.bf16.msra.mxu0 %v8065_v58  ;;  %v7940_v46 = vld [vmem:[#allocation8 + $0x388] sm:$0xf]  ;;  %v7685_v9 = vor.u32 %v10049_v18, %v7684_v45 }
 0x178   : > { %v8574_v51 = vld [vmem:[#allocation8 + $0x8a0] sm:$0xf0]  ;;  %v10113_v48 = vld [vmem:[#allocation8 + $0x3a4] sm:$0xf0] }
 0x179   : > { %v10332_v54 = vld [vmem:[#allocation8 + $0xa84] sm:$0xf]  ;;  %v8577_v60 = vor.u32 %v10268_v50, %v8574_v51  ;;  %4295 = vmatpush.bf16.msra.mxu1 %v8321_v30  ;;  %v8196_v49 = vld [vmem:[#allocation8 + $0x588] sm:$0xf] }
 0x17a   : > { %v8830_v56 = vld [vmem:[#allocation8 + $0xaa0] sm:$0xf0]  ;;  %v10177_v50 = vld [vmem:[#allocation8 + $0x5a4] sm:$0xf0] }
 0x17b   : > { %v10132_v63 = vld [vmem:[#allocation8 + $0x444] sm:$0xf]  ;;  %v8833_v7 = vor.u32 %v10332_v54, %v8830_v56  ;;  %4308 = vmatpush.bf16.msra.mxu2 %v8577_v60  ;;  %v8452_v51 = vld [vmem:[#allocation8 + $0x788] sm:$0xf]  ;;  %v7941_v54 = vor.u32 %v10113_v48, %v7940_v46  ;;  %v8197_v56 = vor.u32 %v10177_v50, %v8196_v49 }
 0x17c   : > { %v8030_v0 = vld [vmem:[#allocation8 + $0x460] sm:$0xf0]  ;;  %v7652_v58 = vld [vmem:[#allocation8 + $0x148] sm:$0xf]  ;;  %v8453_v60 = vor.u32 %v10241_v52, %v8452_v51 }
 0x17d   : > { %v10196_v3 = vld [vmem:[#allocation8 + $0x644] sm:$0xf]  ;;  %v8033_v14 = vor.u32 %v10132_v63, %v8030_v0  ;;  %4321 = vmatpush.bf16.msra.mxu3 %v8833_v7  ;;  %v7908_v30 = vld [vmem:[#allocation8 + $0x348] sm:$0xf] }
 0x17e   : > { %v8286_v8 = vld [vmem:[#allocation8 + $0x660] sm:$0xf0]  ;;  %v10105_v63 = vld [vmem:[#allocation8 + $0x364] sm:$0xf0] }
 0x17f   : > { %v10260_v10 = vld [vmem:[#allocation8 + $0x844] sm:$0xf]  ;;  %v8289_v20 = vor.u32 %v10196_v3, %v8286_v8  ;;  %4283 = vmatpush.bf16.msra.mxu0 %v8033_v14  ;;  %v8164_v0 = vld [vmem:[#allocation8 + $0x548] sm:$0xf]  ;;  %v7653_v8 = vor.u32 %v10041_v59, %v7652_v58 }
 0x180   : > { %v8542_v11 = vld [vmem:[#allocation8 + $0x860] sm:$0xf0]  ;;  %v10169_v3 = vld [vmem:[#allocation8 + $0x564] sm:$0xf0] }
 0x181   : > { %v10324_v12 = vld [vmem:[#allocation8 + $0xa44] sm:$0xf]  ;;  %v8545_v21 = vor.u32 %v10260_v10, %v8542_v11  ;;  %4296 = vmatpush.bf16.msra.mxu1 %v8289_v20  ;;  %v10233_v7 = vld [vmem:[#allocation8 + $0x764] sm:$0xf0]  ;;  %v7909_v10 = vor.u32 %v10105_v63, %v7908_v30  ;;  %v8165_v11 = vor.u32 %v10169_v3, %v8164_v0 }
 0x182   : > { %v8798_v13 = vld [vmem:[#allocation8 + $0xa60] sm:$0xf0]  ;;  %v7876_v14 = vld [vmem:[#allocation8 + $0x308] sm:$0xf] }
 0x183   : > { %v10124_v15 = vld [vmem:[#allocation8 + $0x404] sm:$0xf]  ;;  %v8801_v26 = vor.u32 %v10324_v12, %v8798_v13  ;;  %4309 = vmatpush.bf16.msra.mxu2 %v8545_v21  ;;  %v7620_v12 = vld [vmem:[#allocation8 + $0x108] sm:$0xf] }
 0x184   : > { %v7998_v19 = vld [vmem:[#allocation8 + $0x420] sm:$0xf0]  ;;  %v10033_v13 = vld [vmem:[#allocation8 + $0x124] sm:$0xf0] }
 0x185   : > { %v10188_v22 = vld [vmem:[#allocation8 + $0x604] sm:$0xf]  ;;  %v8001_v36 = vor.u32 %v10124_v15, %v7998_v19  ;;  %4322 = vmatpush.bf16.msra.mxu3 %v8801_v26  ;;  %v8421_v15 = vor.u32 %v10233_v7, %v8420_v6  ;;  %v10097_v19 = vld [vmem:[#allocation8 + $0x324] sm:$0xf0]  ;;  %v7621_v25 = vor.u32 %v10033_v13, %v7620_v12 }
 0x186   : > { %v8254_v23 = vld [vmem:[#allocation8 + $0x620] sm:$0xf0]  ;;  %v8132_v20 = vld [vmem:[#allocation8 + $0x508] sm:$0xf] }
 0x187   : > { %v10252_v24 = vld [vmem:[#allocation8 + $0x804] sm:$0xf]  ;;  %v8257_v39 = vor.u32 %v10188_v22, %v8254_v23  ;;  %4284 = vmatpush.bf16.msra.mxu0 %v8001_v36  ;;  %v10161_v21 = vld [vmem:[#allocation8 + $0x524] sm:$0xf0]  ;;  %v1813_v50 = vpop.f32.mrf.mxu3 }
 0x188   : > { %v8510_v27 = vld [vmem:[#allocation8 + $0x820] sm:$0xf0]  ;;  %v8388_v22 = vld [vmem:[#allocation8 + $0x708] sm:$0xf] }
 0x189   : > { %v10316_v28 = vld [vmem:[#allocation8 + $0xa04] sm:$0xf]  ;;  %v8513_v40 = vor.u32 %v10252_v24, %v8510_v27  ;;  %4297 = vmatpush.bf16.msra.mxu1 %v8257_v39  ;;  %v10225_v23 = vld [vmem:[#allocation8 + $0x724] sm:$0xf0]  ;;  %v1774_v24 = vpop.f32.mrf.mxu0  ;;  %v1787_v27 = vpop.f32.mrf.mxu1 }
 0x18a   : > { %v8766_v29 = vld [vmem:[#allocation8 + $0xa20] sm:$0xf0]  ;;  %4285 = vmatmul.bf16.vlgmr.msra.gmra.mxu0 %v11222_v2  ;;  %v1775_v26 = vadd.f32 %v1774_v24, %v11243_v17  ;;  %v7844_v33 = vld [vmem:[#allocation8 + $0x2c8] sm:$0xf]  ;;  %v8389_v35 = vor.u32 %v10225_v23, %v8388_v22 }
 0x18b   : > { %v8769_v42 = vor.u32 %v10316_v28, %v8766_v29  ;;  %4310 = vmatpush.bf16.msra.mxu2 %v8513_v40  ;;  %4329 = vmatpush.bf16.msrb.mxu0 %v7717_v4  ;;  %v7877_v28 = vor.u32 %v10097_v19, %v7876_v14  ;;  %v8133_v29 = vor.u32 %v10161_v21, %v8132_v20  ;;  %v10089_v36 = vld [vmem:[#allocation8 + $0x2e4] sm:$0xf0] }
 0x18c   : > { %4298 = vmatmul.bf16.vlgmr.msra.gmra.mxu1 %v11224_v5  ;;  %v8100_v37 = vld [vmem:[#allocation8 + $0x4c8] sm:$0xf]  ;;  %v11250_v34 = vadd.f32 %v1787_v27, %v1775_v26  ;;  %v7845_v17 = vor.u32 %v10089_v36, %v7844_v33  ;;  %v10053_v33 = vld [vmem:[#allocation8 + $0x1cc] sm:$0xf] }
 0x18d   : > { %4323 = vmatpush.bf16.msra.mxu3 %v8769_v42  ;;  %4342 = vmatpush.bf16.msrb.mxu1 %v7973_v43  ;;  %v10153_v38 = vld [vmem:[#allocation8 + $0x4e4] sm:$0xf0] }
 0x18e   : > { %4311 = vmatmul.bf16.vlgmr.msra.gmra.mxu2 %v11235_v53  ;;  %v8356_v39 = vld [vmem:[#allocation8 + $0x6c8] sm:$0xf]  ;;  %v8101_v16 = vor.u32 %v10153_v38, %v8100_v37  ;;  %v10117_v38 = vld [vmem:[#allocation8 + $0x3cc] sm:$0xf] }
 0x18f   : > { %4355 = vmatpush.bf16.msrb.mxu2 %v8229_v44  ;;  %4330 = vmatpush.bf16.msrb.mxu0 %v7685_v9  ;;  %v10217_v40 = vld [vmem:[#allocation8 + $0x6e4] sm:$0xf0] }
 0x190   : > { %4324 = vmatmul.bf16.vlgmr.msra.gmra.mxu3 %v11237_v57  ;;  %v7556_v42 = vld [vmem:[#allocation8 + $0x88] sm:$0xf]  ;;  %v8357_v44 = vor.u32 %v10217_v40, %v8356_v39  ;;  %v7974_v39 = vld [vmem:[#allocation8 + $0x3e8] sm:$0xf0] }
 0x191   : > { %4368 = vmatpush.bf16.msrb.mxu3 %v8485_v47  ;;  %4343 = vmatpush.bf16.msrb.mxu1 %v7941_v54  ;;  %v10017_v4 = vld [vmem:[#allocation8 + $0xa4] sm:$0xf0]  ;;  %v1800_v47 = vpop.f32.mrf.mxu2  ;;  %v1776_v51 = vpop.f32.mrf.mxu0 }
 0x192   : > { %v7812_v43 = vld [vmem:[#allocation8 + $0x288] sm:$0xf]  ;;  %v7557_v52 = vor.u32 %v10017_v4, %v7556_v42  ;;  %v11252_v9 = vadd.f32 %v1813_v50, %v1800_v47  ;;  %v1789_v54 = vpop.f32.mrf.mxu1  ;;  %v10109_v47 = vld [vmem:[#allocation8 + $0x38c] sm:$0xf] }
 0x193   : > { %4356 = vmatpush.bf16.msrb.mxu2 %v8197_v56  ;;  %4331 = vmatpush.bf16.msrb.mxu0 %v7653_v8  ;;  %v10081_v45 = vld [vmem:[#allocation8 + $0x2a4] sm:$0xf0] }
 0x194   : > { %v8068_v18 = vld [vmem:[#allocation8 + $0x488] sm:$0xf]  ;;  %v7813_v56 = vor.u32 %v10081_v45, %v7812_v43 }
 0x195   : > { %4369 = vmatpush.bf16.msrb.mxu3 %v8453_v60  ;;  %4344 = vmatpush.bf16.msrb.mxu1 %v7909_v10  ;;  %v10145_v46 = vld [vmem:[#allocation8 + $0x4a4] sm:$0xf0] }
 0x196   : > { %v8324_v48 = vld [vmem:[#allocation8 + $0x688] sm:$0xf]  ;;  %v8069_v58 = vor.u32 %v10145_v46, %v8068_v18  ;;  %v10045_v18 = vld [vmem:[#allocation8 + $0x18c] sm:$0xf] }
 0x197   : > { %4357 = vmatpush.bf16.msrb.mxu2 %v8165_v11  ;;  %4332 = vmatpush.bf16.msrb.mxu0 %v7621_v25  ;;  %v10209_v49 = vld [vmem:[#allocation8 + $0x6a4] sm:$0xf0]  ;;  %v7686_v46 = vld [vmem:[#allocation8 + $0x1a8] sm:$0xf0] }
 0x198   : > { %v7524_v59 = vld [vmem:[#allocation8 + $0x48] sm:$0xf]  ;;  %v8325_v63 = vor.u32 %v10209_v49, %v8324_v48  ;;  %v7942_v48 = vld [vmem:[#allocation8 + $0x3a8] sm:$0xf0]  ;;  %v7689_v51 = vor.u32 %v10045_v18, %v7686_v46 }
 0x199   : > { %4370 = vmatpush.bf16.msrb.mxu3 %v8421_v15  ;;  %4345 = vmatpush.bf16.msrb.mxu1 %v7877_v28  ;;  %v10009_v30 = vld [vmem:[#allocation8 + $0x64] sm:$0xf0]  ;;  %v1802_v25 = vpop.f32.mrf.mxu2 }
 0x19a   : > { %v7780_v60 = vld [vmem:[#allocation8 + $0x248] sm:$0xf]  ;;  %v7525_v10 = vor.u32 %v10009_v30, %v7524_v59  ;;  %v10037_v30 = vld [vmem:[#allocation8 + $0x14c] sm:$0xf] }
 0x19b   : > { %4358 = vmatpush.bf16.msrb.mxu2 %v8133_v29  ;;  %4333 = vmatpush.bf16.msrb.mxu0 %v7589_v41  ;;  %v10073_v0 = vld [vmem:[#allocation8 + $0x264] sm:$0xf0]  ;;  %v1815_v29 = vpop.f32.mrf.mxu3 }
 0x19c   : > { %v8036_v3 = vld [vmem:[#allocation8 + $0x448] sm:$0xf]  ;;  %v7781_v13 = vor.u32 %v10073_v0, %v7780_v60  ;;  %v7654_v60 = vld [vmem:[#allocation8 + $0x168] sm:$0xf0] }
 0x19d   : > { %4371 = vmatpush.bf16.msrb.mxu3 %v8389_v35  ;;  %4346 = vmatpush.bf16.msrb.mxu1 %v7845_v17  ;;  %v10137_v6 = vld [vmem:[#allocation8 + $0x464] sm:$0xf0]  ;;  %v7718_v35 = vld [vmem:[#allocation8 + $0x1e8] sm:$0xf0] }
 0x19e   : > { %v8292_v7 = vld [vmem:[#allocation8 + $0x648] sm:$0xf]  ;;  %v8037_v14 = vor.u32 %v10137_v6, %v8036_v3  ;;  %v7910_v0 = vld [vmem:[#allocation8 + $0x368] sm:$0xf0] }
 0x19f   : > { %4359 = vmatpush.bf16.msrb.mxu2 %v8101_v16  ;;  %v10201_v8 = vld [vmem:[#allocation8 + $0x664] sm:$0xf0]  ;;  %4334 = vmatpush.bf16.msrb.mxu0 %v7557_v52  ;;  %v7721_v16 = vor.u32 %v10053_v33, %v7718_v35  ;;  %v1839_v29 = vpop.f32.mrf.mxu1  ;;  %v10021_v33 = vld [vmem:[#allocation8 + $0xcc] sm:$0xf] }
 0x1a0   : > { %v7492_v11 = vld [vmem:[#allocation8 + $0x8] sm:$0xf]  ;;  %v8293_v21 = vor.u32 %v10201_v8, %v8292_v7  ;;  %v7657_v7 = vor.u32 %v10037_v30, %v7654_v60  ;;  %v7590_v35 = vld [vmem:[#allocation8 + $0xe8] sm:$0xf0] }
 0x1a1   : > { %4372 = vmatpush.bf16.msrb.mxu3 %v8357_v44  ;;  %v10001_v12 = vld [vmem:[#allocation8 + $0x24] sm:$0xf0]  ;;  %4347 = vmatpush.bf16.msrb.mxu1 %v7813_v56  ;;  %v7977_v44 = vor.u32 %v10117_v38, %v7974_v39 }
 0x1a2   : > { %v7748_v15 = vld [vmem:[#allocation8 + $0x208] sm:$0xf]  ;;  %v7493_v31 = vor.u32 %v10001_v12, %v7492_v11 }
 0x1a3   : > { %4360 = vmatpush.bf16.msrb.mxu2 %v8069_v58  ;;  %v10065_v19 = vld [vmem:[#allocation8 + $0x224] sm:$0xf0]  ;;  %4335 = vmatpush.bf16.msrb.mxu0 %v7525_v10  ;;  %v7945_v58 = vor.u32 %v10109_v47, %v7942_v48  ;;  %v10077_v47 = vld [vmem:[#allocation8 + $0x28c] sm:$0xf] }
 0x1a4   : > { %v8004_v20 = vld [vmem:[#allocation8 + $0x408] sm:$0xf]  ;;  %v7749_v36 = vor.u32 %v10065_v19, %v7748_v15  ;;  %v7622_v15 = vld [vmem:[#allocation8 + $0x128] sm:$0xf0] }
 0x1a5   : > { %4373 = vmatpush.bf16.msrb.mxu3 %v8325_v63  ;;  %v10129_v22 = vld [vmem:[#allocation8 + $0x424] sm:$0xf0]  ;;  %4348 = vmatpush.bf16.msrb.mxu1 %v7781_v13  ;;  %v10101_v63 = vld [vmem:[#allocation8 + $0x34c] sm:$0xf] }
 0x1a6   : > { %v8260_v23 = vld [vmem:[#allocation8 + $0x608] sm:$0xf]  ;;  %v8005_v37 = vor.u32 %v10129_v22, %v8004_v20  ;;  %v7913_v12 = vor.u32 %v10101_v63, %v7910_v0  ;;  %v10093_v19 = vld [vmem:[#allocation8 + $0x30c] sm:$0xf]  ;;  %v1826_v22 = vpop.f32.mrf.mxu0 }
 0x1a7   : > { %v10193_v24 = vld [vmem:[#allocation8 + $0x624] sm:$0xf0]  ;;  %4361 = vmatpush.bf16.msrb.mxu2 %v8037_v14  ;;  %4336 = vmatpush.bf16.msrb.mxu0 %v7493_v31  ;;  %v10029_v14 = vld [vmem:[#allocation8 + $0x10c] sm:$0xf]  ;;  %v1865_v46 = vpop.f32.mrf.mxu3  ;;  %v1841_v30 = vpop.f32.mrf.mxu1 }
 0x1a8   : > { %v8740_v26 = vld [vmem:[#allocation8 + $0x9c8] sm:$0xf]  ;;  %v8261_v40 = vor.u32 %v10193_v24, %v8260_v23  ;;  %v7878_v20 = vld [vmem:[#allocation8 + $0x328] sm:$0xf0]  ;;  %v7625_v24 = vor.u32 %v10029_v14, %v7622_v15 }
 0x1a9   : > { %v10313_v27 = vld [vmem:[#allocation8 + $0x9e4] sm:$0xf0]  ;;  %4374 = vmatpush.bf16.msrb.mxu3 %v8293_v21  ;;  %4349 = vmatpush.bf16.msrb.mxu1 %v7749_v36  ;;  %v7881_v31 = vor.u32 %v10093_v19, %v7878_v20  ;;  %v10085_v36 = vld [vmem:[#allocation8 + $0x2cc] sm:$0xf] }
 0x1aa   : > { %v8996_v28 = vld [vmem:[#allocation8 + $0xbc8] sm:$0xf]  ;;  %v8741_v41 = vor.u32 %v10313_v27, %v8740_v26  ;;  %4337 = vmatmul.bf16.vlgmr.msrb.gmra.mxu0 %v11218_v62  ;;  %v7814_v48 = vld [vmem:[#allocation8 + $0x2a8] sm:$0xf0] }
 0x1ab   : > { %v10377_v32 = vld [vmem:[#allocation8 + $0xbe4] sm:$0xf0]  ;;  %4362 = vmatpush.bf16.msrb.mxu2 %v8005_v37  ;;  %v7846_v37 = vld [vmem:[#allocation8 + $0x2e8] sm:$0xf0]  ;;  %v7817_v60 = vor.u32 %v10077_v47, %v7814_v48 }
 0x1ac   : > { %v8997_v17 = vor.u32 %v10377_v32, %v8996_v28  ;;  %v8708_v42 = vld [vmem:[#allocation8 + $0x988] sm:$0xf]  ;;  %4381 = vmatpush.bf16.msra.mxu0 %v8741_v41  ;;  %4350 = vmatmul.bf16.vlgmr.msrb.gmra.mxu1 %v11220_v1  ;;  %v1827_v28 = vadd.f32 %v1826_v22, %v11252_v9  ;;  %v7593_v41 = vor.u32 %v10021_v33, %v7590_v35  ;;  %v10005_v0 = vld [vmem:[#allocation8 + $0x4c] sm:$0xf] }
 0x1ad   : > { %v10305_v4 = vld [vmem:[#allocation8 + $0x9a4] sm:$0xf0]  ;;  %4375 = vmatpush.bf16.msrb.mxu3 %v8261_v40  ;;  %v7849_v9 = vor.u32 %v10085_v36, %v7846_v37  ;;  %v9997_v19 = vld [vmem:[#allocation8 + $0xc] sm:$0xf] }
 0x1ae   : > { %v8964_v43 = vld [vmem:[#allocation8 + $0xb88] sm:$0xf]  ;;  %v8709_v49 = vor.u32 %v10305_v4, %v8708_v42  ;;  %4394 = vmatpush.bf16.msra.mxu1 %v8997_v17  ;;  %4363 = vmatmul.bf16.vlgmr.msrb.gmra.mxu2 %v11222_v2  ;;  %v1840_v38 = vadd.f32 %v1839_v29, %v1827_v28  ;;  %v1852_v4 = vpop.f32.mrf.mxu2  ;;  %v7494_v22 = vld [vmem:[#allocation8 + $0x28] sm:$0xf0] }
 0x1af   : > { %v10369_v45 = vld [vmem:[#allocation8 + $0xba4] sm:$0xf0]  ;;  %4407 = vmatpush.bf16.msra.mxu2 %v7721_v16  ;;  %v10245_v28 = vld [vmem:[#allocation8 + $0x7cc] sm:$0xf]  ;;  %v7497_v36 = vor.u32 %v9997_v19, %v7494_v22 }
 0x1b0   : > { %v8965_v50 = vor.u32 %v10369_v45, %v8964_v43  ;;  %v8676_v52 = vld [vmem:[#allocation8 + $0x948] sm:$0xf]  ;;  %4382 = vmatpush.bf16.msra.mxu0 %v8709_v49  ;;  %4376 = vmatmul.bf16.vlgmr.msrb.gmra.mxu3 %v11224_v5  ;;  %v7558_v45 = vld [vmem:[#allocation8 + $0xa8] sm:$0xf0]  ;;  %v1853_v18 = vadd.f32 %v1852_v4, %v1840_v38 }
 0x1b1   : > { %v10297_v54 = vld [vmem:[#allocation8 + $0x964] sm:$0xf0]  ;;  %4420 = vmatpush.bf16.msra.mxu3 %v7977_v44  ;;  %v10013_v44 = vld [vmem:[#allocation8 + $0x8c] sm:$0xf] }
 0x1b2   : > { %v8932_v56 = vld [vmem:[#allocation8 + $0xb48] sm:$0xf]  ;;  %v8677_v3 = vor.u32 %v10297_v54, %v8676_v52  ;;  %4395 = vmatpush.bf16.msra.mxu1 %v8965_v50  ;;  %v11259_v50 = vadd.f32 %v1865_v46, %v1853_v18  ;;  %v7561_v54 = vor.u32 %v10013_v44, %v7558_v45  ;;  %v8742_v33 = vld [vmem:[#allocation8 + $0x9e8] sm:$0xf0] }
 0x1b3   : > { %v10361_v59 = vld [vmem:[#allocation8 + $0xb64] sm:$0xf0]  ;;  %4408 = vmatpush.bf16.msra.mxu2 %v7689_v51  ;;  %v1828_v51 = vpop.f32.mrf.mxu0  ;;  %v10373_v37 = vld [vmem:[#allocation8 + $0xbcc] sm:$0xf] }
 0x1b4   : > { %v8933_v6 = vor.u32 %v10361_v59, %v8932_v56  ;;  %v8644_v8 = vld [vmem:[#allocation8 + $0x908] sm:$0xf]  ;;  %4383 = vmatpush.bf16.msra.mxu0 %v8677_v3  ;;  %v7526_v3 = vld [vmem:[#allocation8 + $0x68] sm:$0xf0] }
 0x1b5   : > { %v10289_v10 = vld [vmem:[#allocation8 + $0x924] sm:$0xf0]  ;;  %4421 = vmatpush.bf16.msra.mxu3 %v7945_v58  ;;  %v8998_v38 = vld [vmem:[#allocation8 + $0xbe8] sm:$0xf0] }
 0x1b6   : > { %v8900_v11 = vld [vmem:[#allocation8 + $0xb08] sm:$0xf]  ;;  %v8645_v21 = vor.u32 %v10289_v10, %v8644_v8  ;;  %4396 = vmatpush.bf16.msra.mxu1 %v8933_v6  ;;  %v10069_v6 = vld [vmem:[#allocation8 + $0x24c] sm:$0xf]  ;;  %v1854_v20 = vpop.f32.mrf.mxu2 }
 0x1b7   : > { %v10353_v13 = vld [vmem:[#allocation8 + $0xb24] sm:$0xf0]  ;;  %4409 = vmatpush.bf16.msra.mxu2 %v7657_v7  ;;  %v7782_v7 = vld [vmem:[#allocation8 + $0x268] sm:$0xf0] }
 0x1b8   : > { %v8901_v23 = vor.u32 %v10353_v13, %v8900_v11  ;;  %v8612_v25 = vld [vmem:[#allocation8 + $0x8c8] sm:$0xf]  ;;  %4384 = vmatpush.bf16.msra.mxu0 %v8645_v21  ;;  %v7529_v13 = vor.u32 %v10005_v0, %v7526_v3  ;;  %v7785_v21 = vor.u32 %v10069_v6, %v7782_v7  ;;  %v10237_v4 = vld [vmem:[#allocation8 + $0x78c] sm:$0xf] }
 0x1b9   : > { %v10281_v26 = vld [vmem:[#allocation8 + $0x8e4] sm:$0xf0]  ;;  %4422 = vmatpush.bf16.msra.mxu3 %v7913_v12  ;;  %v10301_v44 = vld [vmem:[#allocation8 + $0x98c] sm:$0xf] }
 0x1ba   : > { %v8868_v27 = vld [vmem:[#allocation8 + $0xac8] sm:$0xf]  ;;  %v8613_v39 = vor.u32 %v10281_v26, %v8612_v25  ;;  %4397 = vmatpush.bf16.msra.mxu1 %v8901_v23  ;;  %v10061_v23 = vld [vmem:[#allocation8 + $0x20c] sm:$0xf]  ;;  %v1867_v25 = vpop.f32.mrf.mxu3 }
 0x1bb   : > { %v10345_v32 = vld [vmem:[#allocation8 + $0xae4] sm:$0xf0]  ;;  %4410 = vmatpush.bf16.msra.mxu2 %v7625_v24  ;;  %v7750_v24 = vld [vmem:[#allocation8 + $0x228] sm:$0xf0] }
 0x1bc   : > { %v8869_v40 = vor.u32 %v10345_v32, %v8868_v27  ;;  %v8580_v17 = vld [vmem:[#allocation8 + $0x888] sm:$0xf]  ;;  %4385 = vmatpush.bf16.msra.mxu0 %v8613_v39  ;;  %v10181_v26 = vld [vmem:[#allocation8 + $0x5cc] sm:$0xf]  ;;  %v7753_v39 = vor.u32 %v10061_v23, %v7750_v24 }
 0x1bd   : > { %v10273_v16 = vld [vmem:[#allocation8 + $0x8a4] sm:$0xf0]  ;;  %4423 = vmatpush.bf16.msra.mxu3 %v7881_v31  ;;  %v8230_v27 = vld [vmem:[#allocation8 + $0x5e8] sm:$0xf0] }
 0x1be   : > { %v8836_v42 = vld [vmem:[#allocation8 + $0xa88] sm:$0xf]  ;;  %v8581_v49 = vor.u32 %v10273_v16, %v8580_v17  ;;  %4398 = vmatpush.bf16.msra.mxu1 %v8869_v40  ;;  %v8486_v31 = vld [vmem:[#allocation8 + $0x7e8] sm:$0xf0]  ;;  %v8233_v40 = vor.u32 %v10181_v26, %v8230_v27 }
 0x1bf   : > { %v10337_v43 = vld [vmem:[#allocation8 + $0xaa4] sm:$0xf0]  ;;  %4411 = vmatpush.bf16.msra.mxu2 %v7593_v41  ;;  %v10309_v32 = vld [vmem:[#allocation8 + $0x9cc] sm:$0xf]  ;;  %v8489_v41 = vor.u32 %v10245_v28, %v8486_v31  ;;  %v11267_v22 = vpop.f32.mrf.mxu1 }
 0x1c0   : > { %v8837_v52 = vor.u32 %v10337_v43, %v8836_v42  ;;  %v8548_v56 = vld [vmem:[#allocation8 + $0x848] sm:$0xf]  ;;  %4386 = vmatpush.bf16.msra.mxu0 %v8581_v49  ;;  %v8745_v17 = vor.u32 %v10309_v32, %v8742_v33  ;;  %v10173_v16 = vld [vmem:[#allocation8 + $0x58c] sm:$0xf]  ;;  %v11265_v20 = vpop.f32.mrf.mxu0 }
 0x1c1   : > { %v10265_v58 = vld [vmem:[#allocation8 + $0x864] sm:$0xf0]  ;;  %4424 = vmatpush.bf16.msra.mxu3 %v7849_v9  ;;  %v8198_v42 = vld [vmem:[#allocation8 + $0x5a8] sm:$0xf0]  ;;  %v9001_v9 = vor.u32 %v10373_v37, %v8998_v38 }
 0x1c2   : > { %v8804_v59 = vld [vmem:[#allocation8 + $0xa48] sm:$0xf]  ;;  %v8549_v8 = vor.u32 %v10265_v58, %v8548_v56  ;;  %4399 = vmatpush.bf16.msra.mxu1 %v8837_v52  ;;  %v8454_v43 = vld [vmem:[#allocation8 + $0x7a8] sm:$0xf0]  ;;  %v8201_v47 = vor.u32 %v10173_v16, %v8198_v42 }
 0x1c3   : > { %v10329_v63 = vld [vmem:[#allocation8 + $0xa64] sm:$0xf0]  ;;  %4412 = vmatpush.bf16.msra.mxu2 %v7561_v54  ;;  %v8710_v45 = vld [vmem:[#allocation8 + $0x9a8] sm:$0xf0]  ;;  %v8457_v48 = vor.u32 %v10237_v4, %v8454_v43 }
 0x1c4   : > { %v8516_v10 = vld [vmem:[#allocation8 + $0x808] sm:$0xf]  ;;  %v8805_v12 = vor.u32 %v10329_v63, %v8804_v59  ;;  %4387 = vmatpush.bf16.msra.mxu0 %v8549_v8  ;;  %v10365_v18 = vld [vmem:[#allocation8 + $0xb8c] sm:$0xf]  ;;  %v8713_v49 = vor.u32 %v10301_v44, %v8710_v45 }
 0x1c5   : > { %v10257_v11 = vld [vmem:[#allocation8 + $0x824] sm:$0xf0]  ;;  %4425 = vmatpush.bf16.msra.mxu3 %v7817_v60  ;;  %v8966_v46 = vld [vmem:[#allocation8 + $0xba8] sm:$0xf0] }
 0x1c6   : > { %v8772_v14 = vld [vmem:[#allocation8 + $0xa08] sm:$0xf]  ;;  %v8517_v29 = vor.u32 %v10257_v11, %v8516_v10  ;;  %4400 = vmatpush.bf16.msra.mxu1 %v8805_v12  ;;  %v10165_v51 = vld [vmem:[#allocation8 + $0x54c] sm:$0xf]  ;;  %v8969_v56 = vor.u32 %v10365_v18, %v8966_v46 }
 0x1c7   : > { %v10321_v15 = vld [vmem:[#allocation8 + $0xa24] sm:$0xf0]  ;;  %4413 = vmatpush.bf16.msra.mxu2 %v7529_v13  ;;  %v8166_v52 = vld [vmem:[#allocation8 + $0x568] sm:$0xf0]  ;;  %v11271_v18 = vpop.f32.mrf.mxu3 }
 0x1c8   : > { %v8773_v35 = vor.u32 %v10321_v15, %v8772_v14  ;;  %4388 = vmatpush.bf16.msra.mxu0 %v8517_v29  ;;  %v10229_v54 = vld [vmem:[#allocation8 + $0x74c] sm:$0xf]  ;;  %v8169_v0 = vor.u32 %v10165_v51, %v8166_v52  ;;  %v4184_v45 = vpop.f32.mrf.mxu0 }
 0x1c9   : > { %4426 = vmatpush.bf16.msra.mxu3 %v7785_v21  ;;  %v8422_v58 = vld [vmem:[#allocation8 + $0x768] sm:$0xf0]  ;;  %v10178_v45 = vld [vmem:[#allocation8 + $0x5ac] sm:$0xf0] }
 0x1ca   : > { %4401 = vmatpush.bf16.msra.mxu1 %v8773_v35  ;;  %v10293_v59 = vld [vmem:[#allocation8 + $0x94c] sm:$0xf]  ;;  %v8425_v3 = vor.u32 %v10229_v54, %v8422_v58 }
 0x1cb   : > { %4414 = vmatpush.bf16.msra.mxu2 %v7497_v36  ;;  %4389 = vmatmul.bf16.vlgmr.msra.gmra.mxu0 %v11235_v53  ;;  %v8678_v30 = vld [vmem:[#allocation8 + $0x968] sm:$0xf0] }
 0x1cc   : > { %4433 = vmatpush.bf16.msrb.mxu0 %v8233_v40  ;;  %v10357_v60 = vld [vmem:[#allocation8 + $0xb4c] sm:$0xf]  ;;  %v8681_v6 = vor.u32 %v10293_v59, %v8678_v30 }
 0x1cd   : > { %4427 = vmatpush.bf16.msra.mxu3 %v7753_v39  ;;  %4402 = vmatmul.bf16.vlgmr.msra.gmra.mxu1 %v11237_v57  ;;  %v8934_v63 = vld [vmem:[#allocation8 + $0xb68] sm:$0xf0] }
 0x1ce   : > { %4446 = vmatpush.bf16.msrb.mxu1 %v8489_v41  ;;  %4415 = vmatmul.bf16.vlgmr.msra.gmra.mxu2 %v11218_v62  ;;  %v10157_v7 = vld [vmem:[#allocation8 + $0x50c] sm:$0xf]  ;;  %v8937_v11 = vor.u32 %v10357_v60, %v8934_v63 }
 0x1cf   : > { %4459 = vmatpush.bf16.msrb.mxu2 %v8745_v17  ;;  %v8134_v8 = vld [vmem:[#allocation8 + $0x528] sm:$0xf0] }
 0x1d0   : > { %4434 = vmatpush.bf16.msrb.mxu0 %v8201_v47  ;;  %4428 = vmatmul.bf16.vlgmr.msra.gmra.mxu3 %v11220_v1  ;;  %v10221_v10 = vld [vmem:[#allocation8 + $0x70c] sm:$0xf]  ;;  %v8137_v21 = vor.u32 %v10157_v7, %v8134_v8  ;;  %v4197_v47 = vpop.f32.mrf.mxu1 }
 0x1d1   : > { %4472 = vmatpush.bf16.msrb.mxu3 %v9001_v9  ;;  %v8390_v12 = vld [vmem:[#allocation8 + $0x728] sm:$0xf0]  ;;  %v11269_v9 = vpop.f32.mrf.mxu2  ;;  %v10242_v47 = vld [vmem:[#allocation8 + $0x7ac] sm:$0xf0] }
 0x1d2   : > { %4447 = vmatpush.bf16.msrb.mxu1 %v8457_v48  ;;  %v10285_v13 = vld [vmem:[#allocation8 + $0x90c] sm:$0xf]  ;;  %v8393_v23 = vor.u32 %v10221_v10, %v8390_v12 }
 0x1d3   : > { %4460 = vmatpush.bf16.msrb.mxu2 %v8713_v49  ;;  %v8646_v14 = vld [vmem:[#allocation8 + $0x928] sm:$0xf0] }
 0x1d4   : > { %v10349_v15 = vld [vmem:[#allocation8 + $0xb0c] sm:$0xf]  ;;  %4435 = vmatpush.bf16.msrb.mxu0 %v8169_v0  ;;  %v8649_v24 = vor.u32 %v10285_v13, %v8646_v14 }
 0x1d5   : > { %4473 = vmatpush.bf16.msrb.mxu3 %v8969_v56  ;;  %v8902_v19 = vld [vmem:[#allocation8 + $0xb28] sm:$0xf0] }
 0x1d6   : > { %4448 = vmatpush.bf16.msrb.mxu1 %v8425_v3  ;;  %v10149_v25 = vld [vmem:[#allocation8 + $0x4cc] sm:$0xf]  ;;  %v8905_v28 = vor.u32 %v10349_v15, %v8902_v19 }
 0x1d7   : > { %4461 = vmatpush.bf16.msrb.mxu2 %v8681_v6  ;;  %v8102_v26 = vld [vmem:[#allocation8 + $0x4e8] sm:$0xf0] }
 0x1d8   : > { %v10213_v27 = vld [vmem:[#allocation8 + $0x6cc] sm:$0xf]  ;;  %4436 = vmatpush.bf16.msrb.mxu0 %v8137_v21  ;;  %v8105_v36 = vor.u32 %v10149_v25, %v8102_v26  ;;  %v7980_v25 = vld [vmem:[#allocation8 + $0x3d0] sm:$0xf]  ;;  %v4223_v26 = vpop.f32.mrf.mxu3 }
 0x1d9   : > { %4474 = vmatpush.bf16.msrb.mxu3 %v8937_v11  ;;  %v8358_v29 = vld [vmem:[#allocation8 + $0x6e8] sm:$0xf0]  ;;  %v4210_v21 = vpop.f32.mrf.mxu2 }
 0x1da   : > { %v10277_v31 = vld [vmem:[#allocation8 + $0x8cc] sm:$0xf]  ;;  %4449 = vmatpush.bf16.msrb.mxu1 %v8393_v23  ;;  %v8361_v37 = vor.u32 %v10213_v27, %v8358_v29  ;;  %v7724_v23 = vld [vmem:[#allocation8 + $0x1d0] sm:$0xf] }
 0x1db   : > { %v8614_v32 = vld [vmem:[#allocation8 + $0x8e8] sm:$0xf0]  ;;  %4462 = vmatpush.bf16.msrb.mxu2 %v8649_v24  ;;  %v10058_v24 = vld [vmem:[#allocation8 + $0x1ec] sm:$0xf0] }
 0x1dc   : > { %v10341_v33 = vld [vmem:[#allocation8 + $0xacc] sm:$0xf]  ;;  %v8617_v38 = vor.u32 %v10277_v31, %v8614_v32  ;;  %4437 = vmatpush.bf16.msrb.mxu0 %v8105_v36  ;;  %v8236_v29 = vld [vmem:[#allocation8 + $0x5d0] sm:$0xf] }
 0x1dd   : > { %v8870_v35 = vld [vmem:[#allocation8 + $0xae8] sm:$0xf0]  ;;  %4475 = vmatpush.bf16.msrb.mxu3 %v8905_v28  ;;  %v10122_v28 = vld [vmem:[#allocation8 + $0x3ec] sm:$0xf0] }
 0x1de   : > { %v10141_v39 = vld [vmem:[#allocation8 + $0x48c] sm:$0xf]  ;;  %v8873_v17 = vor.u32 %v10341_v33, %v8870_v35  ;;  %4450 = vmatpush.bf16.msrb.mxu1 %v8361_v37  ;;  %v10186_v31 = vld [vmem:[#allocation8 + $0x5ec] sm:$0xf0]  ;;  %v4196_v37 = vadd.f32 %v11267_v22, %v11265_v20 }
 0x1df   : > { %v8070_v40 = vld [vmem:[#allocation8 + $0x4a8] sm:$0xf0]  ;;  %4463 = vmatpush.bf16.msrb.mxu2 %v8617_v38  ;;  %v8492_v35 = vld [vmem:[#allocation8 + $0x7d0] sm:$0xf] }
 0x1e0   : > { %v10205_v41 = vld [vmem:[#allocation8 + $0x68c] sm:$0xf]  ;;  %v8073_v46 = vor.u32 %v10141_v39, %v8070_v40  ;;  %v10250_v36 = vld [vmem:[#allocation8 + $0x7ec] sm:$0xf0]  ;;  %v7725_v39 = vor.u32 %v10058_v24, %v7724_v23  ;;  %v7981_v40 = vor.u32 %v10122_v28, %v7980_v25  ;;  %v4209_v20 = vadd.f32 %v11269_v9, %v4196_v37  ;;  %v4247_v25 = vpop.f32.mrf.mxu1 }
 0x1e1   : > { %v8326_v16 = vld [vmem:[#allocation8 + $0x6a8] sm:$0xf0]  ;;  %4476 = vmatpush.bf16.msrb.mxu3 %v8873_v17  ;;  %v7692_v17 = vld [vmem:[#allocation8 + $0x190] sm:$0xf]  ;;  %v4826_v23 = vperm.slane %v11210_v55, 0 }
 0x1e2   : > { %v10269_v42 = vld [vmem:[#allocation8 + $0x88c] sm:$0xf]  ;;  %v8329_v48 = vor.u32 %v10205_v41, %v8326_v16  ;;  %4438 = vmatpush.bf16.msrb.mxu0 %v8073_v46  ;;  %v8237_v41 = vor.u32 %v10186_v31, %v8236_v29  ;;  %v10050_v16 = vld [vmem:[#allocation8 + $0x1ac] sm:$0xf0] }
 0x1e3   : > { %v8582_v4 = vld [vmem:[#allocation8 + $0x8a8] sm:$0xf0]  ;;  %v8460_v46 = vld [vmem:[#allocation8 + $0x790] sm:$0xf] }
 0x1e4   : > { %v10333_v43 = vld [vmem:[#allocation8 + $0xa8c] sm:$0xf]  ;;  %v8585_v49 = vor.u32 %v10269_v42, %v8582_v4  ;;  %4451 = vmatpush.bf16.msrb.mxu1 %v8329_v48  ;;  %v7948_v42 = vld [vmem:[#allocation8 + $0x390] sm:$0xf]  ;;  %v8493_v4 = vor.u32 %v10250_v36, %v8492_v35  ;;  %v7693_v48 = vor.u32 %v10050_v16, %v7692_v17 }
 0x1e5   : > { %v8838_v44 = vld [vmem:[#allocation8 + $0xaa8] sm:$0xf0]  ;;  %v10234_v9 = vld [vmem:[#allocation8 + $0x76c] sm:$0xf0] }
 0x1e6   : > { %v10133_v51 = vld [vmem:[#allocation8 + $0x44c] sm:$0xf]  ;;  %v8841_v56 = vor.u32 %v10333_v43, %v8838_v44  ;;  %4464 = vmatpush.bf16.msrb.mxu2 %v8585_v49  ;;  %v10114_v43 = vld [vmem:[#allocation8 + $0x3ac] sm:$0xf0] }
 0x1e7   : > { %v8038_v52 = vld [vmem:[#allocation8 + $0x468] sm:$0xf0]  ;;  %v8204_v44 = vld [vmem:[#allocation8 + $0x590] sm:$0xf]  ;;  %v7949_v22 = vor.u32 %v10114_v43, %v7948_v42 }
 0x1e8   : > { %v10197_v54 = vld [vmem:[#allocation8 + $0x64c] sm:$0xf]  ;;  %v8041_v0 = vor.u32 %v10133_v51, %v8038_v52  ;;  %4477 = vmatpush.bf16.msrb.mxu3 %v8841_v56  ;;  %v8205_v49 = vor.u32 %v10178_v45, %v8204_v44  ;;  %v7660_v51 = vld [vmem:[#allocation8 + $0x150] sm:$0xf]  ;;  %v8461_v56 = vor.u32 %v10242_v47, %v8460_v46  ;;  %v4260_v47 = vpop.f32.mrf.mxu2 }
 0x1e9   : > { %v8294_v58 = vld [vmem:[#allocation8 + $0x668] sm:$0xf0]  ;;  %v10042_v52 = vld [vmem:[#allocation8 + $0x16c] sm:$0xf0] }
 0x1ea   : > { %v10261_v59 = vld [vmem:[#allocation8 + $0x84c] sm:$0xf]  ;;  %v8297_v7 = vor.u32 %v10197_v54, %v8294_v58  ;;  %4439 = vmatpush.bf16.msrb.mxu0 %v8041_v0  ;;  %v7916_v54 = vld [vmem:[#allocation8 + $0x350] sm:$0xf]  ;;  %v4222_v0 = vadd.f32 %v11271_v18, %v4209_v20 }
 0x1eb   : > { %v8550_v30 = vld [vmem:[#allocation8 + $0x868] sm:$0xf0]  ;;  %v10106_v58 = vld [vmem:[#allocation8 + $0x36c] sm:$0xf0] }
 0x1ec   : > { %v10325_v60 = vld [vmem:[#allocation8 + $0xa4c] sm:$0xf]  ;;  %v8553_v8 = vor.u32 %v10261_v59, %v8550_v30  ;;  %4452 = vmatpush.bf16.msrb.mxu1 %v8297_v7  ;;  %v8172_v59 = vld [vmem:[#allocation8 + $0x550] sm:$0xf] }
 0x1ed   : > { %v8806_v63 = vld [vmem:[#allocation8 + $0xa68] sm:$0xf0]  ;;  %v10170_v30 = vld [vmem:[#allocation8 + $0x56c] sm:$0xf0] }
 0x1ee   : > { %v10125_v3 = vld [vmem:[#allocation8 + $0x40c] sm:$0xf]  ;;  %v8809_v13 = vor.u32 %v10325_v60, %v8806_v63  ;;  %4465 = vmatpush.bf16.msrb.mxu2 %v8553_v8  ;;  %v8428_v60 = vld [vmem:[#allocation8 + $0x750] sm:$0xf]  ;;  %v7661_v63 = vor.u32 %v10042_v52, %v7660_v51 }
 0x1ef   : > { %v8006_v6 = vld [vmem:[#allocation8 + $0x428] sm:$0xf0]  ;;  %v7628_v7 = vld [vmem:[#allocation8 + $0x110] sm:$0xf] }
 0x1f0   : > { %v10189_v10 = vld [vmem:[#allocation8 + $0x60c] sm:$0xf]  ;;  %v8009_v27 = vor.u32 %v10125_v3, %v8006_v6  ;;  %4478 = vmatpush.bf16.msrb.mxu3 %v8809_v13  ;;  %v7917_v3 = vor.u32 %v10106_v58, %v7916_v54  ;;  %v8173_v6 = vor.u32 %v10170_v30, %v8172_v59  ;;  %v10034_v8 = vld [vmem:[#allocation8 + $0x12c] sm:$0xf0]  ;;  %v4249_v54 = vpop.f32.mrf.mxu1 }
 0x1f1   : > { %v8262_v11 = vld [vmem:[#allocation8 + $0x628] sm:$0xf0]  ;;  %v8140_v13 = vld [vmem:[#allocation8 + $0x510] sm:$0xf]  ;;  %v7629_v18 = vor.u32 %v10034_v8, %v7628_v7 }
 0x1f2   : > { %v10253_v12 = vld [vmem:[#allocation8 + $0x80c] sm:$0xf]  ;;  %v8265_v32 = vor.u32 %v10189_v10, %v8262_v11  ;;  %4440 = vmatpush.bf16.msrb.mxu0 %v8009_v27  ;;  %v7884_v10 = vld [vmem:[#allocation8 + $0x310] sm:$0xf]  ;;  %v8429_v11 = vor.u32 %v10234_v9, %v8428_v60 }
 0x1f3   : > { %v8518_v14 = vld [vmem:[#allocation8 + $0x828] sm:$0xf0]  ;;  %v10226_v21 = vld [vmem:[#allocation8 + $0x72c] sm:$0xf0] }
 0x1f4   : > { %v10317_v15 = vld [vmem:[#allocation8 + $0xa0c] sm:$0xf]  ;;  %v8521_v33 = vor.u32 %v10253_v12, %v8518_v14  ;;  %4453 = vmatpush.bf16.msrb.mxu1 %v8265_v32  ;;  %v10098_v12 = vld [vmem:[#allocation8 + $0x32c] sm:$0xf0] }
 0x1f5   : > { %v8774_v19 = vld [vmem:[#allocation8 + $0xa28] sm:$0xf0]  ;;  %4441 = vmatmul.bf16.vlgmr.msrb.gmra.mxu0 %v11222_v2  ;;  %v10162_v14 = vld [vmem:[#allocation8 + $0x52c] sm:$0xf0]  ;;  %v7885_v26 = vor.u32 %v10098_v12, %v7884_v10 }
 0x1f6   : > { %v8777_v38 = vor.u32 %v10317_v15, %v8774_v19  ;;  %4466 = vmatpush.bf16.msrb.mxu2 %v8521_v33  ;;  %4485 = vmatpush.bf16.msra.mxu0 %v7725_v39  ;;  %v4234_v15 = vpop.f32.mrf.mxu0  ;;  %v8396_v19 = vld [vmem:[#allocation8 + $0x710] sm:$0xf]  ;;  %v8141_v27 = vor.u32 %v10162_v14, %v8140_v13 }
 0x1f7   : > { %4454 = vmatmul.bf16.vlgmr.msrb.gmra.mxu1 %v11224_v5  ;;  %v4235_v24 = vadd.f32 %v4234_v15, %v4222_v0  ;;  %v7596_v28 = vld [vmem:[#allocation8 + $0xd0] sm:$0xf]  ;;  %v8397_v32 = vor.u32 %v10226_v21, %v8396_v19 }
 0x1f8   : > { %4479 = vmatpush.bf16.msrb.mxu3 %v8777_v38  ;;  %4498 = vmatpush.bf16.msra.mxu1 %v7981_v40  ;;  %v10026_v29 = vld [vmem:[#allocation8 + $0xec] sm:$0xf0] }
 0x1f9   : > { %4467 = vmatmul.bf16.vlgmr.msrb.gmra.mxu2 %v11235_v53  ;;  %v7852_v31 = vld [vmem:[#allocation8 + $0x2d0] sm:$0xf]  ;;  %v4248_v33 = vadd.f32 %v4247_v25, %v4235_v24  ;;  %v7597_v40 = vor.u32 %v10026_v29, %v7596_v28  ;;  %v4262_v25 = vpop.f32.mrf.mxu2 }
 0x1fa   : > { %4511 = vmatpush.bf16.msra.mxu2 %v8237_v41  ;;  %4486 = vmatpush.bf16.msra.mxu0 %v7693_v48  ;;  %v10090_v35 = vld [vmem:[#allocation8 + $0x2ec] sm:$0xf0] }
 0x1fb   : > { %4480 = vmatmul.bf16.vlgmr.msrb.gmra.mxu3 %v11237_v57  ;;  %v8108_v36 = vld [vmem:[#allocation8 + $0x4d0] sm:$0xf]  ;;  %v11282_v55 = vmul.f32 %v4826_v23, %v4248_v33  ;;  %v7853_v41 = vor.u32 %v10090_v35, %v7852_v31  ;;  %v10054_v33 = vld [vmem:[#allocation8 + $0x1d4] sm:$0xf] }
 0x1fc   : > { %4524 = vmatpush.bf16.msra.mxu3 %v8493_v4  ;;  %4499 = vmatpush.bf16.msra.mxu1 %v7949_v22  ;;  %v10154_v37 = vld [vmem:[#allocation8 + $0x4ec] sm:$0xf0]  ;;  %v4273_v22 = vpop.f32.mrf.mxu3  ;;  %v7726_v35 = vld [vmem:[#allocation8 + $0x1f0] sm:$0xf0] }
 0x1fd   : > { %v8364_v38 = vld [vmem:[#allocation8 + $0x6d0] sm:$0xf]  ;;  %v8109_v17 = vor.u32 %v10154_v37, %v8108_v36  ;;  %v11284_v52 = vadd.f32 %v4273_v22, %v4260_v47  ;;  %v7694_v47 = vld [vmem:[#allocation8 + $0x1b0] sm:$0xf0] }
 0x1fe   : > { %4512 = vmatpush.bf16.msra.mxu2 %v8205_v49  ;;  %4487 = vmatpush.bf16.msra.mxu0 %v7661_v63  ;;  %v10218_v39 = vld [vmem:[#allocation8 + $0x6ec] sm:$0xf0]  ;;  %v4236_v49 = vpop.f32.mrf.mxu0 }
 0x1ff   : > { %v7564_v16 = vld [vmem:[#allocation8 + $0x90] sm:$0xf]  ;;  %v8365_v43 = vor.u32 %v10218_v39, %v8364_v38  ;;  %v10118_v38 = vld [vmem:[#allocation8 + $0x3d4] sm:$0xf] }
 0x200   : > { %4525 = vmatpush.bf16.msra.mxu3 %v8461_v56  ;;  %4500 = vmatpush.bf16.msra.mxu1 %v7917_v3  ;;  %v10018_v42 = vld [vmem:[#allocation8 + $0xac] sm:$0xf0]  ;;  %v7982_v39 = vld [vmem:[#allocation8 + $0x3f0] sm:$0xf0] }
 0x201   : > { %v7820_v4 = vld [vmem:[#allocation8 + $0x290] sm:$0xf]  ;;  %v7565_v51 = vor.u32 %v10018_v42, %v7564_v16  ;;  %v7729_v16 = vor.u32 %v10054_v33, %v7726_v35  ;;  %v10022_v35 = vld [vmem:[#allocation8 + $0xd4] sm:$0xf] }
 0x202   : > { %4513 = vmatpush.bf16.msra.mxu2 %v8173_v6  ;;  %4488 = vmatpush.bf16.msra.mxu0 %v7629_v18  ;;  %v10082_v44 = vld [vmem:[#allocation8 + $0x2ac] sm:$0xf0] }
 0x203   : > { %v8076_v45 = vld [vmem:[#allocation8 + $0x490] sm:$0xf]  ;;  %v7821_v56 = vor.u32 %v10082_v44, %v7820_v4  ;;  %v7985_v44 = vor.u32 %v10118_v38, %v7982_v39  ;;  %v10086_v38 = vld [vmem:[#allocation8 + $0x2d4] sm:$0xf] }
 0x204   : > { %4526 = vmatpush.bf16.msra.mxu3 %v8429_v11  ;;  %4501 = vmatpush.bf16.msra.mxu1 %v7885_v26  ;;  %v10146_v46 = vld [vmem:[#allocation8 + $0x4ac] sm:$0xf0]  ;;  %v4275_v29 = vpop.f32.mrf.mxu3  ;;  %v7854_v39 = vld [vmem:[#allocation8 + $0x2f0] sm:$0xf0] }
 0x205   : > { %v8332_v48 = vld [vmem:[#allocation8 + $0x690] sm:$0xf]  ;;  %v8077_v58 = vor.u32 %v10146_v46, %v8076_v45  ;;  %v10046_v46 = vld [vmem:[#allocation8 + $0x194] sm:$0xf] }
 0x206   : > { %4514 = vmatpush.bf16.msra.mxu2 %v8141_v27  ;;  %v10210_v20 = vld [vmem:[#allocation8 + $0x6ac] sm:$0xf0]  ;;  %4489 = vmatpush.bf16.msra.mxu0 %v7597_v40 }
 0x207   : > { %v7532_v59 = vld [vmem:[#allocation8 + $0x50] sm:$0xf]  ;;  %v8333_v9 = vor.u32 %v10210_v20, %v8332_v48  ;;  %v10110_v48 = vld [vmem:[#allocation8 + $0x394] sm:$0xf] }
 0x208   : > { %4527 = vmatpush.bf16.msra.mxu3 %v8397_v32  ;;  %4502 = vmatpush.bf16.msra.mxu1 %v7853_v41  ;;  %v10010_v30 = vld [vmem:[#allocation8 + $0x6c] sm:$0xf0]  ;;  %v7950_v20 = vld [vmem:[#allocation8 + $0x3b0] sm:$0xf0] }
 0x209   : > { %v7788_v60 = vld [vmem:[#allocation8 + $0x250] sm:$0xf]  ;;  %v7533_v8 = vor.u32 %v10010_v30, %v7532_v59  ;;  %v7953_v59 = vor.u32 %v10110_v48, %v7950_v20  ;;  %v7566_v48 = vld [vmem:[#allocation8 + $0xb0] sm:$0xf0] }
 0x20a   : > { %4515 = vmatpush.bf16.msra.mxu2 %v8109_v17  ;;  %v10074_v63 = vld [vmem:[#allocation8 + $0x26c] sm:$0xf0]  ;;  %4490 = vmatpush.bf16.msra.mxu0 %v7565_v51  ;;  %v7697_v51 = vor.u32 %v10046_v46, %v7694_v47  ;;  %v10014_v47 = vld [vmem:[#allocation8 + $0x94] sm:$0xf] }
 0x20b   : > { %v8044_v0 = vld [vmem:[#allocation8 + $0x450] sm:$0xf]  ;;  %v7789_v12 = vor.u32 %v10074_v63, %v7788_v60  ;;  %v10038_v60 = vld [vmem:[#allocation8 + $0x154] sm:$0xf] }
 0x20c   : > { %4528 = vmatpush.bf16.msra.mxu3 %v8365_v43  ;;  %v10138_v3 = vld [vmem:[#allocation8 + $0x46c] sm:$0xf0]  ;;  %4503 = vmatpush.bf16.msra.mxu1 %v7821_v56  ;;  %v10102_v63 = vld [vmem:[#allocation8 + $0x354] sm:$0xf] }
 0x20d   : > { %v8300_v6 = vld [vmem:[#allocation8 + $0x650] sm:$0xf]  ;;  %v8045_v13 = vor.u32 %v10138_v3, %v8044_v0  ;;  %v7918_v0 = vld [vmem:[#allocation8 + $0x370] sm:$0xf0] }
 0x20e   : > { %v10202_v7 = vld [vmem:[#allocation8 + $0x66c] sm:$0xf0]  ;;  %4516 = vmatpush.bf16.msra.mxu2 %v8077_v58  ;;  %4491 = vmatpush.bf16.msra.mxu0 %v7533_v8  ;;  %v10078_v20 = vld [vmem:[#allocation8 + $0x294] sm:$0xf] }
 0x20f   : > { %v7500_v10 = vld [vmem:[#allocation8 + $0x10] sm:$0xf]  ;;  %v8301_v21 = vor.u32 %v10202_v7, %v8300_v6 }
 0x210   : > { %v10002_v11 = vld [vmem:[#allocation8 + $0x2c] sm:$0xf0]  ;;  %4529 = vmatpush.bf16.msra.mxu3 %v8333_v9  ;;  %4504 = vmatpush.bf16.msra.mxu1 %v7789_v12  ;;  %v7662_v9 = vld [vmem:[#allocation8 + $0x170] sm:$0xf0]  ;;  %v7921_v12 = vor.u32 %v10102_v63, %v7918_v0 }
 0x211   : > { %v7756_v14 = vld [vmem:[#allocation8 + $0x210] sm:$0xf]  ;;  %v7501_v31 = vor.u32 %v10002_v11, %v7500_v10  ;;  %v7665_v7 = vor.u32 %v10038_v60, %v7662_v9 }
 0x212   : > { %v10066_v15 = vld [vmem:[#allocation8 + $0x22c] sm:$0xf0]  ;;  %4517 = vmatpush.bf16.msra.mxu2 %v8045_v13 }
 0x213   : > { %v8012_v19 = vld [vmem:[#allocation8 + $0x410] sm:$0xf]  ;;  %v7757_v36 = vor.u32 %v10066_v15, %v7756_v14  ;;  %4492 = vmatpush.bf16.msra.mxu0 %v7501_v31  ;;  %v10030_v14 = vld [vmem:[#allocation8 + $0x114] sm:$0xf] }
 0x214   : > { %v10130_v23 = vld [vmem:[#allocation8 + $0x42c] sm:$0xf0]  ;;  %4530 = vmatpush.bf16.msra.mxu3 %v8301_v21  ;;  %v7630_v15 = vld [vmem:[#allocation8 + $0x130] sm:$0xf0] }
 0x215   : > { %v8268_v24 = vld [vmem:[#allocation8 + $0x610] sm:$0xf]  ;;  %v8013_v37 = vor.u32 %v10130_v23, %v8012_v19  ;;  %4505 = vmatpush.bf16.msra.mxu1 %v7757_v36  ;;  %v10094_v19 = vld [vmem:[#allocation8 + $0x314] sm:$0xf]  ;;  %v7633_v25 = vor.u32 %v10030_v14, %v7630_v15 }
 0x216   : > { %v10194_v18 = vld [vmem:[#allocation8 + $0x62c] sm:$0xf0]  ;;  %4493 = vmatmul.bf16.vlgmr.msra.gmra.mxu0 %v11218_v62  ;;  %v7886_v21 = vld [vmem:[#allocation8 + $0x330] sm:$0xf0] }
 0x217   : > { %v8748_v26 = vld [vmem:[#allocation8 + $0x9d0] sm:$0xf]  ;;  %v8269_v40 = vor.u32 %v10194_v18, %v8268_v24  ;;  %4518 = vmatpush.bf16.msra.mxu2 %v8013_v37  ;;  %v4286_v24 = vpop.f32.mrf.mxu0  ;;  %v7598_v36 = vld [vmem:[#allocation8 + $0xf0] sm:$0xf0] }
 0x218   : > { %v10314_v27 = vld [vmem:[#allocation8 + $0x9ec] sm:$0xf0]  ;;  %4506 = vmatmul.bf16.vlgmr.msra.gmra.mxu1 %v11220_v1 }
 0x219   : > { %v9004_v28 = vld [vmem:[#allocation8 + $0xbd0] sm:$0xf]  ;;  %v8749_v41 = vor.u32 %v10314_v27, %v8748_v26  ;;  %4531 = vmatpush.bf16.msra.mxu3 %v8269_v40  ;;  %v4287_v26 = vadd.f32 %v4286_v24, %v11284_v52  ;;  %v4299_v27 = vpop.f32.mrf.mxu1 }
 0x21a   : > { %v10378_v32 = vld [vmem:[#allocation8 + $0xbec] sm:$0xf0]  ;;  %4519 = vmatmul.bf16.vlgmr.msra.gmra.mxu2 %v11222_v2 }
 0x21b   : > { %v9005_v17 = vor.u32 %v10378_v32, %v9004_v28  ;;  %v8716_v42 = vld [vmem:[#allocation8 + $0x990] sm:$0xf]  ;;  %4537 = vmatpush.bf16.msrb.mxu0 %v8749_v41  ;;  %4563 = vmatpush.bf16.msrb.mxu2 %v7729_v16  ;;  %v7889_v32 = vor.u32 %v10094_v19, %v7886_v21  ;;  %v4300_v37 = vadd.f32 %v4299_v27, %v4287_v26  ;;  %v4312_v16 = vpop.f32.mrf.mxu2  ;;  %v10062_v26 = vld [vmem:[#allocation8 + $0x214] sm:$0xf] }
 0x21c   : > { %v10306_v4 = vld [vmem:[#allocation8 + $0x9ac] sm:$0xf0]  ;;  %4532 = vmatmul.bf16.vlgmr.msra.gmra.mxu3 %v11224_v5  ;;  %v7758_v27 = vld [vmem:[#allocation8 + $0x230] sm:$0xf0] }
 0x21d   : > { %v8972_v43 = vld [vmem:[#allocation8 + $0xb90] sm:$0xf]  ;;  %v8717_v22 = vor.u32 %v10306_v4, %v8716_v42  ;;  %4550 = vmatpush.bf16.msrb.mxu1 %v9005_v17  ;;  %4576 = vmatpush.bf16.msrb.mxu3 %v7985_v44  ;;  %v7601_v17 = vor.u32 %v10022_v35, %v7598_v36  ;;  %v4313_v44 = vadd.f32 %v4312_v16, %v4300_v37  ;;  %v8494_v35 = vld [vmem:[#allocation8 + $0x7f0] sm:$0xf0] }
 0x21e   : > { %v10370_v45 = vld [vmem:[#allocation8 + $0xbac] sm:$0xf0]  ;;  %v10310_v36 = vld [vmem:[#allocation8 + $0x9d4] sm:$0xf] }
 0x21f   : > { %v8973_v49 = vor.u32 %v10370_v45, %v8972_v43  ;;  %v8684_v54 = vld [vmem:[#allocation8 + $0x950] sm:$0xf]  ;;  %4538 = vmatpush.bf16.msrb.mxu0 %v8717_v22  ;;  %4564 = vmatpush.bf16.msrb.mxu2 %v7697_v51  ;;  %v7857_v43 = vor.u32 %v10086_v38, %v7854_v39  ;;  %v4325_v45 = vpop.f32.mrf.mxu3  ;;  %v7822_v22 = vld [vmem:[#allocation8 + $0x2b0] sm:$0xf0] }
 0x220   : > { %v10298_v56 = vld [vmem:[#allocation8 + $0x96c] sm:$0xf0]  ;;  %v4326_v51 = vadd.f32 %v4325_v45, %v4313_v44  ;;  %v8750_v37 = vld [vmem:[#allocation8 + $0x9f0] sm:$0xf0] }
 0x221   : > { %v8940_v58 = vld [vmem:[#allocation8 + $0xb50] sm:$0xf]  ;;  %v8685_v3 = vor.u32 %v10298_v56, %v8684_v54  ;;  %4551 = vmatpush.bf16.msrb.mxu1 %v8973_v49  ;;  %4577 = vmatpush.bf16.msrb.mxu3 %v7953_v59  ;;  %v4827_v49 = vperm.slane %v11231_v61, 0  ;;  %v4288_v56 = vpop.f32.mrf.mxu0  ;;  %v7569_v59 = vor.u32 %v10014_v47, %v7566_v48  ;;  %v4301_v63 = vpop.f32.mrf.mxu1  ;;  %v10070_v61 = vld [vmem:[#allocation8 + $0x254] sm:$0xf] }
 0x222   : > { %v10362_v30 = vld [vmem:[#allocation8 + $0xb6c] sm:$0xf0]  ;;  %v10238_v44 = vld [vmem:[#allocation8 + $0x794] sm:$0xf] }
 0x223   : > { %v8941_v6 = vor.u32 %v10362_v30, %v8940_v58  ;;  %v8652_v8 = vld [vmem:[#allocation8 + $0x910] sm:$0xf]  ;;  %4539 = vmatpush.bf16.msrb.mxu0 %v8685_v3  ;;  %4565 = vmatpush.bf16.msrb.mxu2 %v7665_v7  ;;  %v11292_v0 = vmul.f32 %v4827_v49, %v4326_v51  ;;  %v7825_v3 = vor.u32 %v10078_v20, %v7822_v22  ;;  %v10006_v7 = vld [vmem:[#allocation8 + $0x54] sm:$0xf]  ;;  %v4314_v24 = vpop.f32.mrf.mxu2 }
 0x224   : > { %v10290_v10 = vld [vmem:[#allocation8 + $0x92c] sm:$0xf0]  ;;  %v10302_v47 = vld [vmem:[#allocation8 + $0x994] sm:$0xf] }
 0x225   : > { %v8908_v11 = vld [vmem:[#allocation8 + $0xb10] sm:$0xf]  ;;  %v8653_v23 = vor.u32 %v10290_v10, %v8652_v8  ;;  %4552 = vmatpush.bf16.msrb.mxu1 %v8941_v6  ;;  %4578 = vmatpush.bf16.msrb.mxu3 %v7921_v12  ;;  %v7534_v8 = vld [vmem:[#allocation8 + $0x70] sm:$0xf0] }
 0x226   : > { %v10354_v13 = vld [vmem:[#allocation8 + $0xb2c] sm:$0xf0]  ;;  %v7790_v10 = vld [vmem:[#allocation8 + $0x270] sm:$0xf0]  ;;  %v7537_v15 = vor.u32 %v10006_v7, %v7534_v8 }
 0x227   : > { %v8909_v18 = vor.u32 %v10354_v13, %v8908_v11  ;;  %v8620_v28 = vld [vmem:[#allocation8 + $0x8d0] sm:$0xf]  ;;  %4540 = vmatpush.bf16.msrb.mxu0 %v8653_v23  ;;  %4566 = vmatpush.bf16.msrb.mxu2 %v7633_v25  ;;  %v9998_v23 = vld [vmem:[#allocation8 + $0x14] sm:$0xf] }
 0x228   : > { %v10282_v29 = vld [vmem:[#allocation8 + $0x8ec] sm:$0xf0]  ;;  %v7502_v25 = vld [vmem:[#allocation8 + $0x30] sm:$0xf0] }
 0x229   : > { %v8876_v31 = vld [vmem:[#allocation8 + $0xad0] sm:$0xf]  ;;  %v8621_v40 = vor.u32 %v10282_v29, %v8620_v28  ;;  %4553 = vmatpush.bf16.msrb.mxu1 %v8909_v18  ;;  %4579 = vmatpush.bf16.msrb.mxu3 %v7889_v32  ;;  %v7793_v18 = vor.u32 %v10070_v61, %v7790_v10  ;;  %v4327_v28 = vpop.f32.mrf.mxu3  ;;  %v10182_v29 = vld [vmem:[#allocation8 + $0x5d4] sm:$0xf]  ;;  %v7505_v39 = vor.u32 %v9998_v23, %v7502_v25  ;;  %v4338_v24 = vpop.f32.mrf.mxu0 }
 0x22a   : > { %v10346_v33 = vld [vmem:[#allocation8 + $0xaec] sm:$0xf0]  ;;  %v10246_v32 = vld [vmem:[#allocation8 + $0x7d4] sm:$0xf]  ;;  %v4351_v25 = vpop.f32.mrf.mxu1 }
 0x22b   : > { %v8877_v41 = vor.u32 %v10346_v33, %v8876_v31  ;;  %v8588_v52 = vld [vmem:[#allocation8 + $0x890] sm:$0xf]  ;;  %4541 = vmatpush.bf16.msrb.mxu0 %v8621_v40  ;;  %4567 = vmatpush.bf16.msrb.mxu2 %v7601_v17  ;;  %v8238_v31 = vld [vmem:[#allocation8 + $0x5f0] sm:$0xf0]  ;;  %v7761_v17 = vor.u32 %v10062_v26, %v7758_v27 }
 0x22c   : > { %v10274_v42 = vld [vmem:[#allocation8 + $0x8ac] sm:$0xf0]  ;;  %v10374_v40 = vld [vmem:[#allocation8 + $0xbd4] sm:$0xf]  ;;  %v8241_v16 = vor.u32 %v10182_v29, %v8238_v31 }
 0x22d   : > { %v8844_v4 = vld [vmem:[#allocation8 + $0xa90] sm:$0xf]  ;;  %v8589_v54 = vor.u32 %v10274_v42, %v8588_v52  ;;  %4554 = vmatpush.bf16.msrb.mxu1 %v8877_v41  ;;  %4580 = vmatpush.bf16.msrb.mxu3 %v7857_v43  ;;  %v9006_v41 = vld [vmem:[#allocation8 + $0xbf0] sm:$0xf0]  ;;  %v8497_v52 = vor.u32 %v10246_v32, %v8494_v35  ;;  %v8753_v42 = vor.u32 %v10310_v36, %v8750_v37 }
 0x22e   : > { %v10338_v46 = vld [vmem:[#allocation8 + $0xaac] sm:$0xf0]  ;;  %v8206_v43 = vld [vmem:[#allocation8 + $0x5b0] sm:$0xf0]  ;;  %v9009_v45 = vor.u32 %v10374_v40, %v9006_v41  ;;  %v4352_v32 = vadd.f32 %v4351_v25, %v4338_v24 }
 0x22f   : > { %v8845_v58 = vor.u32 %v10338_v46, %v8844_v4  ;;  %v8556_v30 = vld [vmem:[#allocation8 + $0x850] sm:$0xf]  ;;  %4542 = vmatpush.bf16.msrb.mxu0 %v8589_v54  ;;  %4568 = vmatpush.bf16.msrb.mxu2 %v7569_v59  ;;  %v10174_v4 = vld [vmem:[#allocation8 + $0x594] sm:$0xf] }
 0x230   : > { %v10266_v60 = vld [vmem:[#allocation8 + $0x86c] sm:$0xf0]  ;;  %v8462_v46 = vld [vmem:[#allocation8 + $0x7b0] sm:$0xf0]  ;;  %v8209_v49 = vor.u32 %v10174_v4, %v8206_v43 }
 0x231   : > { %v8812_v9 = vld [vmem:[#allocation8 + $0xa50] sm:$0xf]  ;;  %v8557_v11 = vor.u32 %v10266_v60, %v8556_v30  ;;  %4555 = vmatpush.bf16.msrb.mxu1 %v8845_v58  ;;  %4581 = vmatpush.bf16.msrb.mxu3 %v7825_v3  ;;  %v8718_v48 = vld [vmem:[#allocation8 + $0x9b0] sm:$0xf0]  ;;  %v8465_v51 = vor.u32 %v10238_v44, %v8462_v46  ;;  %v4364_v46 = vpop.f32.mrf.mxu2 }
 0x232   : > { %v10330_v6 = vld [vmem:[#allocation8 + $0xa6c] sm:$0xf0]  ;;  %v10366_v20 = vld [vmem:[#allocation8 + $0xb94] sm:$0xf]  ;;  %v8721_v54 = vor.u32 %v10302_v47, %v8718_v48 }
 0x233   : > { %v8524_v12 = vld [vmem:[#allocation8 + $0x810] sm:$0xf]  ;;  %v8813_v14 = vor.u32 %v10330_v6, %v8812_v9  ;;  %4543 = vmatpush.bf16.msrb.mxu0 %v8557_v11  ;;  %4569 = vmatpush.bf16.msrb.mxu2 %v7537_v15  ;;  %v8974_v22 = vld [vmem:[#allocation8 + $0xbb0] sm:$0xf0] }
 0x234   : > { %v10258_v13 = vld [vmem:[#allocation8 + $0x82c] sm:$0xf0]  ;;  %v10166_v56 = vld [vmem:[#allocation8 + $0x554] sm:$0xf]  ;;  %v8977_v30 = vor.u32 %v10366_v20, %v8974_v22  ;;  %v4340_v20 = vpop.f32.mrf.mxu0  ;;  %v4365_v22 = vadd.f32 %v4364_v46, %v4352_v32  ;;  %v8212_v46 = vld [vmem:[#allocation8 + $0x598] sm:$0xf] }
 0x235   : > { %v8780_v19 = vld [vmem:[#allocation8 + $0xa10] sm:$0xf]  ;;  %v8525_v33 = vor.u32 %v10258_v13, %v8524_v12  ;;  %4556 = vmatpush.bf16.msrb.mxu1 %v8813_v14  ;;  %4582 = vmatpush.bf16.msrb.mxu3 %v7793_v18  ;;  %v8174_v58 = vld [vmem:[#allocation8 + $0x570] sm:$0xf0]  ;;  %v10243_v20 = vld [vmem:[#allocation8 + $0x7b4] sm:$0xf0] }
 0x236   : > { %v10322_v21 = vld [vmem:[#allocation8 + $0xa2c] sm:$0xf0]  ;;  %v10230_v59 = vld [vmem:[#allocation8 + $0x754] sm:$0xf]  ;;  %v8177_v7 = vor.u32 %v10166_v56, %v8174_v58 }
 0x237   : > { %v8781_v38 = vor.u32 %v10322_v21, %v8780_v19  ;;  %4544 = vmatpush.bf16.msrb.mxu0 %v8525_v33  ;;  %4570 = vmatpush.bf16.msrb.mxu2 %v7505_v39  ;;  %v8430_v60 = vld [vmem:[#allocation8 + $0x770] sm:$0xf0] }
 0x238   : > { %v10294_v9 = vld [vmem:[#allocation8 + $0x954] sm:$0xf]  ;;  %v8433_v8 = vor.u32 %v10230_v59, %v8430_v60 }
 0x239   : > { %4557 = vmatpush.bf16.msrb.mxu1 %v8781_v38  ;;  %4583 = vmatpush.bf16.msrb.mxu3 %v7761_v17  ;;  %v8686_v63 = vld [vmem:[#allocation8 + $0x970] sm:$0xf0] }
 0x23a   : > { %4545 = vmatmul.bf16.vlgmr.msrb.gmra.mxu0 %v11235_v53  ;;  %v10358_v3 = vld [vmem:[#allocation8 + $0xb54] sm:$0xf]  ;;  %4571 = vmatmul.bf16.vlgmr.msrb.gmra.mxu2 %v11218_v62  ;;  %v8689_v61 = vor.u32 %v10294_v9, %v8686_v63 }
 0x23b   : > { %4589 = vmatpush.bf16.msra.mxu0 %v8241_v16  ;;  %4615 = vmatpush.bf16.msra.mxu2 %v8753_v42  ;;  %v8942_v6 = vld [vmem:[#allocation8 + $0xb70] sm:$0xf0] }
 0x23c   : > { %4558 = vmatmul.bf16.vlgmr.msrb.gmra.mxu1 %v11237_v57  ;;  %4584 = vmatmul.bf16.vlgmr.msrb.gmra.mxu3 %v11220_v1  ;;  %v10158_v10 = vld [vmem:[#allocation8 + $0x514] sm:$0xf]  ;;  %v8945_v13 = vor.u32 %v10358_v3, %v8942_v6 }
 0x23d   : > { %4602 = vmatpush.bf16.msra.mxu1 %v8497_v52  ;;  %4628 = vmatpush.bf16.msra.mxu3 %v9009_v45  ;;  %v8142_v11 = vld [vmem:[#allocation8 + $0x530] sm:$0xf0] }
 0x23e   : > { %v10222_v12 = vld [vmem:[#allocation8 + $0x714] sm:$0xf]  ;;  %v8145_v18 = vor.u32 %v10158_v10, %v8142_v11 }
 0x23f   : > { %4590 = vmatpush.bf16.msra.mxu0 %v8209_v49  ;;  %4616 = vmatpush.bf16.msra.mxu2 %v8721_v54  ;;  %v8398_v14 = vld [vmem:[#allocation8 + $0x730] sm:$0xf0]  ;;  %v4377_v49 = vpop.f32.mrf.mxu3  ;;  %v4353_v54 = vpop.f32.mrf.mxu1 }
 0x240   : > { %v10286_v15 = vld [vmem:[#allocation8 + $0x914] sm:$0xf]  ;;  %v8401_v26 = vor.u32 %v10222_v12, %v8398_v14  ;;  %v11298_v9 = vadd.f32 %v4377_v49, %v4365_v22  ;;  %v7668_v54 = vld [vmem:[#allocation8 + $0x158] sm:$0xf] }
 0x241   : > { %4603 = vmatpush.bf16.msra.mxu1 %v8465_v51  ;;  %4629 = vmatpush.bf16.msra.mxu3 %v8977_v30  ;;  %v8654_v19 = vld [vmem:[#allocation8 + $0x930] sm:$0xf0] }
 0x242   : > { %v10350_v21 = vld [vmem:[#allocation8 + $0xb14] sm:$0xf]  ;;  %v8657_v27 = vor.u32 %v10286_v15, %v8654_v19 }
 0x243   : > { %v8910_v23 = vld [vmem:[#allocation8 + $0xb30] sm:$0xf0]  ;;  %4591 = vmatpush.bf16.msra.mxu0 %v8177_v7  ;;  %4617 = vmatpush.bf16.msra.mxu2 %v8689_v61 }
 0x244   : > { %v10150_v28 = vld [vmem:[#allocation8 + $0x4d4] sm:$0xf]  ;;  %v8913_v33 = vor.u32 %v10350_v21, %v8910_v23 }
 0x245   : > { %4604 = vmatpush.bf16.msra.mxu1 %v8433_v8  ;;  %v8110_v29 = vld [vmem:[#allocation8 + $0x4f0] sm:$0xf0]  ;;  %4630 = vmatpush.bf16.msra.mxu3 %v8945_v13 }
 0x246   : > { %v10214_v31 = vld [vmem:[#allocation8 + $0x6d4] sm:$0xf]  ;;  %v8113_v40 = vor.u32 %v10150_v28, %v8110_v29  ;;  %v10059_v28 = vld [vmem:[#allocation8 + $0x1f4] sm:$0xf0] }
 0x247   : > { %v8366_v35 = vld [vmem:[#allocation8 + $0x6f0] sm:$0xf0]  ;;  %4592 = vmatpush.bf16.msra.mxu0 %v8145_v18  ;;  %4618 = vmatpush.bf16.msra.mxu2 %v8657_v27  ;;  %v7732_v27 = vld [vmem:[#allocation8 + $0x1d8] sm:$0xf] }
 0x248   : > { %v10278_v36 = vld [vmem:[#allocation8 + $0x8d4] sm:$0xf]  ;;  %v8369_v41 = vor.u32 %v10214_v31, %v8366_v35  ;;  %v7988_v29 = vld [vmem:[#allocation8 + $0x3d8] sm:$0xf]  ;;  %v4379_v31 = vpop.f32.mrf.mxu3 }
 0x249   : > { %v8622_v37 = vld [vmem:[#allocation8 + $0x8f0] sm:$0xf0]  ;;  %4605 = vmatpush.bf16.msra.mxu1 %v8401_v26  ;;  %4631 = vmatpush.bf16.msra.mxu3 %v8913_v33  ;;  %v4366_v26 = vpop.f32.mrf.mxu2  ;;  %v10123_v33 = vld [vmem:[#allocation8 + $0x3f4] sm:$0xf0] }
 0x24a   : > { %v10342_v38 = vld [vmem:[#allocation8 + $0xad4] sm:$0xf]  ;;  %v8625_v17 = vor.u32 %v10278_v36, %v8622_v37  ;;  %v8244_v35 = vld [vmem:[#allocation8 + $0x5d8] sm:$0xf] }
 0x24b   : > { %v8878_v39 = vld [vmem:[#allocation8 + $0xaf0] sm:$0xf0]  ;;  %4593 = vmatpush.bf16.msra.mxu0 %v8113_v40  ;;  %v10187_v36 = vld [vmem:[#allocation8 + $0x5f4] sm:$0xf0] }
 0x24c   : > { %v10142_v16 = vld [vmem:[#allocation8 + $0x494] sm:$0xf]  ;;  %v8881_v4 = vor.u32 %v10342_v38, %v8878_v39  ;;  %4619 = vmatpush.bf16.msra.mxu2 %v8625_v17  ;;  %v8500_v39 = vld [vmem:[#allocation8 + $0x7d8] sm:$0xf]  ;;  %v7733_v17 = vor.u32 %v10059_v28, %v7732_v27  ;;  %v4403_v27 = vpop.f32.mrf.mxu1 }
 0x24d   : > { %v8078_v52 = vld [vmem:[#allocation8 + $0x4b0] sm:$0xf0]  ;;  %4606 = vmatpush.bf16.msra.mxu1 %v8369_v41  ;;  %v10251_v40 = vld [vmem:[#allocation8 + $0x7f4] sm:$0xf0] }
 0x24e   : > { %v10206_v42 = vld [vmem:[#allocation8 + $0x694] sm:$0xf]  ;;  %v8081_v51 = vor.u32 %v10142_v16, %v8078_v52  ;;  %4632 = vmatpush.bf16.msra.mxu3 %v8881_v4  ;;  %v7989_v16 = vor.u32 %v10123_v33, %v7988_v29  ;;  %v8245_v52 = vor.u32 %v10187_v36, %v8244_v35  ;;  %v10051_v4 = vld [vmem:[#allocation8 + $0x1b4] sm:$0xf0] }
 0x24f   : > { %v8334_v43 = vld [vmem:[#allocation8 + $0x6b0] sm:$0xf0]  ;;  %v7604_v31 = vld [vmem:[#allocation8 + $0xd8] sm:$0xf] }
 0x250   : > { %v10270_v44 = vld [vmem:[#allocation8 + $0x894] sm:$0xf]  ;;  %v8337_v56 = vor.u32 %v10206_v42, %v8334_v43  ;;  %4594 = vmatpush.bf16.msra.mxu0 %v8081_v51  ;;  %v7700_v42 = vld [vmem:[#allocation8 + $0x198] sm:$0xf] }
 0x251   : > { %v8590_v45 = vld [vmem:[#allocation8 + $0x8b0] sm:$0xf0]  ;;  %v7956_v43 = vld [vmem:[#allocation8 + $0x398] sm:$0xf]  ;;  %v7701_v22 = vor.u32 %v10051_v4, %v7700_v42 }
 0x252   : > { %v10334_v47 = vld [vmem:[#allocation8 + $0xa94] sm:$0xf]  ;;  %v8593_v58 = vor.u32 %v10270_v44, %v8590_v45  ;;  %4607 = vmatpush.bf16.msra.mxu1 %v8337_v56  ;;  %v8501_v44 = vor.u32 %v10251_v40, %v8500_v39  ;;  %v10115_v45 = vld [vmem:[#allocation8 + $0x3b4] sm:$0xf0] }
 0x253   : > { %v8846_v48 = vld [vmem:[#allocation8 + $0xab0] sm:$0xf0]  ;;  %v7957_v49 = vor.u32 %v10115_v45, %v7956_v43  ;;  %v10043_v56 = vld [vmem:[#allocation8 + $0x174] sm:$0xf0] }
 0x254   : > { %v10134_v59 = vld [vmem:[#allocation8 + $0x454] sm:$0xf]  ;;  %v8849_v63 = vor.u32 %v10334_v47, %v8846_v48  ;;  %4620 = vmatpush.bf16.msra.mxu2 %v8593_v58  ;;  %v10179_v47 = vld [vmem:[#allocation8 + $0x5b4] sm:$0xf0] }
 0x255   : > { %v8046_v30 = vld [vmem:[#allocation8 + $0x470] sm:$0xf0]  ;;  %v8468_v48 = vld [vmem:[#allocation8 + $0x798] sm:$0xf]  ;;  %v8213_v51 = vor.u32 %v10179_v47, %v8212_v46  ;;  %v4416_v47 = vpop.f32.mrf.mxu2 }
 0x256   : > { %v10198_v60 = vld [vmem:[#allocation8 + $0x654] sm:$0xf]  ;;  %v8049_v10 = vor.u32 %v10134_v59, %v8046_v30  ;;  %4633 = vmatpush.bf16.msra.mxu3 %v8849_v63  ;;  %v7924_v58 = vld [vmem:[#allocation8 + $0x358] sm:$0xf]  ;;  %v8469_v59 = vor.u32 %v10243_v20, %v8468_v48 }
 0x257   : > { %v8302_v3 = vld [vmem:[#allocation8 + $0x670] sm:$0xf0]  ;;  %v10107_v30 = vld [vmem:[#allocation8 + $0x374] sm:$0xf0] }
 0x258   : > { %v10262_v6 = vld [vmem:[#allocation8 + $0x854] sm:$0xf]  ;;  %v8305_v13 = vor.u32 %v10198_v60, %v8302_v3  ;;  %4595 = vmatpush.bf16.msra.mxu0 %v8049_v10  ;;  %v8180_v60 = vld [vmem:[#allocation8 + $0x558] sm:$0xf] }
 0x259   : > { %v8558_v7 = vld [vmem:[#allocation8 + $0x870] sm:$0xf0]  ;;  %v10171_v63 = vld [vmem:[#allocation8 + $0x574] sm:$0xf0] }
 0x25a   : > { %v10326_v8 = vld [vmem:[#allocation8 + $0xa54] sm:$0xf]  ;;  %v8561_v14 = vor.u32 %v10262_v6, %v8558_v7  ;;  %4608 = vmatpush.bf16.msra.mxu1 %v8305_v13  ;;  %v8436_v3 = vld [vmem:[#allocation8 + $0x758] sm:$0xf]  ;;  %v7669_v7 = vor.u32 %v10043_v56, %v7668_v54  ;;  %v4405_v56 = vpop.f32.mrf.mxu1 }
 0x25b   : > { %v8814_v61 = vld [vmem:[#allocation8 + $0xa70] sm:$0xf0]  ;;  %v10235_v6 = vld [vmem:[#allocation8 + $0x774] sm:$0xf0] }
 0x25c   : > { %v10126_v11 = vld [vmem:[#allocation8 + $0x414] sm:$0xf]  ;;  %v8817_v23 = vor.u32 %v10326_v8, %v8814_v61  ;;  %4621 = vmatpush.bf16.msra.mxu2 %v8561_v14  ;;  %v7925_v8 = vor.u32 %v10107_v30, %v7924_v58  ;;  %v8181_v61 = vor.u32 %v10171_v63, %v8180_v60  ;;  %v7636_v10 = vld [vmem:[#allocation8 + $0x118] sm:$0xf]  ;;  %v8437_v13 = vor.u32 %v10235_v6, %v8436_v3 }
 0x25d   : > { %v8014_v12 = vld [vmem:[#allocation8 + $0x430] sm:$0xf0]  ;;  %v10099_v14 = vld [vmem:[#allocation8 + $0x334] sm:$0xf0] }
 0x25e   : > { %v10190_v15 = vld [vmem:[#allocation8 + $0x614] sm:$0xf]  ;;  %v8017_v32 = vor.u32 %v10126_v11, %v8014_v12  ;;  %4634 = vmatpush.bf16.msra.mxu3 %v8817_v23  ;;  %v10035_v11 = vld [vmem:[#allocation8 + $0x134] sm:$0xf0] }
 0x25f   : > { %v8270_v19 = vld [vmem:[#allocation8 + $0x630] sm:$0xf0]  ;;  %v7892_v12 = vld [vmem:[#allocation8 + $0x318] sm:$0xf]  ;;  %v7637_v26 = vor.u32 %v10035_v11, %v7636_v10 }
 0x260   : > { %v10254_v21 = vld [vmem:[#allocation8 + $0x814] sm:$0xf]  ;;  %v8273_v37 = vor.u32 %v10190_v15, %v8270_v19  ;;  %4596 = vmatpush.bf16.msra.mxu0 %v8017_v32  ;;  %v8148_v15 = vld [vmem:[#allocation8 + $0x518] sm:$0xf]  ;;  %v7893_v28 = vor.u32 %v10099_v14, %v7892_v12 }
 0x261   : > { %v8526_v24 = vld [vmem:[#allocation8 + $0x830] sm:$0xf0]  ;;  %v10163_v19 = vld [vmem:[#allocation8 + $0x534] sm:$0xf0] }
 0x262   : > { %v10318_v18 = vld [vmem:[#allocation8 + $0xa14] sm:$0xf]  ;;  %v8529_v38 = vor.u32 %v10254_v21, %v8526_v24  ;;  %4609 = vmatpush.bf16.msra.mxu1 %v8273_v37  ;;  %v4390_v21 = vpop.f32.mrf.mxu0  ;;  %v8404_v23 = vld [vmem:[#allocation8 + $0x718] sm:$0xf]  ;;  %v8149_v29 = vor.u32 %v10163_v19, %v8148_v15 }
 0x263   : > { %v8782_v25 = vld [vmem:[#allocation8 + $0xa30] sm:$0xf0]  ;;  %4597 = vmatmul.bf16.vlgmr.msra.gmra.mxu0 %v11222_v2  ;;  %v10227_v24 = vld [vmem:[#allocation8 + $0x734] sm:$0xf0] }
 0x264   : > { %v8785_v41 = vor.u32 %v10318_v18, %v8782_v25  ;;  %4622 = vmatpush.bf16.msra.mxu2 %v8529_v38  ;;  %4641 = vmatpush.bf16.msrb.mxu0 %v7733_v17  ;;  %v4828_v18 = vperm.slane %v11250_v34, 0  ;;  %v4391_v25 = vadd.f32 %v4390_v21, %v11298_v9  ;;  %v10027_v32 = vld [vmem:[#allocation8 + $0xf4] sm:$0xf0]  ;;  %v8405_v35 = vor.u32 %v10227_v24, %v8404_v23 }
 0x265   : > { %4610 = vmatmul.bf16.vlgmr.msra.gmra.mxu1 %v11224_v5  ;;  %v7860_v33 = vld [vmem:[#allocation8 + $0x2d8] sm:$0xf]  ;;  %v7605_v9 = vor.u32 %v10027_v32, %v7604_v31 }
 0x266   : > { %4635 = vmatpush.bf16.msra.mxu3 %v8785_v41  ;;  %4654 = vmatpush.bf16.msrb.mxu1 %v7989_v16  ;;  %v4404_v36 = vadd.f32 %v4403_v27, %v4391_v25  ;;  %v10091_v37 = vld [vmem:[#allocation8 + $0x2f4] sm:$0xf0]  ;;  %v4418_v27 = vpop.f32.mrf.mxu2 }
 0x267   : > { %4623 = vmatmul.bf16.vlgmr.msra.gmra.mxu2 %v11235_v53  ;;  %v8116_v38 = vld [vmem:[#allocation8 + $0x4d8] sm:$0xf]  ;;  %v7861_v17 = vor.u32 %v10091_v37, %v7860_v33  ;;  %v7734_v37 = vld [vmem:[#allocation8 + $0x1f8] sm:$0xf0] }
 0x268   : > { %4667 = vmatpush.bf16.msrb.mxu2 %v8245_v52  ;;  %4642 = vmatpush.bf16.msrb.mxu0 %v7701_v22  ;;  %v10155_v39 = vld [vmem:[#allocation8 + $0x4f4] sm:$0xf0]  ;;  %v11306_v41 = vmul.f32 %v4828_v18, %v4404_v36  ;;  %v4429_v22 = vpop.f32.mrf.mxu3  ;;  %v10055_v36 = vld [vmem:[#allocation8 + $0x1dc] sm:$0xf] }
 0x269   : > { %4636 = vmatmul.bf16.vlgmr.msra.gmra.mxu3 %v11237_v57  ;;  %v8372_v40 = vld [vmem:[#allocation8 + $0x6d8] sm:$0xf]  ;;  %v8117_v16 = vor.u32 %v10155_v39, %v8116_v38  ;;  %v11308_v54 = vadd.f32 %v4429_v22, %v4416_v47  ;;  %v7702_v47 = vld [vmem:[#allocation8 + $0x1b8] sm:$0xf0] }
 0x26a   : > { %4680 = vmatpush.bf16.msrb.mxu3 %v8501_v44  ;;  %4655 = vmatpush.bf16.msrb.mxu1 %v7957_v49  ;;  %v10219_v34 = vld [vmem:[#allocation8 + $0x6f4] sm:$0xf0]  ;;  %v4392_v49 = vpop.f32.mrf.mxu0 }
 0x26b   : > { %v7572_v52 = vld [vmem:[#allocation8 + $0x98] sm:$0xf]  ;;  %v8373_v43 = vor.u32 %v10219_v34, %v8372_v40  ;;  %v10119_v40 = vld [vmem:[#allocation8 + $0x3dc] sm:$0xf] }
 0x26c   : > { %4668 = vmatpush.bf16.msrb.mxu2 %v8213_v51  ;;  %4643 = vmatpush.bf16.msrb.mxu0 %v7669_v7  ;;  %v10019_v42 = vld [vmem:[#allocation8 + $0xb4] sm:$0xf0]  ;;  %v7990_v34 = vld [vmem:[#allocation8 + $0x3f8] sm:$0xf0] }
 0x26d   : > { %v7828_v4 = vld [vmem:[#allocation8 + $0x298] sm:$0xf]  ;;  %v7573_v51 = vor.u32 %v10019_v42, %v7572_v52  ;;  %v7737_v52 = vor.u32 %v10055_v36, %v7734_v37  ;;  %v10023_v37 = vld [vmem:[#allocation8 + $0xdc] sm:$0xf] }
 0x26e   : > { %4681 = vmatpush.bf16.msrb.mxu3 %v8469_v59  ;;  %4656 = vmatpush.bf16.msrb.mxu1 %v7925_v8  ;;  %v10083_v44 = vld [vmem:[#allocation8 + $0x2b4] sm:$0xf0] }
 0x26f   : > { %v8084_v45 = vld [vmem:[#allocation8 + $0x498] sm:$0xf]  ;;  %v7829_v58 = vor.u32 %v10083_v44, %v7828_v4  ;;  %v7993_v44 = vor.u32 %v10119_v40, %v7990_v34  ;;  %v10087_v40 = vld [vmem:[#allocation8 + $0x2dc] sm:$0xf] }
 0x270   : > { %4669 = vmatpush.bf16.msrb.mxu2 %v8181_v61  ;;  %4644 = vmatpush.bf16.msrb.mxu0 %v7637_v26  ;;  %v10147_v46 = vld [vmem:[#allocation8 + $0x4b4] sm:$0xf0]  ;;  %v4431_v32 = vpop.f32.mrf.mxu3  ;;  %v7862_v34 = vld [vmem:[#allocation8 + $0x2f8] sm:$0xf0] }
 0x271   : > { %v8340_v48 = vld [vmem:[#allocation8 + $0x698] sm:$0xf]  ;;  %v8085_v59 = vor.u32 %v10147_v46, %v8084_v45  ;;  %v10047_v46 = vld [vmem:[#allocation8 + $0x19c] sm:$0xf] }
 0x272   : > { %4682 = vmatpush.bf16.msrb.mxu3 %v8437_v13  ;;  %4657 = vmatpush.bf16.msrb.mxu1 %v7893_v28  ;;  %v10211_v20 = vld [vmem:[#allocation8 + $0x6b4] sm:$0xf0] }
 0x273   : > { %v7540_v30 = vld [vmem:[#allocation8 + $0x58] sm:$0xf]  ;;  %v8341_v3 = vor.u32 %v10211_v20, %v8340_v48  ;;  %v10111_v48 = vld [vmem:[#allocation8 + $0x39c] sm:$0xf] }
 0x274   : > { %4670 = vmatpush.bf16.msrb.mxu2 %v8149_v29  ;;  %4645 = vmatpush.bf16.msrb.mxu0 %v7605_v9  ;;  %v10011_v60 = vld [vmem:[#allocation8 + $0x74] sm:$0xf0]  ;;  %v7958_v20 = vld [vmem:[#allocation8 + $0x3b8] sm:$0xf0] }
 0x275   : > { %v7796_v63 = vld [vmem:[#allocation8 + $0x258] sm:$0xf]  ;;  %v7541_v11 = vor.u32 %v10011_v60, %v7540_v30  ;;  %v7961_v30 = vor.u32 %v10111_v48, %v7958_v20  ;;  %v7574_v48 = vld [vmem:[#allocation8 + $0xb8] sm:$0xf0] }
 0x276   : > { %4683 = vmatpush.bf16.msrb.mxu3 %v8405_v35  ;;  %4658 = vmatpush.bf16.msrb.mxu1 %v7861_v17  ;;  %v10075_v6 = vld [vmem:[#allocation8 + $0x274] sm:$0xf0]  ;;  %v10079_v20 = vld [vmem:[#allocation8 + $0x29c] sm:$0xf] }
 0x277   : > { %v8052_v7 = vld [vmem:[#allocation8 + $0x458] sm:$0xf]  ;;  %v7797_v14 = vor.u32 %v10075_v6, %v7796_v63  ;;  %v10039_v63 = vld [vmem:[#allocation8 + $0x15c] sm:$0xf] }
 0x278   : > { %4671 = vmatpush.bf16.msrb.mxu2 %v8117_v16  ;;  %v10139_v8 = vld [vmem:[#allocation8 + $0x474] sm:$0xf0]  ;;  %4646 = vmatpush.bf16.msrb.mxu0 %v7573_v51  ;;  %v7705_v51 = vor.u32 %v10047_v46, %v7702_v47  ;;  %v10103_v6 = vld [vmem:[#allocation8 + $0x35c] sm:$0xf] }
 0x279   : > { %v8308_v61 = vld [vmem:[#allocation8 + $0x658] sm:$0xf]  ;;  %v8053_v15 = vor.u32 %v10139_v8, %v8052_v7  ;;  %v7926_v7 = vld [vmem:[#allocation8 + $0x378] sm:$0xf0] }
 0x27a   : > { %4684 = vmatpush.bf16.msrb.mxu3 %v8373_v43  ;;  %v10203_v10 = vld [vmem:[#allocation8 + $0x674] sm:$0xf0]  ;;  %4659 = vmatpush.bf16.msrb.mxu1 %v7829_v58  ;;  %v10015_v47 = vld [vmem:[#allocation8 + $0x9c] sm:$0xf] }
 0x27b   : > { %v7508_v12 = vld [vmem:[#allocation8 + $0x18] sm:$0xf]  ;;  %v8309_v24 = vor.u32 %v10203_v10, %v8308_v61 }
 0x27c   : > { %v10003_v13 = vld [vmem:[#allocation8 + $0x34] sm:$0xf0]  ;;  %4672 = vmatpush.bf16.msrb.mxu2 %v8085_v59  ;;  %4647 = vmatpush.bf16.msrb.mxu0 %v7541_v11 }
 0x27d   : > { %v7764_v19 = vld [vmem:[#allocation8 + $0x218] sm:$0xf]  ;;  %v7509_v33 = vor.u32 %v10003_v13, %v7508_v12 }
 0x27e   : > { %v10067_v21 = vld [vmem:[#allocation8 + $0x234] sm:$0xf0]  ;;  %4685 = vmatpush.bf16.msrb.mxu3 %v8341_v3  ;;  %4660 = vmatpush.bf16.msrb.mxu1 %v7797_v14  ;;  %v7670_v3 = vld [vmem:[#allocation8 + $0x178] sm:$0xf0]  ;;  %v7929_v14 = vor.u32 %v10103_v6, %v7926_v7 }
 0x27f   : > { %v8020_v23 = vld [vmem:[#allocation8 + $0x418] sm:$0xf]  ;;  %v7765_v38 = vor.u32 %v10067_v21, %v7764_v19  ;;  %v7673_v10 = vor.u32 %v10039_v63, %v7670_v3  ;;  %v10031_v19 = vld [vmem:[#allocation8 + $0x11c] sm:$0xf] }
 0x280   : > { %v10131_v18 = vld [vmem:[#allocation8 + $0x434] sm:$0xf0]  ;;  %4673 = vmatpush.bf16.msrb.mxu2 %v8053_v15  ;;  %4648 = vmatpush.bf16.msrb.mxu0 %v7509_v33  ;;  %v7638_v21 = vld [vmem:[#allocation8 + $0x138] sm:$0xf0] }
 0x281   : > { %v8276_v25 = vld [vmem:[#allocation8 + $0x618] sm:$0xf]  ;;  %v8021_v39 = vor.u32 %v10131_v18, %v8020_v23  ;;  %v10095_v23 = vld [vmem:[#allocation8 + $0x31c] sm:$0xf]  ;;  %v7641_v27 = vor.u32 %v10031_v19, %v7638_v21 }
 0x282   : > { %v10195_v26 = vld [vmem:[#allocation8 + $0x634] sm:$0xf0]  ;;  %4686 = vmatpush.bf16.msrb.mxu3 %v8309_v24  ;;  %4661 = vmatpush.bf16.msrb.mxu1 %v7765_v38  ;;  %v7894_v24 = vld [vmem:[#allocation8 + $0x338] sm:$0xf0] }
 0x283   : > { %v8756_v28 = vld [vmem:[#allocation8 + $0x9d8] sm:$0xf]  ;;  %v8277_v9 = vor.u32 %v10195_v26, %v8276_v25  ;;  %4649 = vmatmul.bf16.vlgmr.msrb.gmra.mxu0 %v11218_v62  ;;  %v4442_v25 = vpop.f32.mrf.mxu0  ;;  %v7606_v38 = vld [vmem:[#allocation8 + $0xf8] sm:$0xf0] }
 0x284   : > { %v10315_v29 = vld [vmem:[#allocation8 + $0x9f4] sm:$0xf0]  ;;  %4674 = vmatpush.bf16.msrb.mxu2 %v8021_v39 }
 0x285   : > { %v9012_v31 = vld [vmem:[#allocation8 + $0xbd8] sm:$0xf]  ;;  %v8757_v17 = vor.u32 %v10315_v29, %v8756_v28  ;;  %4662 = vmatmul.bf16.vlgmr.msrb.gmra.mxu1 %v11220_v1  ;;  %v4443_v28 = vadd.f32 %v4442_v25, %v11308_v54  ;;  %v4455_v29 = vpop.f32.mrf.mxu1 }
 0x286   : > { %v10379_v35 = vld [vmem:[#allocation8 + $0xbf4] sm:$0xf0]  ;;  %4687 = vmatpush.bf16.msrb.mxu3 %v8277_v9 }
 0x287   : > { %v9013_v16 = vor.u32 %v10379_v35, %v9012_v31  ;;  %v8724_v42 = vld [vmem:[#allocation8 + $0x998] sm:$0xf]  ;;  %4693 = vmatpush.bf16.msra.mxu0 %v8757_v17  ;;  %4675 = vmatmul.bf16.vlgmr.msrb.gmra.mxu2 %v11222_v2  ;;  %v7897_v35 = vor.u32 %v10095_v23, %v7894_v24  ;;  %v4456_v39 = vadd.f32 %v4455_v29, %v4443_v28  ;;  %v10063_v28 = vld [vmem:[#allocation8 + $0x21c] sm:$0xf] }
 0x288   : > { %v10307_v4 = vld [vmem:[#allocation8 + $0x9b4] sm:$0xf0]  ;;  %4719 = vmatpush.bf16.msra.mxu2 %v7737_v52  ;;  %v4468_v52 = vpop.f32.mrf.mxu2  ;;  %v7766_v29 = vld [vmem:[#allocation8 + $0x238] sm:$0xf0] }
 0x289   : > { %v8980_v43 = vld [vmem:[#allocation8 + $0xb98] sm:$0xf]  ;;  %v8725_v22 = vor.u32 %v10307_v4, %v8724_v42  ;;  %4706 = vmatpush.bf16.msra.mxu1 %v9013_v16  ;;  %4688 = vmatmul.bf16.vlgmr.msrb.gmra.mxu3 %v11224_v5  ;;  %v7609_v16 = vor.u32 %v10023_v37, %v7606_v38  ;;  %v8502_v37 = vld [vmem:[#allocation8 + $0x7f8] sm:$0xf0] }
 0x28a   : > { %v10371_v45 = vld [vmem:[#allocation8 + $0xbb4] sm:$0xf0]  ;;  %4732 = vmatpush.bf16.msra.mxu3 %v7993_v44  ;;  %v4469_v44 = vadd.f32 %v4468_v52, %v4456_v39  ;;  %v10311_v38 = vld [vmem:[#allocation8 + $0x9dc] sm:$0xf] }
 0x28b   : > { %v8981_v49 = vor.u32 %v10371_v45, %v8980_v43  ;;  %v8692_v56 = vld [vmem:[#allocation8 + $0x958] sm:$0xf]  ;;  %4694 = vmatpush.bf16.msra.mxu0 %v8725_v22  ;;  %v7865_v43 = vor.u32 %v10087_v40, %v7862_v34  ;;  %v4481_v45 = vpop.f32.mrf.mxu3  ;;  %v7830_v22 = vld [vmem:[#allocation8 + $0x2b8] sm:$0xf0] }
 0x28c   : > { %v10299_v58 = vld [vmem:[#allocation8 + $0x974] sm:$0xf0]  ;;  %4720 = vmatpush.bf16.msra.mxu2 %v7705_v51  ;;  %v4482_v51 = vadd.f32 %v4481_v45, %v4469_v44  ;;  %v8758_v39 = vld [vmem:[#allocation8 + $0x9f8] sm:$0xf0] }
 0x28d   : > { %v8948_v59 = vld [vmem:[#allocation8 + $0xb58] sm:$0xf]  ;;  %v8693_v8 = vor.u32 %v10299_v58, %v8692_v56  ;;  %4707 = vmatpush.bf16.msra.mxu1 %v8981_v49  ;;  %v4829_v49 = vperm.slane %v11259_v50, 0  ;;  %v4444_v58 = vpop.f32.mrf.mxu0  ;;  %v4457_v6 = vpop.f32.mrf.mxu1  ;;  %v10071_v50 = vld [vmem:[#allocation8 + $0x25c] sm:$0xf] }
 0x28e   : > { %v10363_v60 = vld [vmem:[#allocation8 + $0xb74] sm:$0xf0]  ;;  %4733 = vmatpush.bf16.msra.mxu3 %v7961_v30  ;;  %v7577_v30 = vor.u32 %v10015_v47, %v7574_v48  ;;  %v10239_v44 = vld [vmem:[#allocation8 + $0x79c] sm:$0xf] }
 0x28f   : > { %v8949_v61 = vor.u32 %v10363_v60, %v8948_v59  ;;  %v8660_v11 = vld [vmem:[#allocation8 + $0x918] sm:$0xf]  ;;  %4695 = vmatpush.bf16.msra.mxu0 %v8693_v8  ;;  %v11316_v7 = vmul.f32 %v4829_v49, %v4482_v51  ;;  %v7833_v8 = vor.u32 %v10079_v20, %v7830_v22  ;;  %v10303_v47 = vld [vmem:[#allocation8 + $0x99c] sm:$0xf] }
 0x290   : > { %v10291_v12 = vld [vmem:[#allocation8 + $0x934] sm:$0xf0]  ;;  %4721 = vmatpush.bf16.msra.mxu2 %v7673_v10  ;;  %v10007_v10 = vld [vmem:[#allocation8 + $0x5c] sm:$0xf]  ;;  %v4470_v25 = vpop.f32.mrf.mxu2 }
 0x291   : > { %v8916_v13 = vld [vmem:[#allocation8 + $0xb18] sm:$0xf]  ;;  %v8661_v18 = vor.u32 %v10291_v12, %v8660_v11  ;;  %4708 = vmatpush.bf16.msra.mxu1 %v8949_v61  ;;  %v7542_v11 = vld [vmem:[#allocation8 + $0x78] sm:$0xf0]  ;;  %v4797_v25 = vlaneseq }
 0x292   : > { %v10355_v15 = vld [vmem:[#allocation8 + $0xb34] sm:$0xf0]  ;;  %4734 = vmatpush.bf16.msra.mxu3 %v7929_v14  ;;  %v7798_v12 = vld [vmem:[#allocation8 + $0x278] sm:$0xf0]  ;;  %v7545_v21 = vor.u32 %v10007_v10, %v7542_v11 }
 0x293   : > { %v8917_v26 = vor.u32 %v10355_v15, %v8916_v13  ;;  %v8628_v31 = vld [vmem:[#allocation8 + $0x8d8] sm:$0xf]  ;;  %4696 = vmatpush.bf16.msra.mxu0 %v8661_v18  ;;  %v9999_v18 = vld [vmem:[#allocation8 + $0x1c] sm:$0xf] }
 0x294   : > { %v10283_v32 = vld [vmem:[#allocation8 + $0x8f4] sm:$0xf0]  ;;  %4722 = vmatpush.bf16.msra.mxu2 %v7641_v27  ;;  %v7510_v27 = vld [vmem:[#allocation8 + $0x38] sm:$0xf0] }
 0x295   : > { %v8884_v33 = vld [vmem:[#allocation8 + $0xad8] sm:$0xf]  ;;  %v8629_v9 = vor.u32 %v10283_v32, %v8628_v31  ;;  %4709 = vmatpush.bf16.msra.mxu1 %v8917_v26  ;;  %v7801_v26 = vor.u32 %v10071_v50, %v7798_v12  ;;  %v4483_v31 = vpop.f32.mrf.mxu3  ;;  %v10183_v32 = vld [vmem:[#allocation8 + $0x5dc] sm:$0xf]  ;;  %v7513_v34 = vor.u32 %v9999_v18, %v7510_v27  ;;  %v4494_v18 = vpop.f32.mrf.mxu0 }
 0x296   : > { %v10347_v36 = vld [vmem:[#allocation8 + $0xaf4] sm:$0xf0]  ;;  %4735 = vmatpush.bf16.msra.mxu3 %v7897_v35  ;;  %v10247_v35 = vld [vmem:[#allocation8 + $0x7dc] sm:$0xf] }
 0x297   : > { %v8885_v17 = vor.u32 %v10347_v36, %v8884_v33  ;;  %v8596_v54 = vld [vmem:[#allocation8 + $0x898] sm:$0xf]  ;;  %4697 = vmatpush.bf16.msra.mxu0 %v8629_v9  ;;  %v8246_v33 = vld [vmem:[#allocation8 + $0x5f8] sm:$0xf0] }
 0x298   : > { %v10275_v42 = vld [vmem:[#allocation8 + $0x8b4] sm:$0xf0]  ;;  %4723 = vmatpush.bf16.msra.mxu2 %v7609_v16  ;;  %v10375_v9 = vld [vmem:[#allocation8 + $0xbdc] sm:$0xf]  ;;  %v7769_v16 = vor.u32 %v10063_v28, %v7766_v29  ;;  %v8249_v52 = vor.u32 %v10183_v32, %v8246_v33  ;;  %v4507_v32 = vpop.f32.mrf.mxu1 }
 0x299   : > { %v8852_v4 = vld [vmem:[#allocation8 + $0xa98] sm:$0xf]  ;;  %v8597_v56 = vor.u32 %v10275_v42, %v8596_v54  ;;  %4710 = vmatpush.bf16.msra.mxu1 %v8885_v17  ;;  %v9014_v17 = vld [vmem:[#allocation8 + $0xbf8] sm:$0xf0]  ;;  %v8505_v54 = vor.u32 %v10247_v35, %v8502_v37  ;;  %v8761_v42 = vor.u32 %v10311_v38, %v8758_v39  ;;  %v4508_v38 = vadd.f32 %v4507_v32, %v4494_v18 }
 0x29a   : > { %v10339_v46 = vld [vmem:[#allocation8 + $0xab4] sm:$0xf0]  ;;  %4736 = vmatpush.bf16.msra.mxu3 %v7865_v43  ;;  %v8214_v43 = vld [vmem:[#allocation8 + $0x5b8] sm:$0xf0]  ;;  %v9017_v45 = vor.u32 %v10375_v9, %v9014_v17  ;;  %v4798_v9 = vshrl.u32 %v4797_v25, 7 }
 0x29b   : > { %v8853_v59 = vor.u32 %v10339_v46, %v8852_v4  ;;  %v8564_v60 = vld [vmem:[#allocation8 + $0x858] sm:$0xf]  ;;  %4698 = vmatpush.bf16.msra.mxu0 %v8597_v56  ;;  %v10175_v4 = vld [vmem:[#allocation8 + $0x59c] sm:$0xf] }
 0x29c   : > { %v10267_v63 = vld [vmem:[#allocation8 + $0x874] sm:$0xf0]  ;;  %4724 = vmatpush.bf16.msra.mxu2 %v7577_v30  ;;  %v8470_v46 = vld [vmem:[#allocation8 + $0x7b8] sm:$0xf0]  ;;  %v8217_v49 = vor.u32 %v10175_v4, %v8214_v43 }
 0x29d   : > { %v8820_v3 = vld [vmem:[#allocation8 + $0xa58] sm:$0xf]  ;;  %v8565_v13 = vor.u32 %v10267_v63, %v8564_v60  ;;  %4711 = vmatpush.bf16.msra.mxu1 %v8853_v59  ;;  %v8726_v48 = vld [vmem:[#allocation8 + $0x9b8] sm:$0xf0]  ;;  %v8473_v51 = vor.u32 %v10239_v44, %v8470_v46  ;;  %v4520_v4 = vpop.f32.mrf.mxu2 }
 0x29e   : > { %v10331_v61 = vld [vmem:[#allocation8 + $0xa74] sm:$0xf0]  ;;  %4737 = vmatpush.bf16.msra.mxu3 %v7833_v8  ;;  %v10367_v20 = vld [vmem:[#allocation8 + $0xb9c] sm:$0xf]  ;;  %v8729_v56 = vor.u32 %v10303_v47, %v8726_v48  ;;  %v4521_v47 = vadd.f32 %v4520_v4, %v4508_v38 }
 0x29f   : > { %v8532_v14 = vld [vmem:[#allocation8 + $0x818] sm:$0xf]  ;;  %v8821_v19 = vor.u32 %v10331_v61, %v8820_v3  ;;  %4699 = vmatpush.bf16.msra.mxu0 %v8565_v13  ;;  %v8982_v22 = vld [vmem:[#allocation8 + $0xbb8] sm:$0xf0]  ;;  %v4533_v48 = vpop.f32.mrf.mxu3 }
 0x2a0   : > { %v10259_v15 = vld [vmem:[#allocation8 + $0x834] sm:$0xf0]  ;;  %4725 = vmatpush.bf16.msra.mxu2 %v7545_v21  ;;  %v10167_v58 = vld [vmem:[#allocation8 + $0x55c] sm:$0xf]  ;;  %v8985_v60 = vor.u32 %v10367_v20, %v8982_v22 }
 0x2a1   : > { %v8788_v23 = vld [vmem:[#allocation8 + $0xa18] sm:$0xf]  ;;  %v8533_v36 = vor.u32 %v10259_v15, %v8532_v14  ;;  %4712 = vmatpush.bf16.msra.mxu1 %v8821_v19  ;;  %v8182_v59 = vld [vmem:[#allocation8 + $0x578] sm:$0xf0] }
 0x2a2   : > { %v10323_v24 = vld [vmem:[#allocation8 + $0xa34] sm:$0xf0]  ;;  %4738 = vmatpush.bf16.msra.mxu3 %v7801_v26  ;;  %v10231_v30 = vld [vmem:[#allocation8 + $0x75c] sm:$0xf]  ;;  %v8185_v10 = vor.u32 %v10167_v58, %v8182_v59  ;;  %v4496_v58 = vpop.f32.mrf.mxu0  ;;  %v11325_v59 = vmul.u32 64, %v4798_v9 }
 0x2a3   : > { %v8789_v40 = vor.u32 %v10323_v24, %v8788_v23  ;;  %4700 = vmatpush.bf16.msra.mxu0 %v8533_v36  ;;  %v8438_v63 = vld [vmem:[#allocation8 + $0x778] sm:$0xf0] }
 0x2a4   : > { %4726 = vmatpush.bf16.msra.mxu2 %v7513_v34  ;;  %v10295_v3 = vld [vmem:[#allocation8 + $0x95c] sm:$0xf]  ;;  %v8441_v11 = vor.u32 %v10231_v30, %v8438_v63 }
 0x2a5   : > { %4713 = vmatpush.bf16.msra.mxu1 %v8789_v40  ;;  %v8694_v6 = vld [vmem:[#allocation8 + $0x978] sm:$0xf0]  ;;  %v4522_v18 = vpop.f32.mrf.mxu2 }
 0x2a6   : > { %4739 = vmatpush.bf16.msra.mxu3 %v7769_v16  ;;  %v10359_v8 = vld [vmem:[#allocation8 + $0xb5c] sm:$0xf]  ;;  %4701 = vmatmul.bf16.vlgmr.msra.gmra.mxu0 %v11235_v53  ;;  %v8697_v50 = vor.u32 %v10295_v3, %v8694_v6  ;;  %v4509_v6 = vpop.f32.mrf.mxu1 }
 0x2a7   : > { %4745 = vmatpush.bf16.msrb.mxu0 %v8249_v52  ;;  %4727 = vmatmul.bf16.vlgmr.msra.gmra.mxu2 %v11218_v62  ;;  %v8950_v61 = vld [vmem:[#allocation8 + $0xb78] sm:$0xf0] }
 0x2a8   : > { %4771 = vmatpush.bf16.msrb.mxu2 %v8761_v42  ;;  %4714 = vmatmul.bf16.vlgmr.msra.gmra.mxu1 %v11237_v57  ;;  %v10159_v12 = vld [vmem:[#allocation8 + $0x51c] sm:$0xf]  ;;  %v8953_v14 = vor.u32 %v10359_v8, %v8950_v61  ;;  %v4801_v8 = vand.u32 127, %v4797_v25 }
 0x2a9   : > { %4758 = vmatpush.bf16.msrb.mxu1 %v8505_v54  ;;  %4740 = vmatmul.bf16.vlgmr.msra.gmra.mxu3 %v11220_v1  ;;  %v8150_v13 = vld [vmem:[#allocation8 + $0x538] sm:$0xf0] }
 0x2aa   : > { %4784 = vmatpush.bf16.msrb.mxu3 %v9017_v45  ;;  %v10223_v62 = vld [vmem:[#allocation8 + $0x71c] sm:$0xf]  ;;  %v8153_v1 = vor.u32 %v10159_v12, %v8150_v13  ;;  %vm4805_vm0 = vcmp.ge.s32.totalorder %v4801_v8, %v11325_v59  ;;  %v4804_v38 = vadd.s32 384, %v4801_v8 }
 0x2ab   : > { %4746 = vmatpush.bf16.msrb.mxu0 %v8217_v49  ;;  %v8406_v15 = vld [vmem:[#allocation8 + $0x738] sm:$0xf0] }
 0x2ac   : > { %4772 = vmatpush.bf16.msrb.mxu2 %v8729_v56  ;;  %v10287_v19 = vld [vmem:[#allocation8 + $0x91c] sm:$0xf]  ;;  %v8409_v26 = vor.u32 %v10223_v62, %v8406_v15  ;;  %v11323_v56 = vadd.f32 %v4533_v48, %v4521_v47  ;;  %vm4808_vm8 = vcmp.ge.s32.totalorder %v4804_v38, %v11325_v59 }
 0x2ad   : > { %4759 = vmatpush.bf16.msrb.mxu1 %v8473_v51  ;;  %v8662_v21 = vld [vmem:[#allocation8 + $0x938] sm:$0xf0] }
 0x2ae   : > { %4785 = vmatpush.bf16.msrb.mxu3 %v8985_v60  ;;  %v10351_v23 = vld [vmem:[#allocation8 + $0xb1c] sm:$0xf]  ;;  %v8665_v27 = vor.u32 %v10287_v19, %v8662_v21  ;;  %v4809_v19 = vadd.s32 64, %v11325_v59 }
 0x2af   : > { %v8918_v24 = vld [vmem:[#allocation8 + $0xb38] sm:$0xf0]  ;;  %4747 = vmatpush.bf16.msrb.mxu0 %v8185_v10 }
 0x2b0   : > { %4773 = vmatpush.bf16.msrb.mxu2 %v8697_v50  ;;  %v10151_v28 = vld [vmem:[#allocation8 + $0x4dc] sm:$0xf]  ;;  %v8921_v33 = vor.u32 %v10351_v23, %v8918_v24  ;;  %vm4810_vm1 = vcmp.lt.s32.totalorder %v4801_v8, %v4809_v19  ;;  %vm4813_vm9 = vcmp.lt.s32.totalorder %v4804_v38, %v4809_v19 }
 0x2b1   : > { %4760 = vmatpush.bf16.msrb.mxu1 %v8441_v11  ;;  %v8118_v29 = vld [vmem:[#allocation8 + $0x4f8] sm:$0xf0]  ;;  %vm11331_vm4 = vmand %vm4805_vm0, %vm4810_vm1  ;;  %vm6544_vm0 = vcmask 1044483   ;;  %vm6546_vm1 = vcmask 1042432  }
 0x2b2   : > { %v10215_v31 = vld [vmem:[#allocation8 + $0x6dc] sm:$0xf]  ;;  %4786 = vmatpush.bf16.msrb.mxu3 %v8953_v14  ;;  %v8121_v34 = vor.u32 %v10151_v28, %v8118_v29  ;;  %vm4817_vm11 = vmand %vm4808_vm8, %vm4813_vm9 }
 0x2b3   : > { %v8374_v35 = vld [vmem:[#allocation8 + $0x6f8] sm:$0xf0]  ;;  %4748 = vmatpush.bf16.msrb.mxu0 %v8153_v1 }
 0x2b4   : > { %v10279_v36 = vld [vmem:[#allocation8 + $0x8dc] sm:$0xf]  ;;  %4774 = vmatpush.bf16.msrb.mxu2 %v8665_v27  ;;  %v8377_v17 = vor.u32 %v10215_v31, %v8374_v35  ;;  %v4535_v31 = vpop.f32.mrf.mxu3 }
 0x2b5   : > { %v8630_v37 = vld [vmem:[#allocation8 + $0x8f8] sm:$0xf0]  ;;  %4761 = vmatpush.bf16.msrb.mxu1 %v8409_v26  ;;  %v4802_v26 = vadd.s32 128, %v4801_v8 }
 0x2b6   : > { %v10343_v39 = vld [vmem:[#allocation8 + $0xadc] sm:$0xf]  ;;  %v8633_v16 = vor.u32 %v10279_v36, %v8630_v37  ;;  %4787 = vmatpush.bf16.msrb.mxu3 %v8921_v33  ;;  %v4803_v36 = vadd.s32 256, %v4801_v8 }
 0x2b7   : > { %v8886_v40 = vld [vmem:[#allocation8 + $0xaf8] sm:$0xf0]  ;;  %4749 = vmatpush.bf16.msrb.mxu0 %v8121_v34  ;;  %vm4806_vm2 = vcmp.ge.s32.totalorder %v4802_v26, %v11325_v59  ;;  %vm4811_vm3 = vcmp.lt.s32.totalorder %v4802_v26, %v4809_v19 }
 0x2b8   : > { %v10143_v52 = vld [vmem:[#allocation8 + $0x49c] sm:$0xf]  ;;  %v8889_v43 = vor.u32 %v10343_v39, %v8886_v40  ;;  %4775 = vmatpush.bf16.msrb.mxu2 %v8633_v16  ;;  %vm4807_vm5 = vcmp.ge.s32.totalorder %v4803_v36, %v11325_v59  ;;  %vm4812_vm6 = vcmp.lt.s32.totalorder %v4803_v36, %v4809_v19  ;;  %vm11336_vm7 = vmand %vm4806_vm2, %vm4811_vm3  ;;  %vm6551_vm2 = vcmp.lt.s32.totalorder %v4797_v25, 768 }
 0x2b9   : > { %v8086_v54 = vld [vmem:[#allocation8 + $0x4b8] sm:$0xf0]  ;;  %4762 = vmatpush.bf16.msrb.mxu1 %v8377_v17  ;;  %v10956_v17 = vmov 1.0   ;;  %vm4816_vm10 = vmand %vm4807_vm5, %vm4812_vm6 }
 0x2ba   : > { %v10207_v42 = vld [vmem:[#allocation8 + $0x69c] sm:$0xf]  ;;  %v8089_v49 = vor.u32 %v10143_v52, %v8086_v54  ;;  %4788 = vmatpush.bf16.msrb.mxu3 %v8889_v43  ;;  %v4559_v52 = vpop.f32.mrf.mxu1 }
 0x2bb   : > { %v8342_v44 = vld [vmem:[#allocation8 + $0x6b8] sm:$0xf0] }
 0x2bc   : > { %v10271_v45 = vld [vmem:[#allocation8 + $0x89c] sm:$0xf]  ;;  %v8345_v30 = vor.u32 %v10207_v42, %v8342_v44  ;;  %4750 = vmatpush.bf16.msrb.mxu0 %v8089_v49 }
 0x2bd   : > { %v8598_v46 = vld [vmem:[#allocation8 + $0x8b8] sm:$0xf0] }
 0x2be   : > { %v10335_v20 = vld [vmem:[#allocation8 + $0xa9c] sm:$0xf]  ;;  %v8601_v60 = vor.u32 %v10271_v45, %v8598_v46  ;;  %4763 = vmatpush.bf16.msrb.mxu1 %v8345_v30 }
 0x2bf   : > { %v8854_v22 = vld [vmem:[#allocation8 + $0xab8] sm:$0xf0] }
 0x2c0   : > { %v10135_v51 = vld [vmem:[#allocation8 + $0x45c] sm:$0xf]  ;;  %v8857_v61 = vor.u32 %v10335_v20, %v8854_v22  ;;  %4776 = vmatpush.bf16.msrb.mxu2 %v8601_v60 }
 0x2c1   : > { %v8054_v63 = vld [vmem:[#allocation8 + $0x478] sm:$0xf0] }
 0x2c2   : > { %v10199_v3 = vld [vmem:[#allocation8 + $0x65c] sm:$0xf]  ;;  %v8057_v62 = vor.u32 %v10135_v51, %v8054_v63  ;;  %4789 = vmatpush.bf16.msrb.mxu3 %v8857_v61  ;;  %v4561_v4 = vpop.f32.mrf.mxu1 }
 0x2c3   : > { %v8310_v10 = vld [vmem:[#allocation8 + $0x678] sm:$0xf0] }
 0x2c4   : > { %v10263_v11 = vld [vmem:[#allocation8 + $0x85c] sm:$0xf]  ;;  %v8313_v21 = vor.u32 %v10199_v3, %v8310_v10  ;;  %4751 = vmatpush.bf16.msrb.mxu0 %v8057_v62 }
 0x2c5   : > { %v8566_v50 = vld [vmem:[#allocation8 + $0x878] sm:$0xf0] }
 0x2c6   : > { %v10327_v12 = vld [vmem:[#allocation8 + $0xa5c] sm:$0xf]  ;;  %v8569_v23 = vor.u32 %v10263_v11, %v8566_v50  ;;  %4764 = vmatpush.bf16.msrb.mxu1 %v8313_v21 }
 0x2c7   : > { %v8822_v13 = vld [vmem:[#allocation8 + $0xa78] sm:$0xf0] }
 0x2c8   : > { %v10127_v14 = vld [vmem:[#allocation8 + $0x41c] sm:$0xf]  ;;  %v8825_v27 = vor.u32 %v10327_v12, %v8822_v13  ;;  %4777 = vmatpush.bf16.msrb.mxu2 %v8569_v23 }
 0x2c9   : > { %v8022_v15 = vld [vmem:[#allocation8 + $0x438] sm:$0xf0] }
 0x2ca   : > { %v10191_v24 = vld [vmem:[#allocation8 + $0x61c] sm:$0xf]  ;;  %v8025_v32 = vor.u32 %v10127_v14, %v8022_v15  ;;  %4790 = vmatpush.bf16.msrb.mxu3 %v8825_v27 }
 0x2cb   : > { %v8278_v1 = vld [vmem:[#allocation8 + $0x638] sm:$0xf0] }
 0x2cc   : > { %v10255_v28 = vld [vmem:[#allocation8 + $0x81c] sm:$0xf]  ;;  %v8281_v37 = vor.u32 %v10191_v24, %v8278_v1  ;;  %4752 = vmatpush.bf16.msrb.mxu0 %v8025_v32 }
 0x2cd   : > { %v8534_v29 = vld [vmem:[#allocation8 + $0x838] sm:$0xf0] }
 0x2ce   : > { %v10319_v33 = vld [vmem:[#allocation8 + $0xa1c] sm:$0xf]  ;;  %v8537_v39 = vor.u32 %v10255_v28, %v8534_v29  ;;  %4765 = vmatpush.bf16.msrb.mxu1 %v8281_v37 }
 0x2cf   : > { %v8790_v35 = vld [vmem:[#allocation8 + $0xa38] sm:$0xf0]  ;;  %4753 = vmatmul.bf16.vlgmr.msrb.gmra.mxu0 %v11222_v2  ;;  %v4546_v2 = vpop.f32.mrf.mxu0 }
 0x2d0   : > { %v8793_v40 = vor.u32 %v10319_v33, %v8790_v35  ;;  %4778 = vmatpush.bf16.msrb.mxu2 %v8537_v39  ;;  %9022 = vmatpush.xpose.msk.msra.mxu0 %vm11331_vm4, %v10956_v17  ;;  %v4547_v16 = vadd.f32 %v4546_v2, %v11323_v56 }
 0x2d1   : > { %4766 = vmatmul.bf16.vlgmr.msrb.gmra.mxu1 %v11224_v5  ;;  %v4572_v5 = vpop.f32.mrf.mxu2 }
 0x2d2   : > { %4791 = vmatpush.bf16.msrb.mxu3 %v8793_v40  ;;  %9023 = vmatpush.xpose.msk.msra.mxu1 %vm11336_vm7, %v10956_v17  ;;  %v11354_v54 = vadd.f32 %v4559_v52, %v4547_v16 }
 0x2d3   : > { %4779 = vmatmul.bf16.vlgmr.msrb.gmra.mxu2 %v11235_v53  ;;  %v4585_v53 = vpop.f32.mrf.mxu3 }
 0x2d4   : > { %9024 = vmatpush.xpose.msk.msra.mxu2 %vm4816_vm10, %v10956_v17  ;;  %9026 = vmatpush.msk.msrb.mxu0 %vm11331_vm4, %v10956_v17 }
 0x2d5   : > { %4792 = vmatmul.bf16.vlgmr.msrb.gmra.mxu3 %v11237_v57  ;;  %v4586_v57 = vadd.f32 %v4585_v53, %v4572_v5 }
 0x2d6   : > { %9025 = vmatpush.xpose.msk.msra.mxu3 %vm4817_vm11, %v10956_v17  ;;  %9028 = vmatpush.msk.msrb.mxu1 %vm11336_vm7, %v10956_v17 }
 0x2d7   : > { %v4548_v42 = vpop.f32.mrf.mxu0 }
 0x2d8   : > { %9030 = vmatpush.msk.msrb.mxu2 %vm4816_vm10, %v10956_v17 }
 0x2d9   : > { %v4574_v43 = vpop.f32.mrf.mxu2 }
 0x2da   : > { %9032 = vmatpush.msk.msrb.mxu3 %vm4817_vm11, %v10956_v17 }
 0x2db   : > { %v4587_v44 = vpop.f32.mrf.mxu3 }
 0x2df   : > { %4850 = vmatmul.f32.vlgmr.msra.gmra.mxu0 %v11282_v55 }
 0x2e0   : > { %v4598_v45 = vpop.f32.mrf.mxu0 }
 0x2e1   : > { %4870 = vmatmul.f32.vlgmr.msra.gmra.mxu1 %v11292_v0  ;;  %v4599_v46 = vadd.f32 %v4598_v45, %v4586_v57  ;;  %v9204_v45 = vld [vmem:[#allocation10 + $0x150] sm:$0xf] }
 0x2e2   : > { %v4611_v47 = vpop.f32.mrf.mxu1 }
 0x2e3   : > { %4890 = vmatmul.f32.vlgmr.msra.gmra.mxu2 %v11306_v41  ;;  %v4612_v48 = vadd.f32 %v4611_v47, %v4599_v46  ;;  %v10425_v46 = vld [vmem:[#allocation10 + $0x164] sm:$0xf0] }
 0x2e4   : > { %v9205_v47 = vor.u32 %v10425_v46, %v9204_v45  ;;  %v9492_v45 = vld [vmem:[#allocation10 + $0x390] sm:$0xf]  ;;  %v10497_v46 = vld [vmem:[#allocation10 + $0x3a4] sm:$0xf0] }
 0x2e5   : > { %4910 = vmatmul.f32.vlgmr.msra.gmra.mxu3 %v11316_v7 }
 0x2e6   : > { %6215 = vmatpush.bf16.msra.mxu0 %v9205_v47 }
 0x2e8   : > { %v4600_v56 = vpop.f32.mrf.mxu0 }
 0x2e9   : > { %v10419_v56 = vld [vmem:[#allocation10 + $0x134] sm:$0xf0] }
 0x2ea   : > { %v4624_v20 = vpop.f32.mrf.mxu2  ;;  %v4613_v58 = vpop.f32.mrf.mxu1 }
 0x2eb   : > { %v4625_v22 = vadd.f32 %v4624_v20, %v4612_v48  ;;  %v9396_v48 = vld [vmem:[#allocation10 + $0x2d0] sm:$0xf]  ;;  %v10473_v20 = vld [vmem:[#allocation10 + $0x2e4] sm:$0xf0]  ;;  %v9372_v58 = vld [vmem:[#allocation10 + $0x2a0] sm:$0xf] }
 0x2ec   : > { %v4637_v49 = vpop.f32.mrf.mxu3 }
 0x2ed   : > { %v11360_v51 = vadd.f32 %v4637_v49, %v4625_v22  ;;  %v9180_v22 = vld [vmem:[#allocation10 + $0x120] sm:$0xf]  ;;  %v9397_v49 = vor.u32 %v10473_v20, %v9396_v48  ;;  %v10395_v20 = vld [vmem:[#allocation10 + $0x74] sm:$0xf0] }
 0x2ef   : > { %6228 = vmatpush.bf16.msra.mxu1 %v9397_v49  ;;  %v10545_v49 = vld [vmem:[#allocation10 + $0x524] sm:$0xf0] }
 0x2f2   : > { %v4626_v55 = vpop.f32.mrf.mxu2 }
 0x2f3   : > { %v10467_v55 = vld [vmem:[#allocation10 + $0x2b4] sm:$0xf0] }
 0x2f4   : > { %v4639_v59 = vpop.f32.mrf.mxu3 }
 0x2f5   : > { %v9181_v59 = vor.u32 %v10419_v56, %v9180_v22  ;;  %v9684_v22 = vld [vmem:[#allocation10 + $0x510] sm:$0xf]  ;;  %v9276_v56 = vld [vmem:[#allocation10 + $0x1e0] sm:$0xf] }
 0x2f7   : > { %6216 = vmatpush.bf16.msra.mxu0 %v9181_v59  ;;  %v9493_v59 = vor.u32 %v10497_v46, %v9492_v45  ;;  %v10566_v45 = vld [vmem:[#allocation10 + $0x5d4] sm:$0xf]  ;;  %v9782_v46 = vld [vmem:[#allocation10 + $0x5e8] sm:$0xf0] }
 0x300   : > { %v4650_v0 = vpop.f32.mrf.mxu0 }
 0x302   : > { %v4663_v30 = vpop.f32.mrf.mxu1 }
 0x303   : > { %v4664_v41 = vadd.f32 %v4663_v30, %v4650_v0  ;;  %v9588_v0 = vld [vmem:[#allocation10 + $0x450] sm:$0xf]  ;;  %v10521_v30 = vld [vmem:[#allocation10 + $0x464] sm:$0xf0] }
 0x308   : > { %v4652_v6 = vpop.f32.mrf.mxu0 }
 0x309   : > { %v10413_v6 = vld [vmem:[#allocation10 + $0x104] sm:$0xf0] }
 0x30a   : > { %v4676_v60 = vpop.f32.mrf.mxu2  ;;  %v4665_v8 = vpop.f32.mrf.mxu1 }
 0x30b   : > { %v4677_v7 = vadd.f32 %v4676_v60, %v4664_v41  ;;  %v9780_v41 = vld [vmem:[#allocation10 + $0x5d0] sm:$0xf]  ;;  %v9373_v60 = vor.u32 %v10467_v55, %v9372_v58  ;;  %v10443_v58 = vld [vmem:[#allocation10 + $0x1f4] sm:$0xf0] }
 0x30c   : > { %v4689_v63 = vpop.f32.mrf.mxu3 }
 0x30d   : > { %v4690_v3 = vadd.f32 %v4689_v63, %v4677_v7  ;;  %v9589_v7 = vor.u32 %v10521_v30, %v9588_v0  ;;  %v10569_v63 = vld [vmem:[#allocation10 + $0x5e4] sm:$0xf0]  ;;  %6229 = vmatpush.bf16.msra.mxu1 %v9373_v60  ;;  %v9685_v30 = vor.u32 %v10545_v49, %v9684_v22  ;;  %v9468_v60 = vld [vmem:[#allocation10 + $0x360] sm:$0xf]  ;;  %v10410_v49 = vld [vmem:[#allocation10 + $0xf4] sm:$0xf] }
 0x30e   : > { %v9781_v8 = vor.u32 %v10569_v63, %v9780_v41  ;;  %v9060_v41 = vld [vmem:[#allocation10 + $0x30] sm:$0xf] }
 0x30f   : > { %6241 = vmatpush.bf16.msra.mxu2 %v9589_v7  ;;  %v10491_v7 = vld [vmem:[#allocation10 + $0x374] sm:$0xf0] }
 0x310   : > { %6254 = vmatpush.bf16.msra.mxu3 %v9781_v8  ;;  %v9660_v8 = vld [vmem:[#allocation10 + $0x4e0] sm:$0xf] }
 0x312   : > { %v4678_v61 = vpop.f32.mrf.mxu2 }
 0x313   : > { %v9348_v61 = vld [vmem:[#allocation10 + $0x270] sm:$0xf] }
 0x314   : > { %v4691_v10 = vpop.f32.mrf.mxu3 }
 0x315   : > { %v10461_v10 = vld [vmem:[#allocation10 + $0x284] sm:$0xf0] }
 0x323   : > { %v4702_v11 = vpop.f32.mrf.mxu0 }
 0x324   : > { %v4703_v50 = vadd.f32 %v4702_v11, %v4690_v3  ;;  %v9156_v3 = vld [vmem:[#allocation10 + $0xf0] sm:$0xf]  ;;  %v9564_v11 = vld [vmem:[#allocation10 + $0x420] sm:$0xf] }
 0x325   : > { %v4715_v12 = vpop.f32.mrf.mxu1 }
 0x326   : > { %v11362_v13 = vadd.f32 %v4715_v12, %v4703_v50  ;;  %v10515_v50 = vld [vmem:[#allocation10 + $0x434] sm:$0xf0]  ;;  %v9756_v12 = vld [vmem:[#allocation10 + $0x5a0] sm:$0xf] }
 0x32a   : > { %v4728_v62 = vpop.f32.mrf.mxu2 }
 0x32b   : > { %v4704_v19 = vpop.f32.mrf.mxu0 }
 0x32c   : > { %v4741_v14 = vpop.f32.mrf.mxu3 }
 0x32d   : > { %v4742_v15 = vadd.f32 %v4741_v14, %v4728_v62  ;;  %v4717_v21 = vpop.f32.mrf.mxu1  ;;  %v10563_v62 = vld [vmem:[#allocation10 + $0x5b4] sm:$0xf0]  ;;  %v9157_v14 = vor.u32 %v10413_v6, %v9156_v3  ;;  %v9277_v3 = vor.u32 %v10443_v58, %v9276_v56  ;;  %v10389_v6 = vld [vmem:[#allocation10 + $0x44] sm:$0xf0]  ;;  %v9158_v58 = vld [vmem:[#allocation10 + $0x108] sm:$0xf0] }
 0x32e   : > { %v9757_v19 = vor.u32 %v10563_v62, %v9756_v12  ;;  %v9132_v21 = vld [vmem:[#allocation10 + $0xc0] sm:$0xf]  ;;  %v9061_v12 = vor.u32 %v10389_v6, %v9060_v41  ;;  %v10560_v41 = vld [vmem:[#allocation10 + $0x5a4] sm:$0xf] }
 0x32f   : > { %6217 = vmatpush.bf16.msra.mxu0 %v9157_v14  ;;  %v9444_v14 = vld [vmem:[#allocation10 + $0x330] sm:$0xf]  ;;  %v10404_v6 = vld [vmem:[#allocation10 + $0xc4] sm:$0xf] }
 0x330   : > { %6255 = vmatpush.bf16.msra.mxu3 %v9757_v19 }
 0x332   : > { %v4730_v23 = vpop.f32.mrf.mxu2 }
 0x333   : > { %v10407_v23 = vld [vmem:[#allocation10 + $0xd4] sm:$0xf0] }
 0x334   : > { %v4743_v24 = vpop.f32.mrf.mxu3 }
 0x335   : > { %v9324_v24 = vld [vmem:[#allocation10 + $0x240] sm:$0xf] }
 0x34c   : > { %v4754_v1 = vpop.f32.mrf.mxu0 }
 0x34d   : > { %v4755_v18 = vadd.f32 %v4754_v1, %v4742_v15  ;;  %v9565_v15 = vor.u32 %v10515_v50, %v9564_v11  ;;  %v10437_v11 = vld [vmem:[#allocation10 + $0x1c4] sm:$0xf0]  ;;  %v9469_v50 = vor.u32 %v10491_v7, %v9468_v60  ;;  %v9758_v60 = vld [vmem:[#allocation10 + $0x5b8] sm:$0xf0]  ;;  %v9161_v7 = vor.u32 %v10410_v49, %v9158_v58 }
 0x34e   : > { %v4767_v26 = vpop.f32.mrf.mxu1  ;;  %v9038_v58 = vld [vmem:[#allocation10 + $0x18] sm:$0xf0] }
 0x34f   : > { %v4768_v27 = vadd.f32 %v4767_v26, %v4755_v18  ;;  %v9349_v18 = vor.u32 %v10461_v10, %v9348_v61  ;;  %v10455_v26 = vld [vmem:[#allocation10 + $0x254] sm:$0xf0]  ;;  %6242 = vmatpush.bf16.msra.mxu2 %v9565_v15  ;;  %v9252_v10 = vld [vmem:[#allocation10 + $0x1b0] sm:$0xf]  ;;  %v10485_v15 = vld [vmem:[#allocation10 + $0x344] sm:$0xf0] }
 0x350   : > { %v10539_v61 = vld [vmem:[#allocation10 + $0x4f4] sm:$0xf0]  ;;  %v9253_v19 = vor.u32 %v10437_v11, %v9252_v10  ;;  %v9326_v11 = vld [vmem:[#allocation10 + $0x258] sm:$0xf0] }
 0x351   : > { %6230 = vmatpush.bf16.msra.mxu1 %v9349_v18  ;;  %v9661_v62 = vor.u32 %v10539_v61, %v9660_v8  ;;  %v10431_v18 = vld [vmem:[#allocation10 + $0x194] sm:$0xf0]  ;;  %v9134_v8 = vld [vmem:[#allocation10 + $0xd8] sm:$0xf0]  ;;  %v10452_v61 = vld [vmem:[#allocation10 + $0x244] sm:$0xf] }
 0x352   : > { %v9137_v10 = vor.u32 %v10404_v6, %v9134_v8  ;;  %v10476_v8 = vld [vmem:[#allocation10 + $0x304] sm:$0xf] }
 0x354   : > { %v4756_v32 = vpop.f32.mrf.mxu0 }
 0x355   : > { %v10557_v32 = vld [vmem:[#allocation10 + $0x584] sm:$0xf0] }
 0x356   : > { %v4780_v28 = vpop.f32.mrf.mxu2  ;;  %v4769_v33 = vpop.f32.mrf.mxu1 }
 0x357   : > { %v4781_v29 = vadd.f32 %v4780_v28, %v4768_v27  ;;  %v9540_v27 = vld [vmem:[#allocation10 + $0x3f0] sm:$0xf]  ;;  %v10509_v28 = vld [vmem:[#allocation10 + $0x404] sm:$0xf0] }
 0x358   : > { %v4793_v31 = vpop.f32.mrf.mxu3 }
 0x359   : > { %v11364_v35 = vadd.f32 %v4793_v31, %v4781_v29  ;;  %v9732_v31 = vld [vmem:[#allocation10 + $0x570] sm:$0xf] }
 0x35c   : > { %v4851_v38 = vpop.f32.mrf.mxu0 }
 0x35e   : > { %v4782_v36 = vpop.f32.mrf.mxu2  ;;  %v4871_v39 = vpop.f32.mrf.mxu1 }
 0x35f   : > { %v4872_v40 = vadd.f32 %v4871_v39, %v4851_v38  ;;  %v9541_v36 = vor.u32 %v10509_v28, %v9540_v27  ;;  %v9733_v38 = vor.u32 %v10557_v32, %v9732_v31  ;;  %v9108_v39 = vld [vmem:[#allocation10 + $0x90] sm:$0xf]  ;;  %v9206_v27 = vld [vmem:[#allocation10 + $0x168] sm:$0xf0]  ;;  %v9445_v28 = vor.u32 %v10485_v15, %v9444_v14  ;;  %v10554_v14 = vld [vmem:[#allocation10 + $0x574] sm:$0xf] }
 0x360   : > { %v4795_v37 = vpop.f32.mrf.mxu3  ;;  %v9398_v31 = vld [vmem:[#allocation10 + $0x2e8] sm:$0xf0]  ;;  %v9636_v32 = vld [vmem:[#allocation10 + $0x4b0] sm:$0xf] }
 0x361   : > { %v9133_v37 = vor.u32 %v10407_v23, %v9132_v21  ;;  %6243 = vmatpush.bf16.msra.mxu2 %v9541_v36  ;;  %6256 = vmatpush.bf16.msra.mxu3 %v9733_v38  ;;  %v9036_v21 = vld [vmem:[#allocation10] sm:$0xf]  ;;  %v10383_v23 = vld [vmem:[#allocation10 + $0x14] sm:$0xf0]  ;;  %v10533_v36 = vld [vmem:[#allocation10 + $0x4c4] sm:$0xf0] }
 0x362   : > { %v10479_v38 = vld [vmem:[#allocation10 + $0x314] sm:$0xf0] }
 0x363   : > { %6218 = vmatpush.bf16.msra.mxu0 %v9133_v37  ;;  %v9420_v37 = vld [vmem:[#allocation10 + $0x300] sm:$0xf] }
 0x366   : > { %v4891_v34 = vpop.f32.mrf.mxu2 }
 0x367   : > { %v4892_v9 = vadd.f32 %v4891_v34, %v4872_v40  ;;  %v10401_v40 = vld [vmem:[#allocation10 + $0xa4] sm:$0xf0]  ;;  %v9516_v34 = vld [vmem:[#allocation10 + $0x3c0] sm:$0xf] }
 0x368   : > { %v4911_v17 = vpop.f32.mrf.mxu3 }
 0x369   : > { %v4912_v2 = vadd.f32 %v4911_v17, %v4892_v9  ;;  %v9325_v17 = vor.u32 %v10455_v26, %v9324_v24  ;;  %v9228_v24 = vld [vmem:[#allocation10 + $0x180] sm:$0xf]  ;;  %v10422_v26 = vld [vmem:[#allocation10 + $0x154] sm:$0xf] }
 0x36b   : > { %v4915_v16 = vsel %vm4914_vm12, %v4912_v2, -inf  ;;  %6231 = vmatpush.bf16.msra.mxu1 %v9325_v17  ;;  %v9590_v17 = vld [vmem:[#allocation10 + $0x468] sm:$0xf0] }
 0x36c   : > { %v4916_v52 = vrot.slane %v4915_v16, 4 }
 0x36e   : > { %v4917_v5 = vmax.f32 %v4915_v16, %v4916_v52  ;;  %v9708_v16 = vld [vmem:[#allocation10 + $0x540] sm:$0xf]  ;;  %v10551_v52 = vld [vmem:[#allocation10 + $0x554] sm:$0xf0] }
 0x370   : > { %v4918_v53 = vrot.slane %v4917_v5, 2 }
 0x372   : > { %v4919_v42 = vmax.f32 %v4917_v5, %v4918_v53  ;;  %v9300_v5 = vld [vmem:[#allocation10 + $0x210] sm:$0xf]  ;;  %v10449_v53 = vld [vmem:[#allocation10 + $0x224] sm:$0xf0] }
 0x373   : > { %v9301_v48 = vor.u32 %v10449_v53, %v9300_v5  ;;  %v9637_v5 = vor.u32 %v10533_v36, %v9636_v32  ;;  %v9182_v53 = vld [vmem:[#allocation10 + $0x138] sm:$0xf0]  ;;  %v10548_v32 = vld [vmem:[#allocation10 + $0x544] sm:$0xf] }
 0x374   : > { %v4920_v57 = vrot.slane %v4919_v42, 1  ;;  %v9710_v36 = vld [vmem:[#allocation10 + $0x558] sm:$0xf0] }
 0x375   : > { %6232 = vmatpush.bf16.msra.mxu1 %v9301_v48  ;;  %v9566_v48 = vld [vmem:[#allocation10 + $0x438] sm:$0xf0] }
 0x376   : > { %v4921_v4 = vmax.f32 %v4919_v42, %v4920_v57 }
 0x378   : > { %v4922_v43 = vsub.f32 %v4912_v2, %v4921_v4  ;;  %v10503_v2 = vld [vmem:[#allocation10 + $0x3d4] sm:$0xf0]  ;;  %v9109_v4 = vor.u32 %v10401_v40, %v9108_v39  ;;  %v9037_v40 = vor.u32 %v10383_v23, %v9036_v21  ;;  %v10398_v23 = vld [vmem:[#allocation10 + $0x94] sm:$0xf] }
 0x379   : > { %v9517_v57 = vor.u32 %v10503_v2, %v9516_v34  ;;  %6233 = vmatpush.bf16.msra.mxu1 %v9277_v3  ;;  %v9229_v34 = vor.u32 %v10431_v18, %v9228_v24  ;;  %v9209_v2 = vor.u32 %v10422_v26, %v9206_v27  ;;  %v9761_v3 = vor.u32 %v10560_v41, %v9758_v60  ;;  %v9110_v24 = vld [vmem:[#allocation10 + $0xa8] sm:$0xf0]  ;;  %v10446_v18 = vld [vmem:[#allocation10 + $0x214] sm:$0xf] }
 0x37a   : > { %v4923_v44 = vmul.f32 1.442695, %v4922_v43  ;;  %v9709_v43 = vor.u32 %v10551_v52, %v9708_v16  ;;  %6219 = vmatpush.bf16.msra.mxu0 %v9109_v4  ;;  %v10416_v52 = vld [vmem:[#allocation10 + $0x124] sm:$0xf]  ;;  %v9421_v4 = vor.u32 %v10479_v38, %v9420_v37  ;;  %v9113_v26 = vor.u32 %v10398_v23, %v9110_v24  ;;  %v9302_v27 = vld [vmem:[#allocation10 + $0x228] sm:$0xf0] }
 0x37b   : > { %6244 = vmatpush.bf16.msra.mxu2 %v9517_v57  ;;  %v9374_v57 = vld [vmem:[#allocation10 + $0x2b8] sm:$0xf0]  ;;  %v9713_v37 = vor.u32 %v10548_v32, %v9710_v36  ;;  %v10392_v38 = vld [vmem:[#allocation10 + $0x64] sm:$0xf]  ;;  %v10482_v41 = vld [vmem:[#allocation10 + $0x334] sm:$0xf] }
 0x37c   : > { %10678 = vpow2.f32 %v4923_v44  ;;  %v9084_v44 = vld [vmem:[#allocation10 + $0x60] sm:$0xf]  ;;  %6257 = vmatpush.bf16.msra.mxu3 %v9709_v43  ;;  %v10527_v43 = vld [vmem:[#allocation10 + $0x494] sm:$0xf0]  ;;  %v9446_v60 = vld [vmem:[#allocation10 + $0x348] sm:$0xf0] }
 0x37d   : > { %v9085_v0 = vor.u32 %v10395_v20, %v9084_v44  ;;  %6234 = vmatpush.bf16.msra.mxu1 %v9253_v19  ;;  %v9185_v20 = vor.u32 %v10416_v52, %v9182_v53  ;;  %v9734_v19 = vld [vmem:[#allocation10 + $0x588] sm:$0xf0]  ;;  %v10542_v52 = vld [vmem:[#allocation10 + $0x514] sm:$0xf] }
 0x37e   : > { %v9737_v21 = vor.u32 %v10554_v14, %v9734_v19  ;;  %v9686_v53 = vld [vmem:[#allocation10 + $0x528] sm:$0xf0] }
 0x37f   : > { %6245 = vmatpush.bf16.msra.mxu2 %v9493_v59  ;;  %6220 = vmatpush.bf16.msra.mxu0 %v9085_v0  ;;  %v9350_v59 = vld [vmem:[#allocation10 + $0x288] sm:$0xf0]  ;;  %v9785_v0 = vor.u32 %v10566_v45, %v9782_v46  ;;  %v10488_v46 = vld [vmem:[#allocation10 + $0x364] sm:$0xf] }
 0x380   : > { %6258 = vmatpush.bf16.msra.mxu3 %v9685_v30 }
 0x381   : > { %6235 = vmatpush.bf16.msra.mxu1 %v9229_v34 }
 0x382   : > { %v11367_v1 = vpop.eup %10678 }
 0x383   : > { %v4925_v29 = vsel %vm4914_vm12, %v11367_v1, 0.0  ;;  %6246 = vmatpush.bf16.msra.mxu2 %v9469_v50  ;;  %6221 = vmatpush.bf16.msra.mxu0 %v9061_v12  ;;  %v9329_v50 = vor.u32 %v10452_v61, %v9326_v11  ;;  %v10506_v12 = vld [vmem:[#allocation10 + $0x3f4] sm:$0xf]  ;;  %v9422_v61 = vld [vmem:[#allocation10 + $0x318] sm:$0xf0] }
 0x384   : > { %v4926_v33 = vrot.slane %v4925_v29, 4  ;;  %6259 = vmatpush.bf16.msra.mxu3 %v9661_v62  ;;  %v9542_v62 = vld [vmem:[#allocation10 + $0x408] sm:$0xf0]  ;;  %v10524_v11 = vld [vmem:[#allocation10 + $0x484] sm:$0xf] }
 0x385   : > { %v9545_v15 = vor.u32 %v10506_v12, %v9542_v62 }
 0x386   : > { %v4927_v9 = vadd.f32 %v4926_v33, %v4925_v29  ;;  %v10470_v29 = vld [vmem:[#allocation10 + $0x2d4] sm:$0xf] }
 0x387   : > { %v9401_v16 = vor.u32 %v10470_v29, %v9398_v31  ;;  %6247 = vmatpush.bf16.msra.mxu2 %v9445_v28  ;;  %6222 = vmatpush.bf16.msra.mxu0 %v9037_v40  ;;  %v9305_v28 = vor.u32 %v10446_v18, %v9302_v27  ;;  %v10500_v29 = vld [vmem:[#allocation10 + $0x3c4] sm:$0xf]  ;;  %v9518_v31 = vld [vmem:[#allocation10 + $0x3d8] sm:$0xf0] }
 0x388   : > { %v4928_v42 = vrot.slane %v4927_v9, 2  ;;  %6260 = vmatpush.bf16.msra.mxu3 %v9637_v5  ;;  %v10440_v40 = vld [vmem:[#allocation10 + $0x1e4] sm:$0xf] }
 0x38a   : > { %v4929_v47 = vadd.f32 %v4928_v42, %v4927_v9  ;;  %v10518_v9 = vld [vmem:[#allocation10 + $0x454] sm:$0xf]  ;;  %v10464_v42 = vld [vmem:[#allocation10 + $0x2a4] sm:$0xf] }
 0x38b   : > { %v9593_v44 = vor.u32 %v10518_v9, %v9590_v17  ;;  %v9377_v22 = vor.u32 %v10464_v42, %v9374_v57  ;;  %6248 = vmatpush.bf16.msra.mxu2 %v9421_v4  ;;  %v9278_v9 = vld [vmem:[#allocation10 + $0x1f8] sm:$0xf0]  ;;  %v9689_v42 = vor.u32 %v10542_v52, %v9686_v53  ;;  %v10386_v57 = vld [vmem:[#allocation10 + $0x34] sm:$0xf]  ;;  %v9062_v4 = vld [vmem:[#allocation10 + $0x48] sm:$0xf0] }
 0x38c   : > { %v4930_v55 = vrot.slane %v4929_v47, 1  ;;  %v9281_v17 = vor.u32 %v10440_v40, %v9278_v9  ;;  %v10474_v9 = vld [vmem:[#allocation10 + $0x2ec] sm:$0xf0] }
 0x38e   : > { %v4931_v63 = vadd.f32 %v4930_v55, %v4929_v47  ;;  %v10512_v47 = vld [vmem:[#allocation10 + $0x424] sm:$0xf]  ;;  %v10458_v55 = vld [vmem:[#allocation10 + $0x274] sm:$0xf] }
 0x38f   : > { %v9569_v30 = vor.u32 %v10512_v47, %v9566_v48  ;;  %v9470_v47 = vld [vmem:[#allocation10 + $0x378] sm:$0xf0]  ;;  %v10536_v48 = vld [vmem:[#allocation10 + $0x4e4] sm:$0xf] }
 0x390   : > { %10680 = vrcp.f32 %v4931_v63  ;;  %v9353_v63 = vor.u32 %v10458_v55, %v9350_v59  ;;  %v10428_v55 = vld [vmem:[#allocation10 + $0x184] sm:$0xf] }
 0x396   : > { %v10681_v33 = vpop.eup %10680 }
 0x397   : > { %v4933_v39 = vmul.f32 %v10681_v33, %v11367_v1  ;;  %v9612_v1 = vld [vmem:[#allocation10 + $0x480] sm:$0xf]  ;;  %v9521_v33 = vor.u32 %v10500_v29, %v9518_v31 }
 0x398   : > { %v9613_v56 = vor.u32 %v10527_v43, %v9612_v1  ;;  %v10434_v1 = vld [vmem:[#allocation10 + $0x1b4] sm:$0xf]  ;;  %v9065_v43 = vor.u32 %v10386_v57, %v9062_v4  ;;  %v9188_v57 = vld [vmem:[#allocation10 + $0x128] sm:$0xf] }
 0x399   : > { %9027 = vmatmul.msk.f32.vlgmr.msrb.gmra.mxu0 %vm4914_vm12, %v4933_v39  ;;  %9029 = vmatmul.msk.f32.vlgmr.msrb.gmra.mxu1 %vm4914_vm12, %v4933_v39 }
 0x39a   : > { %9031 = vmatmul.msk.f32.vlgmr.msrb.gmra.mxu2 %vm4914_vm12, %v4933_v39  ;;  %9033 = vmatmul.msk.f32.vlgmr.msrb.gmra.mxu3 %vm4914_vm12, %v4933_v39  ;;  %v9086_v39 = vld [vmem:[#allocation10 + $0x78] sm:$0xf0] }
 0x39b   : > { %6267 = vmatpush.bf16.msrb.mxu0 %v9209_v2  ;;  %6280 = vmatpush.bf16.msrb.mxu1 %v9401_v16  ;;  %v9089_v34 = vor.u32 %v10392_v38, %v9086_v39  ;;  %v10494_v2 = vld [vmem:[#allocation10 + $0x394] sm:$0xf]  ;;  %v9494_v16 = vld [vmem:[#allocation10 + $0x3a8] sm:$0xf0]  ;;  %v9212_v39 = vld [vmem:[#allocation10 + $0x158] sm:$0xf] }
 0x39c   : > { %6293 = vmatpush.bf16.msrb.mxu2 %v9593_v44  ;;  %6261 = vmatpush.bf16.msra.mxu3 %v9613_v56  ;;  %v9497_v5 = vor.u32 %v10494_v2, %v9494_v16  ;;  %v9254_v44 = vld [vmem:[#allocation10 + $0x1c8] sm:$0xf0]  ;;  %v10380_v56 = vld [vmem:[#allocation10 + $0x4] sm:$0xf] }
 0x39d   : > { %v9257_v45 = vor.u32 %v10434_v1, %v9254_v44  ;;  %v9041_v59 = vor.u32 %v10380_v56, %v9038_v58  ;;  %v10420_v1 = vld [vmem:[#allocation10 + $0x13c] sm:$0xf0] }
 0x39e   : > { %v10468_v44 = vld [vmem:[#allocation10 + $0x2bc] sm:$0xf0]  ;;  %v9189_v58 = vor.u32 %v10420_v1, %v9188_v57  ;;  %v10498_v57 = vld [vmem:[#allocation10 + $0x3ac] sm:$0xf0]  ;;  %v9692_v1 = vld [vmem:[#allocation10 + $0x518] sm:$0xf] }
 0x39f   : > { %6268 = vmatpush.bf16.msrb.mxu0 %v9185_v20  ;;  %6281 = vmatpush.bf16.msrb.mxu1 %v9377_v22  ;;  %v9473_v20 = vor.u32 %v10488_v46, %v9470_v47  ;;  %v9662_v22 = vld [vmem:[#allocation10 + $0x4f8] sm:$0xf0]  ;;  %v9596_v47 = vld [vmem:[#allocation10 + $0x458] sm:$0xf] }
 0x3a0   : > { %6306 = vmatpush.bf16.msrb.mxu3 %v9785_v0  ;;  %6294 = vmatpush.bf16.msrb.mxu2 %v9569_v30  ;;  %v9665_v49 = vor.u32 %v10536_v48, %v9662_v22  ;;  %v9230_v0 = vld [vmem:[#allocation10 + $0x198] sm:$0xf0]  ;;  %v10522_v48 = vld [vmem:[#allocation10 + $0x46c] sm:$0xf0] }
 0x3a1   : > { %v9233_v30 = vor.u32 %v10428_v55, %v9230_v0  ;;  %v10570_v22 = vld [vmem:[#allocation10 + $0x5ec] sm:$0xf0] }
 0x3a2   : > { %v10414_v0 = vld [vmem:[#allocation10 + $0x10c] sm:$0xf0] }
 0x3a3   : > { %6269 = vmatpush.bf16.msrb.mxu0 %v9161_v7  ;;  %6282 = vmatpush.bf16.msrb.mxu1 %v9353_v63  ;;  %v10530_v7 = vld [vmem:[#allocation10 + $0x4b4] sm:$0xf]  ;;  %v9638_v63 = vld [vmem:[#allocation10 + $0x4c8] sm:$0xf0] }
 0x3a4   : > { %6307 = vmatpush.bf16.msrb.mxu3 %v9761_v3  ;;  %6295 = vmatpush.bf16.msrb.mxu2 %v9545_v15  ;;  %v9449_v3 = vor.u32 %v10482_v41, %v9446_v60  ;;  %v9641_v6 = vor.u32 %v10530_v7, %v9638_v63  ;;  %v10462_v41 = vld [vmem:[#allocation10 + $0x28c] sm:$0xf0]  ;;  %v9597_v63 = vor.u32 %v10522_v48, %v9596_v47  ;;  %v9260_v48 = vld [vmem:[#allocation10 + $0x1b8] sm:$0xf] }
 0x3a5   : > { %v10390_v47 = vld [vmem:[#allocation10 + $0x4c] sm:$0xf0] }
 0x3a7   : > { %6270 = vmatpush.bf16.msrb.mxu0 %v9137_v10  ;;  %6283 = vmatpush.bf16.msrb.mxu1 %v9329_v50  ;;  %v9425_v10 = vor.u32 %v10476_v8, %v9422_v61  ;;  %v9614_v50 = vld [vmem:[#allocation10 + $0x498] sm:$0xf0]  ;;  %v9572_v8 = vld [vmem:[#allocation10 + $0x428] sm:$0xf]  ;;  %v10516_v61 = vld [vmem:[#allocation10 + $0x43c] sm:$0xf0] }
 0x3a8   : > { %6308 = vmatpush.bf16.msrb.mxu3 %v9737_v21  ;;  %6296 = vmatpush.bf16.msrb.mxu2 %v9521_v33  ;;  %v9617_v12 = vor.u32 %v10524_v11, %v9614_v50 }
 0x3ab   : > { %6271 = vmatpush.bf16.msrb.mxu0 %v9113_v26  ;;  %6284 = vmatpush.bf16.msrb.mxu1 %v9305_v28 }
 0x3ac   : > { %6309 = vmatpush.bf16.msrb.mxu3 %v9713_v37  ;;  %6297 = vmatpush.bf16.msrb.mxu2 %v9497_v5 }
 0x3af   : > { %6272 = vmatpush.bf16.msrb.mxu0 %v9089_v34  ;;  %6285 = vmatpush.bf16.msrb.mxu1 %v9281_v17  ;;  %v9404_v34 = vld [vmem:[#allocation10 + $0x2d8] sm:$0xf] }
 0x3b0   : > { %6310 = vmatpush.bf16.msrb.mxu3 %v9689_v42  ;;  %6298 = vmatpush.bf16.msrb.mxu2 %v9473_v20  ;;  %v9788_v20 = vld [vmem:[#allocation10 + $0x5d8] sm:$0xf] }
 0x3b3   : > { %6273 = vmatpush.bf16.msrb.mxu0 %v9065_v43  ;;  %6286 = vmatpush.bf16.msrb.mxu1 %v9257_v45  ;;  %v9380_v43 = vld [vmem:[#allocation10 + $0x2a8] sm:$0xf] }
 0x3b4   : > { %6311 = vmatpush.bf16.msrb.mxu3 %v9665_v49  ;;  %6299 = vmatpush.bf16.msrb.mxu2 %v9449_v3  ;;  %v9381_v55 = vor.u32 %v10468_v44, %v9380_v43  ;;  %v9789_v3 = vor.u32 %v10570_v22, %v9788_v20  ;;  %v10546_v43 = vld [vmem:[#allocation10 + $0x52c] sm:$0xf0] }
 0x3b5   : > { %v10438_v20 = vld [vmem:[#allocation10 + $0x1cc] sm:$0xf0] }
 0x3b7   : > { %6274 = vmatpush.bf16.msrb.mxu0 %v9041_v59  ;;  %6287 = vmatpush.bf16.msrb.mxu1 %v9233_v30  ;;  %v9164_v59 = vld [vmem:[#allocation10 + $0xf8] sm:$0xf] }
 0x3b8   : > { %6312 = vmatpush.bf16.msrb.mxu3 %v9641_v6  ;;  %6300 = vmatpush.bf16.msrb.mxu2 %v9425_v10  ;;  %v9356_v30 = vld [vmem:[#allocation10 + $0x278] sm:$0xf]  ;;  %v9165_v6 = vor.u32 %v10414_v0, %v9164_v59  ;;  %v10540_v59 = vld [vmem:[#allocation10 + $0x4fc] sm:$0xf0] }
 0x3b9   : > { %v9357_v50 = vor.u32 %v10462_v41, %v9356_v30  ;;  %v9261_v30 = vor.u32 %v10438_v20, %v9260_v48  ;;  %v9044_v41 = vld [vmem:[#allocation10 + $0x8] sm:$0xf]  ;;  %v9142_v48 = vld [vmem:[#allocation10 + $0xe0] sm:$0xf0]  ;;  %v10453_v20 = vld [vmem:[#allocation10 + $0x24c] sm:$0xf] }
 0x3bc   : > { %6313 = vmatpush.bf16.msrb.mxu3 %v9617_v12  ;;  %v9764_v12 = vld [vmem:[#allocation10 + $0x5a8] sm:$0xf] }
 0x416   : > { %v4954_v62 = vpop.f32.mrf.mxu0  ;;  %v4974_v14 = vpop.f32.mrf.mxu1 }
 0x417   : > { %v5017_v15 = vmul.f32 %v4954_v62, %v11354_v54  ;;  %v5018_v19 = vmul.f32 %v4974_v14, %v11360_v51  ;;  %v10426_v54 = vld [vmem:[#allocation10 + $0x16c] sm:$0xf0]  ;;  %v10564_v62 = vld [vmem:[#allocation10 + $0x5bc] sm:$0xf0]  ;;  %v9140_v14 = vld [vmem:[#allocation10 + $0xc8] sm:$0xf] }
 0x418   : > { %v9213_v42 = vor.u32 %v10426_v54, %v9212_v39  ;;  %v9524_v54 = vld [vmem:[#allocation10 + $0x3c8] sm:$0xf] }
 0x419   : > { %v5021_v21 = vrot.slane %v5017_v15, 4  ;;  %v5027_v23 = vrot.slane %v5018_v19, 4 }
 0x41b   : > { %v5022_v24 = vadd.f32 %v5021_v21, %v5017_v15  ;;  %v5028_v18 = vadd.f32 %v5027_v23, %v5018_v19  ;;  %v10408_v15 = vld [vmem:[#allocation10 + $0xdc] sm:$0xf0]  ;;  %v9332_v19 = vld [vmem:[#allocation10 + $0x248] sm:$0xf]  ;;  %v9573_v23 = vor.u32 %v10516_v61, %v9572_v8 }
 0x41c   : > { %v10456_v21 = vld [vmem:[#allocation10 + $0x25c] sm:$0xf0] }
 0x41d   : > { %v5023_v26 = vrot.slane %v5022_v24, 2  ;;  %v5029_v27 = vrot.slane %v5028_v18, 2  ;;  %v4994_v28 = vpop.f32.mrf.mxu2  ;;  %v5014_v29 = vpop.f32.mrf.mxu3 }
 0x41e   : > { %v5019_v31 = vmul.f32 %v4994_v28, %v11362_v13  ;;  %v5020_v32 = vmul.f32 %v5014_v29, %v11364_v35  ;;  %v9405_v13 = vor.u32 %v10474_v9, %v9404_v34  ;;  %v10510_v28 = vld [vmem:[#allocation10 + $0x40c] sm:$0xf0]  ;;  %v9740_v29 = vld [vmem:[#allocation10 + $0x578] sm:$0xf]  ;;  %v10552_v34 = vld [vmem:[#allocation10 + $0x55c] sm:$0xf0] }
 0x41f   : > { %v5024_v33 = vadd.f32 %v5023_v26, %v5022_v24  ;;  %v5030_v36 = vadd.f32 %v5029_v27, %v5028_v18  ;;  %v9765_v24 = vor.u32 %v10564_v62, %v9764_v12  ;;  %v9548_v18 = vld [vmem:[#allocation10 + $0x3f8] sm:$0xf]  ;;  %v9141_v26 = vor.u32 %v10408_v15, %v9140_v14  ;;  %v9406_v12 = vld [vmem:[#allocation10 + $0x2f0] sm:$0xf0]  ;;  %v10486_v14 = vld [vmem:[#allocation10 + $0x34c] sm:$0xf0] }
 0x420   : > { %v5033_v37 = vrot.slane %v5019_v31, 4  ;;  %v5039_v38 = vrot.slane %v5020_v32, 4  ;;  %v9333_v27 = vor.u32 %v10456_v21, %v9332_v19  ;;  %v9452_v62 = vld [vmem:[#allocation10 + $0x338] sm:$0xf]  ;;  %v10534_v19 = vld [vmem:[#allocation10 + $0x4cc] sm:$0xf0] }
 0x421   : > { %v5025_v40 = vrot.slane %v5024_v33, 1  ;;  %v5031_v51 = vrot.slane %v5030_v36, 1  ;;  %v9644_v15 = vld [vmem:[#allocation10 + $0x4b8] sm:$0xf] }
 0x422   : > { %v5034_v17 = vadd.f32 %v5033_v37, %v5019_v31  ;;  %v5040_v2 = vadd.f32 %v5039_v38, %v5020_v32  ;;  %v10558_v31 = vld [vmem:[#allocation10 + $0x58c] sm:$0xf0]  ;;  %v9116_v32 = vld [vmem:[#allocation10 + $0x98] sm:$0xf]  ;;  %v9549_v38 = vor.u32 %v10510_v28, %v9548_v18  ;;  %v10465_v28 = vld [vmem:[#allocation10 + $0x2ac] sm:$0xf] }
 0x423   : > { %v5026_v16 = vadd.f32 %v5025_v40, %v5024_v33  ;;  %v5032_v52 = vadd.f32 %v5031_v51, %v5030_v36  ;;  %v10402_v33 = vld [vmem:[#allocation10 + $0xac] sm:$0xf0]  ;;  %v9308_v36 = vld [vmem:[#allocation10 + $0x218] sm:$0xf]  ;;  %v9741_v39 = vor.u32 %v10558_v31, %v9740_v29  ;;  %v10504_v40 = vld [vmem:[#allocation10 + $0x3dc] sm:$0xf0]  ;;  %v9453_v29 = vor.u32 %v10486_v14, %v9452_v62 }
 0x424   : > { %v5035_v5 = vrot.slane %v5034_v17, 2  ;;  %v5041_v53 = vrot.slane %v5040_v2, 2  ;;  %v10450_v37 = vld [vmem:[#allocation10 + $0x22c] sm:$0xf0]  ;;  %v9716_v51 = vld [vmem:[#allocation10 + $0x548] sm:$0xf]  ;;  %v9117_v9 = vor.u32 %v10402_v33, %v9116_v32  ;;  %v9645_v31 = vor.u32 %v10534_v19, %v9644_v15 }
 0x425   : > { %v11380_v35 = vpack.c.bf16 %v5026_v16, %v5026_v16  ;;  %v11382_v4 = vpack.c.bf16 %v5032_v52, %v5032_v52  ;;  %v10396_v16 = vld [vmem:[#allocation10 + $0x7c] sm:$0xf0]  ;;  %v9284_v52 = vld [vmem:[#allocation10 + $0x1e8] sm:$0xf]  ;;  %v9382_v32 = vld [vmem:[#allocation10 + $0x2c0] sm:$0xf0] }
 0x426   : > { %v5036_v45 = vadd.f32 %v5035_v5, %v5034_v17  ;;  %v5042_v46 = vadd.f32 %v5041_v53, %v5040_v2  ;;  %v9309_v17 = vor.u32 %v10450_v37, %v9308_v36  ;;  %v9092_v2 = vld [vmem:[#allocation10 + $0x68] sm:$0xf]  ;;  %v10444_v5 = vld [vmem:[#allocation10 + $0x1fc] sm:$0xf0]  ;;  %v9525_v53 = vor.u32 %v10504_v40, %v9524_v54  ;;  %v9598_v54 = vld [vmem:[#allocation10 + $0x470] sm:$0xf0] }
 0x427   : > { %6223 = vmatmul.bf16.vlgmr.msra.gmra.mxu0 %v11380_v35  ;;  %6236 = vmatmul.bf16.vlgmr.msra.gmra.mxu1 %v11382_v4  ;;  %v9093_v44 = vor.u32 %v10396_v16, %v9092_v2  ;;  %v9428_v33 = vld [vmem:[#allocation10 + $0x308] sm:$0xf]  ;;  %v10480_v36 = vld [vmem:[#allocation10 + $0x31c] sm:$0xf0]  ;;  %v10567_v40 = vld [vmem:[#allocation10 + $0x5dc] sm:$0xf] }
 0x428   : > { %v5037_v49 = vrot.slane %v5036_v45, 1  ;;  %v5043_v56 = vrot.slane %v5042_v46, 1  ;;  %6319 = vmatpush.bf16.msra.mxu0 %v9213_v42  ;;  %6332 = vmatpush.bf16.msra.mxu1 %v9405_v13  ;;  %v9717_v42 = vor.u32 %v10552_v34, %v9716_v51  ;;  %v9500_v13 = vld [vmem:[#allocation10 + $0x398] sm:$0xf]  ;;  %v9620_v37 = vld [vmem:[#allocation10 + $0x488] sm:$0xf]  ;;  %v9429_v2 = vor.u32 %v10480_v36, %v9428_v33 }
 0x429   : > { %v9501_v22 = vor.u32 %v10498_v57, %v9500_v13  ;;  %v9790_v51 = vld [vmem:[#allocation10 + $0x5f0] sm:$0xf0]  ;;  %v10513_v57 = vld [vmem:[#allocation10 + $0x42c] sm:$0xf]  ;;  %v9718_v62 = vld [vmem:[#allocation10 + $0x560] sm:$0xf0] }
 0x42a   : > { %v5038_v60 = vadd.f32 %v5037_v49, %v5036_v45  ;;  %v5044_v7 = vadd.f32 %v5043_v56, %v5042_v46  ;;  %v9285_v45 = vor.u32 %v10444_v5, %v9284_v52  ;;  %v9068_v46 = vld [vmem:[#allocation10 + $0x38] sm:$0xf]  ;;  %v9693_v49 = vor.u32 %v10546_v43, %v9692_v1  ;;  %v9476_v56 = vld [vmem:[#allocation10 + $0x368] sm:$0xf]  ;;  %v9166_v52 = vld [vmem:[#allocation10 + $0x110] sm:$0xf0] }
 0x42b   : > { %v9069_v0 = vor.u32 %v10390_v47, %v9068_v46  ;;  %v10459_v5 = vld [vmem:[#allocation10 + $0x27c] sm:$0xf]  ;;  %v9793_v13 = vor.u32 %v10567_v40, %v9790_v51  ;;  %v9574_v1 = vld [vmem:[#allocation10 + $0x440] sm:$0xf0]  ;;  %v10561_v43 = vld [vmem:[#allocation10 + $0x5ac] sm:$0xf] }
 0x42c   : > { %v11386_v10 = vpack.c.bf16 %v5038_v60, %v5038_v60  ;;  %v11388_v11 = vpack.c.bf16 %v5044_v7, %v5044_v7  ;;  %6320 = vmatpush.bf16.msra.mxu0 %v9189_v58  ;;  %6333 = vmatpush.bf16.msra.mxu1 %v9381_v55  ;;  %v10492_v58 = vld [vmem:[#allocation10 + $0x37c] sm:$0xf0]  ;;  %v9668_v55 = vld [vmem:[#allocation10 + $0x4e8] sm:$0xf]  ;;  %v10405_v47 = vld [vmem:[#allocation10 + $0xcc] sm:$0xf] }
 0x42d   : > { %v10384_v60 = vld [vmem:[#allocation10 + $0x1c] sm:$0xf0]  ;;  %v9236_v7 = vld [vmem:[#allocation10 + $0x188] sm:$0xf]  ;;  %v9477_v8 = vor.u32 %v10492_v58, %v9476_v56  ;;  %v9669_v61 = vor.u32 %v10540_v59, %v9668_v55  ;;  %v10507_v58 = vld [vmem:[#allocation10 + $0x3fc] sm:$0xf] }
 0x42e   : > { %6249 = vmatmul.bf16.vlgmr.msra.gmra.mxu2 %v11386_v10  ;;  %6262 = vmatmul.bf16.vlgmr.msra.gmra.mxu3 %v11388_v11  ;;  %v9045_v21 = vor.u32 %v10384_v60, %v9044_v41  ;;  %v9550_v55 = vld [vmem:[#allocation10 + $0x410] sm:$0xf0]  ;;  %v10555_v59 = vld [vmem:[#allocation10 + $0x57c] sm:$0xf]  ;;  %v10393_v19 = vld [vmem:[#allocation10 + $0x6c] sm:$0xf] }
 0x42f   : > { %6345 = vmatpush.bf16.msra.mxu2 %v9597_v63  ;;  %6358 = vmatpush.bf16.msra.mxu3 %v9789_v3  ;;  %v10432_v63 = vld [vmem:[#allocation10 + $0x19c] sm:$0xf0]  ;;  %v10423_v3 = vld [vmem:[#allocation10 + $0x15c] sm:$0xf]  ;;  %v10489_v51 = vld [vmem:[#allocation10 + $0x36c] sm:$0xf] }
 0x430   : > { %6321 = vmatpush.bf16.msra.mxu0 %v9165_v6  ;;  %6334 = vmatpush.bf16.msra.mxu1 %v9357_v50  ;;  %v9214_v6 = vld [vmem:[#allocation10 + $0x170] sm:$0xf0]  ;;  %v10471_v50 = vld [vmem:[#allocation10 + $0x2dc] sm:$0xf] }
 0x431   : > { %v9409_v18 = vor.u32 %v10471_v50, %v9406_v12  ;;  %v10399_v60 = vld [vmem:[#allocation10 + $0x9c] sm:$0xf]  ;;  %v9526_v50 = vld [vmem:[#allocation10 + $0x3e0] sm:$0xf0]  ;;  %v10549_v12 = vld [vmem:[#allocation10 + $0x54c] sm:$0xf] }
 0x432   : > { %v10387_v36 = vld [vmem:[#allocation10 + $0x3c] sm:$0xf] }
 0x433   : > { %6346 = vmatpush.bf16.msra.mxu2 %v9573_v23  ;;  %6359 = vmatpush.bf16.msra.mxu3 %v9765_v24  ;;  %v9237_v23 = vor.u32 %v10432_v63, %v9236_v7  ;;  %v9217_v24 = vor.u32 %v10423_v3, %v9214_v6  ;;  %v9118_v7 = vld [vmem:[#allocation10 + $0xb0] sm:$0xf0]  ;;  %v10447_v63 = vld [vmem:[#allocation10 + $0x21c] sm:$0xf]  ;;  %v9553_v6 = vor.u32 %v10507_v58, %v9550_v55  ;;  %v9196_v55 = vld [vmem:[#allocation10 + $0x130] sm:$0xf] }
 0x434   : > { %6322 = vmatpush.bf16.msra.mxu0 %v9141_v26  ;;  %6335 = vmatpush.bf16.msra.mxu1 %v9333_v27  ;;  %v10417_v26 = vld [vmem:[#allocation10 + $0x12c] sm:$0xf]  ;;  %v9190_v27 = vld [vmem:[#allocation10 + $0x140] sm:$0xf0]  ;;  %v9310_v3 = vld [vmem:[#allocation10 + $0x230] sm:$0xf0]  ;;  %v9121_v14 = vor.u32 %v10399_v60, %v9118_v7 }
 0x435   : > { %v9193_v34 = vor.u32 %v10417_v26, %v9190_v27  ;;  %v9313_v15 = vor.u32 %v10447_v63, %v9310_v3  ;;  %v9721_v26 = vor.u32 %v10549_v12, %v9718_v62  ;;  %v10495_v27 = vld [vmem:[#allocation10 + $0x39c] sm:$0xf]  ;;  %v10469_v60 = vld [vmem:[#allocation10 + $0x2c4] sm:$0xf0]  ;;  %v10477_v7 = vld [vmem:[#allocation10 + $0x30c] sm:$0xf] }
 0x436   : > { %v9430_v63 = vld [vmem:[#allocation10 + $0x320] sm:$0xf0]  ;;  %v10525_v3 = vld [vmem:[#allocation10 + $0x48c] sm:$0xf]  ;;  %v10571_v12 = vld [vmem:[#allocation10 + $0x5f4] sm:$0xf0] }
 0x437   : > { %6347 = vmatpush.bf16.msra.mxu2 %v9549_v38  ;;  %6360 = vmatpush.bf16.msra.mxu3 %v9741_v39  ;;  %v10528_v38 = vld [vmem:[#allocation10 + $0x49c] sm:$0xf0]  ;;  %v10519_v39 = vld [vmem:[#allocation10 + $0x45c] sm:$0xf] }
 0x438   : > { %6275 = vmatmul.bf16.vlgmr.msrb.gmra.mxu0 %v11380_v35  ;;  %6288 = vmatmul.bf16.vlgmr.msrb.gmra.mxu1 %v11382_v4  ;;  %v9621_v16 = vor.u32 %v10528_v38, %v9620_v37  ;;  %v9070_v37 = vld [vmem:[#allocation10 + $0x50] sm:$0xf0]  ;;  %v10435_v38 = vld [vmem:[#allocation10 + $0x1bc] sm:$0xf] }
 0x439   : > { %6323 = vmatpush.bf16.msra.mxu0 %v9117_v9  ;;  %6336 = vmatpush.bf16.msra.mxu1 %v9309_v17  ;;  %v9385_v9 = vor.u32 %v10465_v28, %v9382_v32  ;;  %v10411_v17 = vld [vmem:[#allocation10 + $0xfc] sm:$0xf]  ;;  %v9502_v28 = vld [vmem:[#allocation10 + $0x3b0] sm:$0xf0] }
 0x43b   : > { %6348 = vmatpush.bf16.msra.mxu2 %v9525_v53  ;;  %6361 = vmatpush.bf16.msra.mxu3 %v9717_v42  ;;  %v9358_v53 = vld [vmem:[#allocation10 + $0x290] sm:$0xf0]  ;;  %v9601_v42 = vor.u32 %v10519_v39, %v9598_v54  ;;  %v9505_v54 = vor.u32 %v10495_v27, %v9502_v28  ;;  %v10463_v27 = vld [vmem:[#allocation10 + $0x294] sm:$0xf0]  ;;  %v9580_v28 = vld [vmem:[#allocation10 + $0x430] sm:$0xf] }
 0x43c   : > { %v9361_v46 = vor.u32 %v10459_v5, %v9358_v53  ;;  %v9262_v39 = vld [vmem:[#allocation10 + $0x1d0] sm:$0xf0]  ;;  %v9046_v5 = vld [vmem:[#allocation10 + $0x20] sm:$0xf0]  ;;  %v10429_v53 = vld [vmem:[#allocation10 + $0x18c] sm:$0xf] }
 0x43d   : > { %6324 = vmatpush.bf16.msra.mxu0 %v9093_v44  ;;  %6337 = vmatpush.bf16.msra.mxu1 %v9285_v45  ;;  %v9766_v44 = vld [vmem:[#allocation10 + $0x5c0] sm:$0xf0]  ;;  %v9169_v45 = vor.u32 %v10411_v17, %v9166_v52  ;;  %v10381_v52 = vld [vmem:[#allocation10 + $0xc] sm:$0xf] }
 0x43e   : > { %6301 = vmatmul.bf16.vlgmr.msrb.gmra.mxu2 %v11386_v10  ;;  %6314 = vmatmul.bf16.vlgmr.msrb.gmra.mxu3 %v11388_v11  ;;  %v9769_v56 = vor.u32 %v10561_v43, %v9766_v44  ;;  %v9670_v17 = vld [vmem:[#allocation10 + $0x500] sm:$0xf0]  ;;  %v9412_v44 = vld [vmem:[#allocation10 + $0x2e0] sm:$0xf] }
 0x43f   : > { %6349 = vmatpush.bf16.msra.mxu2 %v9501_v22  ;;  %6362 = vmatpush.bf16.msra.mxu3 %v9693_v49  ;;  %v9334_v22 = vld [vmem:[#allocation10 + $0x260] sm:$0xf0]  ;;  %v9577_v49 = vor.u32 %v10513_v57, %v9574_v1  ;;  %v10427_v57 = vld [vmem:[#allocation10 + $0x174] sm:$0xf0] }
 0x440   : > { %v9337_v41 = vor.u32 %v10453_v20, %v9334_v22  ;;  %v9646_v20 = vld [vmem:[#allocation10 + $0x4d0] sm:$0xf0]  ;;  %v9049_v22 = vor.u32 %v10381_v52, %v9046_v5  ;;  %v9124_v5 = vld [vmem:[#allocation10 + $0xa0] sm:$0xf] }
 0x441   : > { %6325 = vmatpush.bf16.msra.mxu0 %v9069_v0  ;;  %6338 = vmatpush.bf16.msra.mxu1 %v9261_v30  ;;  %v9742_v0 = vld [vmem:[#allocation10 + $0x590] sm:$0xf0]  ;;  %v9145_v30 = vor.u32 %v10405_v47, %v9142_v48  ;;  %v10531_v48 = vld [vmem:[#allocation10 + $0x4bc] sm:$0xf] }
 0x442   : > { %v9454_v47 = vld [vmem:[#allocation10 + $0x350] sm:$0xf0] }
 0x443   : > { %6350 = vmatpush.bf16.msra.mxu2 %v9477_v8  ;;  %6363 = vmatpush.bf16.msra.mxu3 %v9669_v61  ;;  %v9745_v8 = vor.u32 %v10555_v59, %v9742_v0  ;;  %v10501_v61 = vld [vmem:[#allocation10 + $0x3cc] sm:$0xf]  ;;  %v10421_v59 = vld [vmem:[#allocation10 + $0x144] sm:$0xf0]  ;;  %v9388_v0 = vld [vmem:[#allocation10 + $0x2b0] sm:$0xf] }
 0x444   : > { %v9197_v62 = vor.u32 %v10421_v59, %v9196_v55  ;;  %v10445_v55 = vld [vmem:[#allocation10 + $0x204] sm:$0xf0]  ;;  %v9508_v59 = vld [vmem:[#allocation10 + $0x3a0] sm:$0xf] }
 0x445   : > { %6326 = vmatpush.bf16.msra.mxu0 %v9045_v21  ;;  %6339 = vmatpush.bf16.msra.mxu1 %v9237_v23  ;;  %v9094_v21 = vld [vmem:[#allocation10 + $0x80] sm:$0xf0]  ;;  %v10441_v23 = vld [vmem:[#allocation10 + $0x1ec] sm:$0xf] }
 0x446   : > { %v9097_v32 = vor.u32 %v10393_v19, %v9094_v21  ;;  %v9172_v21 = vld [vmem:[#allocation10 + $0x100] sm:$0xf] }
 0x447   : > { %6351 = vmatpush.bf16.msra.mxu2 %v9453_v29  ;;  %6364 = vmatpush.bf16.msra.mxu3 %v9645_v31  ;;  %v10543_v29 = vld [vmem:[#allocation10 + $0x51c] sm:$0xf]  ;;  %v9694_v31 = vld [vmem:[#allocation10 + $0x530] sm:$0xf0] }
 0x448   : > { %6327 = vmatmul.bf16.vlgmr.msra.gmra.mxu0 %v11380_v35  ;;  %6340 = vmatmul.bf16.vlgmr.msra.gmra.mxu1 %v11382_v4  ;;  %v9697_v40 = vor.u32 %v10543_v29, %v9694_v31  ;;  %v10517_v29 = vld [vmem:[#allocation10 + $0x444] sm:$0xf0]  ;;  %v9772_v31 = vld [vmem:[#allocation10 + $0x5b0] sm:$0xf] }
 0x449   : > { %6371 = vmatpush.bf16.msrb.mxu0 %v9217_v24  ;;  %6384 = vmatpush.bf16.msrb.mxu1 %v9409_v18  ;;  %v9286_v24 = vld [vmem:[#allocation10 + $0x200] sm:$0xf0]  ;;  %v9529_v18 = vor.u32 %v10501_v61, %v9526_v50  ;;  %v10523_v61 = vld [vmem:[#allocation10 + $0x474] sm:$0xf0]  ;;  %v9796_v50 = vld [vmem:[#allocation10 + $0x5e0] sm:$0xf] }
 0x44a   : > { %v9289_v33 = vor.u32 %v10441_v23, %v9286_v24  ;;  %v10415_v23 = vld [vmem:[#allocation10 + $0x114] sm:$0xf0] }
 0x44b   : > { %6352 = vmatpush.bf16.msra.mxu2 %v9429_v2  ;;  %6365 = vmatpush.bf16.msra.mxu3 %v9621_v16  ;;  %v9073_v2 = vor.u32 %v10387_v36, %v9070_v37  ;;  %v9265_v16 = vor.u32 %v10435_v38, %v9262_v39  ;;  %v9148_v37 = vld [vmem:[#allocation10 + $0xd0] sm:$0xf]  ;;  %v10409_v38 = vld [vmem:[#allocation10 + $0xe4] sm:$0xf0]  ;;  %v9581_v39 = vor.u32 %v10517_v29, %v9580_v28  ;;  %v10424_v29 = vld [vmem:[#allocation10 + $0x164] sm:$0xf] }
 0x44c   : > { %v10433_v28 = vld [vmem:[#allocation10 + $0x1a4] sm:$0xf0] }
 0x44d   : > { %6372 = vmatpush.bf16.msrb.mxu0 %v9193_v34  ;;  %6385 = vmatpush.bf16.msrb.mxu1 %v9385_v9  ;;  %v9478_v34 = vld [vmem:[#allocation10 + $0x380] sm:$0xf0]  ;;  %v10537_v9 = vld [vmem:[#allocation10 + $0x4ec] sm:$0xf] }
 0x44e   : > { %6353 = vmatmul.bf16.vlgmr.msra.gmra.mxu2 %v11386_v10  ;;  %6366 = vmatmul.bf16.vlgmr.msra.gmra.mxu3 %v11388_v11  ;;  %v9481_v1 = vor.u32 %v10489_v51, %v9478_v34  ;;  %v9673_v43 = vor.u32 %v10537_v9, %v9670_v17  ;;  %v10457_v51 = vld [vmem:[#allocation10 + $0x264] sm:$0xf0]  ;;  %v9556_v34 = vld [vmem:[#allocation10 + $0x400] sm:$0xf]  ;;  %v10511_v9 = vld [vmem:[#allocation10 + $0x414] sm:$0xf0] }
 0x44f   : > { %6397 = vmatpush.bf16.msrb.mxu2 %v9601_v42  ;;  %6410 = vmatpush.bf16.msrb.mxu3 %v9793_v13  ;;  %v9238_v42 = vld [vmem:[#allocation10 + $0x1a0] sm:$0xf0]  ;;  %v9220_v13 = vld [vmem:[#allocation10 + $0x160] sm:$0xf] }
 0x450   : > { %v9748_v17 = vld [vmem:[#allocation10 + $0x580] sm:$0xf] }
 0x451   : > { %6373 = vmatpush.bf16.msrb.mxu0 %v9169_v45  ;;  %6386 = vmatpush.bf16.msrb.mxu1 %v9361_v46  ;;  %v10475_v45 = vld [vmem:[#allocation10 + $0x2f4] sm:$0xf0]  ;;  %v10483_v46 = vld [vmem:[#allocation10 + $0x33c] sm:$0xf] }
 0x452   : > { %v9413_v58 = vor.u32 %v10475_v45, %v9412_v44  ;;  %v10505_v44 = vld [vmem:[#allocation10 + $0x3e4] sm:$0xf0]  ;;  %v9724_v45 = vld [vmem:[#allocation10 + $0x550] sm:$0xf] }
 0x453   : > { %6398 = vmatpush.bf16.msrb.mxu2 %v9577_v49  ;;  %6411 = vmatpush.bf16.msrb.mxu3 %v9769_v56  ;;  %v9241_v49 = vor.u32 %v10429_v53, %v9238_v42  ;;  %v9221_v56 = vor.u32 %v10427_v57, %v9220_v13  ;;  %v10403_v53 = vld [vmem:[#allocation10 + $0xb4] sm:$0xf0]  ;;  %v9557_v42 = vor.u32 %v10511_v9, %v9556_v34  ;;  %v9316_v57 = vld [vmem:[#allocation10 + $0x220] sm:$0xf]  ;;  %v10418_v9 = vld [vmem:[#allocation10 + $0x134] sm:$0xf] }
 0x455   : > { %6374 = vmatpush.bf16.msrb.mxu0 %v9145_v30  ;;  %6387 = vmatpush.bf16.msrb.mxu1 %v9337_v41  ;;  %v9457_v30 = vor.u32 %v10483_v46, %v9454_v47  ;;  %v9649_v41 = vor.u32 %v10531_v48, %v9646_v20  ;;  %v10553_v46 = vld [vmem:[#allocation10 + $0x564] sm:$0xf0]  ;;  %v9125_v47 = vor.u32 %v10403_v53, %v9124_v5  ;;  %v9100_v20 = vld [vmem:[#allocation10 + $0x70] sm:$0xf]  ;;  %v9390_v5 = vld [vmem:[#allocation10 + $0x2c8] sm:$0xf0] }
 0x456   : > { %v9436_v53 = vld [vmem:[#allocation10 + $0x310] sm:$0xf] }
 0x457   : > { %6399 = vmatpush.bf16.msrb.mxu2 %v9553_v6  ;;  %6412 = vmatpush.bf16.msrb.mxu3 %v9745_v8  ;;  %v9622_v6 = vld [vmem:[#allocation10 + $0x4a0] sm:$0xf0]  ;;  %v9604_v8 = vld [vmem:[#allocation10 + $0x460] sm:$0xf] }
 0x458   : > { %v9625_v19 = vor.u32 %v10525_v3, %v9622_v6  ;;  %v9605_v24 = vor.u32 %v10523_v61, %v9604_v8  ;;  %v10391_v3 = vld [vmem:[#allocation10 + $0x54] sm:$0xf0]  ;;  %v9268_v61 = vld [vmem:[#allocation10 + $0x1c0] sm:$0xf] }
 0x459   : > { %6375 = vmatpush.bf16.msrb.mxu0 %v9121_v14  ;;  %6388 = vmatpush.bf16.msrb.mxu1 %v9313_v15  ;;  %v9389_v14 = vor.u32 %v10469_v60, %v9388_v0  ;;  %v9433_v15 = vor.u32 %v10477_v7, %v9430_v63  ;;  %v10499_v0 = vld [vmem:[#allocation10 + $0x3b4] sm:$0xf0]  ;;  %v9076_v63 = vld [vmem:[#allocation10 + $0x40] sm:$0xf] }
 0x45a   : > { %v9509_v6 = vor.u32 %v10499_v0, %v9508_v59  ;;  %v9366_v59 = vld [vmem:[#allocation10 + $0x298] sm:$0xf0]  ;;  %v10514_v0 = vld [vmem:[#allocation10 + $0x434] sm:$0xf] }
 0x45b   : > { %6400 = vmatpush.bf16.msrb.mxu2 %v9529_v18  ;;  %6413 = vmatpush.bf16.msrb.mxu3 %v9721_v26  ;;  %v9797_v18 = vor.u32 %v10571_v12, %v9796_v50  ;;  %v9364_v26 = vld [vmem:[#allocation10 + $0x280] sm:$0xf]  ;;  %v10439_v50 = vld [vmem:[#allocation10 + $0x1d4] sm:$0xf0]  ;;  %v9484_v12 = vld [vmem:[#allocation10 + $0x370] sm:$0xf] }
 0x45c   : > { %v9365_v36 = vor.u32 %v10463_v27, %v9364_v26 }
 0x45d   : > { %6376 = vmatpush.bf16.msrb.mxu0 %v9097_v32  ;;  %6389 = vmatpush.bf16.msrb.mxu1 %v9289_v33  ;;  %v10565_v32 = vld [vmem:[#allocation10 + $0x5c4] sm:$0xf0]  ;;  %v9173_v33 = vor.u32 %v10415_v23, %v9172_v21  ;;  %v9269_v21 = vor.u32 %v10439_v50, %v9268_v61  ;;  %v9052_v23 = vld [vmem:[#allocation10 + $0x10] sm:$0xf]  ;;  %v10454_v50 = vld [vmem:[#allocation10 + $0x254] sm:$0xf] }
 0x45f   : > { %6401 = vmatpush.bf16.msrb.mxu2 %v9505_v54  ;;  %6414 = vmatpush.bf16.msrb.mxu3 %v9697_v40  ;;  %v9773_v54 = vor.u32 %v10565_v32, %v9772_v31  ;;  %v9340_v40 = vld [vmem:[#allocation10 + $0x250] sm:$0xf]  ;;  %v9222_v31 = vld [vmem:[#allocation10 + $0x178] sm:$0xf0]  ;;  %v10472_v32 = vld [vmem:[#allocation10 + $0x2e4] sm:$0xf] }
 0x460   : > { %v9341_v52 = vor.u32 %v10457_v51, %v9340_v40  ;;  %v9225_v51 = vor.u32 %v10424_v29, %v9222_v31  ;;  %v9318_v29 = vld [vmem:[#allocation10 + $0x238] sm:$0xf0]  ;;  %v10502_v31 = vld [vmem:[#allocation10 + $0x3d4] sm:$0xf] }
 0x461   : > { %6377 = vmatpush.bf16.msrb.mxu0 %v9073_v2  ;;  %6390 = vmatpush.bf16.msrb.mxu1 %v9265_v16  ;;  %v10559_v2 = vld [vmem:[#allocation10 + $0x594] sm:$0xf0]  ;;  %v9149_v16 = vor.u32 %v10409_v38, %v9148_v37  ;;  %v9652_v38 = vld [vmem:[#allocation10 + $0x4c0] sm:$0xf] }
 0x462   : > { %v9749_v13 = vor.u32 %v10559_v2, %v9748_v17  ;;  %v10487_v37 = vld [vmem:[#allocation10 + $0x354] sm:$0xf0]  ;;  %v9198_v17 = vld [vmem:[#allocation10 + $0x148] sm:$0xf0]  ;;  %v10466_v2 = vld [vmem:[#allocation10 + $0x2b4] sm:$0xf] }
 0x463   : > { %6402 = vmatpush.bf16.msrb.mxu2 %v9481_v1  ;;  %6415 = vmatpush.bf16.msrb.mxu3 %v9673_v43  ;;  %v10451_v1 = vld [vmem:[#allocation10 + $0x234] sm:$0xf0]  ;;  %v9532_v43 = vld [vmem:[#allocation10 + $0x3d0] sm:$0xf] }
 0x464   : > { %v9317_v48 = vor.u32 %v10451_v1, %v9316_v57  ;;  %v10529_v57 = vld [vmem:[#allocation10 + $0x4a4] sm:$0xf0]  ;;  %v10520_v1 = vld [vmem:[#allocation10 + $0x464] sm:$0xf] }
 0x465   : > { %6378 = vmatpush.bf16.msrb.mxu0 %v9049_v22  ;;  %6391 = vmatpush.bf16.msrb.mxu1 %v9241_v49  ;;  %v10397_v22 = vld [vmem:[#allocation10 + $0x84] sm:$0xf0]  ;;  %v9533_v49 = vor.u32 %v10505_v44, %v9532_v43  ;;  %v9606_v43 = vld [vmem:[#allocation10 + $0x478] sm:$0xf0]  ;;  %v10568_v44 = vld [vmem:[#allocation10 + $0x5e4] sm:$0xf] }
 0x466   : > { %v9101_v60 = vor.u32 %v10397_v22, %v9100_v20  ;;  %v10412_v22 = vld [vmem:[#allocation10 + $0x104] sm:$0xf] }
 0x467   : > { %6403 = vmatpush.bf16.msrb.mxu2 %v9457_v30  ;;  %6416 = vmatpush.bf16.msrb.mxu3 %v9649_v41  ;;  %v9700_v30 = vld [vmem:[#allocation10 + $0x520] sm:$0xf]  ;;  %v10547_v41 = vld [vmem:[#allocation10 + $0x534] sm:$0xf0] }
 0x468   : > { %6379 = vmatmul.bf16.vlgmr.msrb.gmra.mxu0 %v11380_v35  ;;  %6392 = vmatmul.bf16.vlgmr.msrb.gmra.mxu1 %v11382_v4  ;;  %v9701_v8 = vor.u32 %v10547_v41, %v9700_v30  ;;  %v9582_v30 = vld [vmem:[#allocation10 + $0x448] sm:$0xf0]  ;;  %v10562_v41 = vld [vmem:[#allocation10 + $0x5b4] sm:$0xf] }
 0x469   : > { %6423 = vmatpush.bf16.msra.mxu0 %v9221_v56  ;;  %6436 = vmatpush.bf16.msra.mxu1 %v9413_v58  ;;  %v9725_v56 = vor.u32 %v10553_v46, %v9724_v45  ;;  %v9292_v58 = vld [vmem:[#allocation10 + $0x1f0] sm:$0xf]  ;;  %v9798_v45 = vld [vmem:[#allocation10 + $0x5f8] sm:$0xf0]  ;;  %v9201_v46 = vor.u32 %v10418_v9, %v9198_v17  ;;  %v9294_v9 = vld [vmem:[#allocation10 + $0x208] sm:$0xf0] }
 0x46a   : > { %v9293_v7 = vor.u32 %v10445_v55, %v9292_v58  ;;  %v9801_v58 = vor.u32 %v10568_v44, %v9798_v45  ;;  %v10460_v55 = vld [vmem:[#allocation10 + $0x284] sm:$0xf]  ;;  %v9270_v44 = vld [vmem:[#allocation10 + $0x1d8] sm:$0xf0]  ;;  %v10490_v45 = vld [vmem:[#allocation10 + $0x374] sm:$0xf] }
 0x46b   : > { %6404 = vmatpush.bf16.msrb.mxu2 %v9433_v15  ;;  %6417 = vmatpush.bf16.msrb.mxu3 %v9625_v19  ;;  %v10541_v15 = vld [vmem:[#allocation10 + $0x504] sm:$0xf0]  ;;  %v9077_v19 = vor.u32 %v10391_v3, %v9076_v63  ;;  %v9369_v63 = vor.u32 %v10460_v55, %v9366_v59  ;;  %v10406_v3 = vld [vmem:[#allocation10 + $0xd4] sm:$0xf]  ;;  %v10496_v17 = vld [vmem:[#allocation10 + $0x3a4] sm:$0xf] }
 0x46c   : > { %v10430_v59 = vld [vmem:[#allocation10 + $0x194] sm:$0xf] }
 0x46d   : > { %6424 = vmatpush.bf16.msra.mxu0 %v9197_v62  ;;  %6437 = vmatpush.bf16.msra.mxu1 %v9389_v14  ;;  %v10493_v62 = vld [vmem:[#allocation10 + $0x384] sm:$0xf0]  ;;  %v9676_v14 = vld [vmem:[#allocation10 + $0x4f0] sm:$0xf] }
 0x46e   : > { %6405 = vmatmul.bf16.vlgmr.msrb.gmra.mxu2 %v11386_v10  ;;  %6418 = vmatmul.bf16.vlgmr.msrb.gmra.mxu3 %v11388_v11  ;;  %v9485_v26 = vor.u32 %v10493_v62, %v9484_v12  ;;  %v9677_v27 = vor.u32 %v10541_v15, %v9676_v14  ;;  %v9342_v12 = vld [vmem:[#allocation10 + $0x268] sm:$0xf0]  ;;  %v10508_v62 = vld [vmem:[#allocation10 + $0x404] sm:$0xf]  ;;  %v9558_v14 = vld [vmem:[#allocation10 + $0x418] sm:$0xf0] }
 0x46f   : > { %6449 = vmatpush.bf16.msra.mxu2 %v9605_v24  ;;  %6462 = vmatpush.bf16.msra.mxu3 %v9797_v18  ;;  %v10385_v24 = vld [vmem:[#allocation10 + $0x24] sm:$0xf0]  ;;  %v9244_v18 = vld [vmem:[#allocation10 + $0x190] sm:$0xf]  ;;  %v10556_v15 = vld [vmem:[#allocation10 + $0x584] sm:$0xf] }
 0x470   : > { %v9245_v40 = vor.u32 %v10433_v28, %v9244_v18  ;;  %v9126_v18 = vld [vmem:[#allocation10 + $0xb8] sm:$0xf0]  ;;  %v10448_v28 = vld [vmem:[#allocation10 + $0x224] sm:$0xf] }
 0x471   : > { %6425 = vmatpush.bf16.msra.mxu0 %v9173_v33  ;;  %6438 = vmatpush.bf16.msra.mxu1 %v9365_v36  ;;  %v9414_v33 = vld [vmem:[#allocation10 + $0x2f8] sm:$0xf0]  ;;  %v9460_v36 = vld [vmem:[#allocation10 + $0x340] sm:$0xf] }
 0x472   : > { %v9417_v34 = vor.u32 %v10472_v32, %v9414_v33  ;;  %v9534_v32 = vld [vmem:[#allocation10 + $0x3e8] sm:$0xf0]  ;;  %v10550_v33 = vld [vmem:[#allocation10 + $0x554] sm:$0xf] }
 0x473   : > { %6450 = vmatpush.bf16.msra.mxu2 %v9581_v39  ;;  %6463 = vmatpush.bf16.msra.mxu3 %v9773_v54  ;;  %v10535_v39 = vld [vmem:[#allocation10 + $0x4d4] sm:$0xf0]  ;;  %v9053_v54 = vor.u32 %v10385_v24, %v9052_v23  ;;  %v9345_v23 = vor.u32 %v10454_v50, %v9342_v12  ;;  %v10400_v24 = vld [vmem:[#allocation10 + $0xa4] sm:$0xf]  ;;  %v9438_v50 = vld [vmem:[#allocation10 + $0x328] sm:$0xf0] }
 0x474   : > { %v10526_v12 = vld [vmem:[#allocation10 + $0x494] sm:$0xf] }
 0x475   : > { %6426 = vmatpush.bf16.msra.mxu0 %v9149_v16  ;;  %6439 = vmatpush.bf16.msra.mxu1 %v9341_v52  ;;  %v9461_v16 = vor.u32 %v10487_v37, %v9460_v36  ;;  %v9653_v52 = vor.u32 %v10535_v39, %v9652_v38  ;;  %v9726_v36 = vld [vmem:[#allocation10 + $0x568] sm:$0xf0]  ;;  %v9129_v37 = vor.u32 %v10400_v24, %v9126_v18  ;;  %v10394_v39 = vld [vmem:[#allocation10 + $0x74] sm:$0xf] }
 0x476   : > { %v9321_v38 = vor.u32 %v10448_v28, %v9318_v29 }
 0x477   : > { %6451 = vmatpush.bf16.msra.mxu2 %v9557_v42  ;;  %6464 = vmatpush.bf16.msra.mxu3 %v9749_v13  ;;  %v10481_v42 = vld [vmem:[#allocation10 + $0x324] sm:$0xf0]  ;;  %v9628_v13 = vld [vmem:[#allocation10 + $0x490] sm:$0xf] }
 0x478   : > { %v9629_v20 = vor.u32 %v10529_v57, %v9628_v13  ;;  %v9078_v13 = vld [vmem:[#allocation10 + $0x58] sm:$0xf0] }
 0x479   : > { %6427 = vmatpush.bf16.msra.mxu0 %v9125_v47  ;;  %6440 = vmatpush.bf16.msra.mxu1 %v9317_v48  ;;  %v9393_v47 = vor.u32 %v10466_v2, %v9390_v5  ;;  %v9437_v48 = vor.u32 %v10481_v42, %v9436_v53  ;;  %v9510_v2 = vld [vmem:[#allocation10 + $0x3b8] sm:$0xf0]  ;;  %v10388_v42 = vld [vmem:[#allocation10 + $0x44] sm:$0xf] }
 0x47a   : > { %v9513_v57 = vor.u32 %v10496_v17, %v9510_v2 }
 0x47b   : > { %6452 = vmatpush.bf16.msra.mxu2 %v9533_v49  ;;  %6465 = vmatpush.bf16.msra.mxu3 %v9725_v56  ;;  %v9174_v49 = vld [vmem:[#allocation10 + $0x118] sm:$0xf0]  ;;  %v9609_v56 = vor.u32 %v10520_v1, %v9606_v43  ;;  %v10436_v43 = vld [vmem:[#allocation10 + $0x1c4] sm:$0xf] }
 0x47d   : > { %6428 = vmatpush.bf16.msra.mxu0 %v9101_v60  ;;  %6441 = vmatpush.bf16.msra.mxu1 %v9293_v7  ;;  %v9774_v60 = vld [vmem:[#allocation10 + $0x5c8] sm:$0xf0]  ;;  %v9177_v7 = vor.u32 %v10412_v22, %v9174_v49  ;;  %v9273_v22 = vor.u32 %v10436_v43, %v9270_v44  ;;  %v10382_v49 = vld [vmem:[#allocation10 + $0x14] sm:$0xf] }
 0x47e   : > { %v9777_v61 = vor.u32 %v10562_v41, %v9774_v60  ;;  %v9462_v41 = vld [vmem:[#allocation10 + $0x358] sm:$0xf0]  ;;  %v10532_v60 = vld [vmem:[#allocation10 + $0x4c4] sm:$0xf] }
 0x47f   : > { %6453 = vmatpush.bf16.msra.mxu2 %v9509_v6  ;;  %6466 = vmatpush.bf16.msra.mxu3 %v9701_v8  ;;  %v9150_v6 = vld [vmem:[#allocation10 + $0xe8] sm:$0xf0]  ;;  %v9585_v8 = vor.u32 %v10514_v0, %v9582_v30  ;;  %v10484_v30 = vld [vmem:[#allocation10 + $0x344] sm:$0xf] }
 0x480   : > { %v9246_v0 = vld [vmem:[#allocation10 + $0x1a8] sm:$0xf0] }
 0x481   : > { %6429 = vmatpush.bf16.msra.mxu0 %v9077_v19  ;;  %6442 = vmatpush.bf16.msra.mxu1 %v9269_v21  ;;  %v9750_v19 = vld [vmem:[#allocation10 + $0x598] sm:$0xf0]  ;;  %v9153_v21 = vor.u32 %v10406_v3, %v9150_v6  ;;  %v9249_v3 = vor.u32 %v10430_v59, %v9246_v0  ;;  %v9465_v6 = vor.u32 %v10484_v30, %v9462_v41 }
 0x483   : > { %6454 = vmatpush.bf16.msra.mxu2 %v9485_v26  ;;  %6467 = vmatpush.bf16.msra.mxu3 %v9677_v27  ;;  %v9561_v26 = vor.u32 %v10508_v62, %v9558_v14  ;;  %v9753_v27 = vor.u32 %v10556_v15, %v9750_v19  ;;  %v9630_v62 = vld [vmem:[#allocation10 + $0x4a8] sm:$0xf0]  ;;  %v11408_v14 = vld [vmem:[#allocation11] sm:$0x3f] }
 0x484   : > { %v9633_v19 = vor.u32 %v10526_v12, %v9630_v62 }
 0x485   : > { %6430 = vmatpush.bf16.msra.mxu0 %v9053_v54  ;;  %6443 = vmatpush.bf16.msra.mxu1 %v9245_v40  ;;  %v9102_v54 = vld [vmem:[#allocation10 + $0x88] sm:$0xf0]  ;;  %v9537_v40 = vor.u32 %v10502_v31, %v9534_v32 }
 0x486   : > { %v9105_v5 = vor.u32 %v10394_v39, %v9102_v54 }
 0x487   : > { %6455 = vmatpush.bf16.msra.mxu2 %v9461_v16  ;;  %6468 = vmatpush.bf16.msra.mxu3 %v9653_v52  ;;  %v10544_v16 = vld [vmem:[#allocation10 + $0x524] sm:$0xf]  ;;  %v9702_v52 = vld [vmem:[#allocation10 + $0x538] sm:$0xf0] }
 0x488   : > { %6431 = vmatmul.bf16.vlgmr.msra.gmra.mxu0 %v11380_v35  ;;  %6444 = vmatmul.bf16.vlgmr.msra.gmra.mxu1 %v11382_v4  ;;  %v9705_v1 = vor.u32 %v10544_v16, %v9702_v52 }
 0x489   : > { %6475 = vmatpush.bf16.msrb.mxu0 %v9225_v51  ;;  %6488 = vmatpush.bf16.msrb.mxu1 %v9417_v34  ;;  %v9729_v51 = vor.u32 %v10550_v33, %v9726_v36  ;;  %v10442_v34 = vld [vmem:[#allocation10 + $0x1f4] sm:$0xf] }
 0x48a   : > { %v9297_v53 = vor.u32 %v10442_v34, %v9294_v9  ;;  %v6205_v9 = vperm.slane %v11408_v14, 2 }
 0x48b   : > { %6456 = vmatpush.bf16.msra.mxu2 %v9437_v48  ;;  %6469 = vmatpush.bf16.msra.mxu3 %v9629_v20  ;;  %v9678_v48 = vld [vmem:[#allocation10 + $0x508] sm:$0xf0]  ;;  %v9081_v20 = vor.u32 %v10388_v42, %v9078_v13 }
 0x48d   : > { %6476 = vmatpush.bf16.msrb.mxu0 %v9201_v46  ;;  %6489 = vmatpush.bf16.msrb.mxu1 %v9393_v47  ;;  %v9486_v46 = vld [vmem:[#allocation10 + $0x388] sm:$0xf0]  ;;  %v10538_v47 = vld [vmem:[#allocation10 + $0x4f4] sm:$0xf] }
 0x48e   : > { %6457 = vmatmul.bf16.vlgmr.msra.gmra.mxu2 %v11386_v10  ;;  %6470 = vmatmul.bf16.vlgmr.msra.gmra.mxu3 %v11388_v11  ;;  %v9681_v55 = vor.u32 %v10538_v47, %v9678_v48 }
 0x48f   : > { %6501 = vmatpush.bf16.msrb.mxu2 %v9609_v56  ;;  %6514 = vmatpush.bf16.msrb.mxu3 %v9801_v58  ;;  %v9054_v56 = vld [vmem:[#allocation10 + $0x28] sm:$0xf0]  ;;  %v9489_v58 = vor.u32 %v10490_v45, %v9486_v46 }
 0x491   : > { %6477 = vmatpush.bf16.msrb.mxu0 %v9177_v7  ;;  %6490 = vmatpush.bf16.msrb.mxu1 %v9369_v63  ;;  %v9654_v7 = vld [vmem:[#allocation10 + $0x4d8] sm:$0xf0]  ;;  %v9057_v63 = vor.u32 %v10382_v49, %v9054_v56  ;;  %v6206_v56 = vperm.slane %v11408_v14, 3 }
 0x493   : > { %6502 = vmatpush.bf16.msrb.mxu2 %v9585_v8  ;;  %6515 = vmatpush.bf16.msrb.mxu3 %v9777_v61  ;;  %v9657_v8 = vor.u32 %v10532_v60, %v9654_v7  ;;  %v10478_v61 = vld [vmem:[#allocation10 + $0x314] sm:$0xf] }
 0x494   : > { %v9441_v15 = vor.u32 %v10478_v61, %v9438_v50 }
 0x495   : > { %6478 = vmatpush.bf16.msrb.mxu0 %v9153_v21  ;;  %6491 = vmatpush.bf16.msrb.mxu1 %v9345_v23  ;;  %v6203_v21 = vperm.slane %v11408_v14, 0 }
 0x497   : > { %6503 = vmatpush.bf16.msrb.mxu2 %v9561_v26  ;;  %6516 = vmatpush.bf16.msrb.mxu3 %v9753_v27 }
 0x499   : > { %6479 = vmatpush.bf16.msrb.mxu0 %v9129_v37  ;;  %6492 = vmatpush.bf16.msrb.mxu1 %v9321_v38 }
 0x49b   : > { %6504 = vmatpush.bf16.msrb.mxu2 %v9537_v40  ;;  %6517 = vmatpush.bf16.msrb.mxu3 %v9729_v51 }
 0x49d   : > { %6480 = vmatpush.bf16.msrb.mxu0 %v9105_v5  ;;  %6493 = vmatpush.bf16.msrb.mxu1 %v9297_v53 }
 0x49f   : > { %6505 = vmatpush.bf16.msrb.mxu2 %v9513_v57  ;;  %6518 = vmatpush.bf16.msrb.mxu3 %v9705_v1 }
 0x4a1   : > { %6481 = vmatpush.bf16.msrb.mxu0 %v9081_v20  ;;  %6494 = vmatpush.bf16.msrb.mxu1 %v9273_v22 }
 0x4a3   : > { %6506 = vmatpush.bf16.msrb.mxu2 %v9489_v58  ;;  %6519 = vmatpush.bf16.msrb.mxu3 %v9681_v55 }
 0x4a4   : > { %v6224_v23 = vpop.f32.mrf.mxu0  ;;  %v6237_v24 = vpop.f32.mrf.mxu1 }
 0x4a5   : > { %6482 = vmatpush.bf16.msrb.mxu0 %v9057_v63  ;;  %6495 = vmatpush.bf16.msrb.mxu1 %v9249_v3  ;;  %v6225_v18 = vadd.f32 %v6224_v23, %v6203_v21  ;;  %v6207_v21 = vperm.slane %v11408_v14, 4 }
 0x4a7   : > { %6507 = vmatpush.bf16.msrb.mxu2 %v9465_v6  ;;  %6520 = vmatpush.bf16.msrb.mxu3 %v9657_v8  ;;  %v6238_v26 = vadd.f32 %v6237_v24, %v6225_v18 }
 0x4a8   : > { %6483 = vmatmul.bf16.vlgmr.msrb.gmra.mxu0 %v11380_v35  ;;  %6496 = vmatmul.bf16.vlgmr.msrb.gmra.mxu1 %v11382_v4  ;;  %v6204_v35 = vperm.slane %v11408_v14, 1 }
 0x4ab   : > { %6508 = vmatpush.bf16.msrb.mxu2 %v9441_v15  ;;  %6521 = vmatpush.bf16.msrb.mxu3 %v9633_v19 }
 0x4ac   : > { %v6226_v27 = vpop.f32.mrf.mxu0  ;;  %v6239_v28 = vpop.f32.mrf.mxu1 }
 0x4ae   : > { %6509 = vmatmul.bf16.vlgmr.msrb.gmra.mxu2 %v11386_v10  ;;  %6522 = vmatmul.bf16.vlgmr.msrb.gmra.mxu3 %v11388_v11 }
 0x4b1   : > { %v6250_v29 = vpop.f32.mrf.mxu2  ;;  %v6263_v31 = vpop.f32.mrf.mxu3 }
 0x4b2   : > { %v6251_v32 = vadd.f32 %v6250_v29, %v6238_v26  ;;  %v6208_v26 = vperm.slane %v11408_v14, 5 }
 0x4b4   : > { %v6264_v4 = vadd.f32 %v6263_v31, %v6251_v32 }
 0x4b5   : > { %v6276_v33 = vpop.f32.mrf.mxu0  ;;  %v6289_v36 = vpop.f32.mrf.mxu1 }
 0x4b6   : > { %v6277_v37 = vadd.f32 %v6276_v33, %v6204_v35 }
 0x4b8   : > { %v6290_v38 = vadd.f32 %v6289_v36, %v6277_v37 }
 0x4b9   : > { %v6252_v39 = vpop.f32.mrf.mxu2  ;;  %v6265_v54 = vpop.f32.mrf.mxu3 }
 0x4bd   : > { %v6278_v40 = vpop.f32.mrf.mxu0  ;;  %v6291_v51 = vpop.f32.mrf.mxu1 }
 0x4c1   : > { %v6302_v10 = vpop.f32.mrf.mxu2  ;;  %v6315_v34 = vpop.f32.mrf.mxu3 }
 0x4c2   : > { %v6303_v11 = vadd.f32 %v6302_v10, %v6290_v38 }
 0x4c4   : > { %v6316_v17 = vadd.f32 %v6315_v34, %v6303_v11 }
 0x4c5   : > { %v6328_v2 = vpop.f32.mrf.mxu0  ;;  %v6341_v16 = vpop.f32.mrf.mxu1 }
 0x4c6   : > { %v6533_v52 = vrot.slane %v6316_v17, 7  ;;  %v6329_v5 = vadd.f32 %v6328_v2, %v6205_v9 }
 0x4c8   : > { %v6539_v53 = vsel %vm6538_vm13, %v6264_v4, %v6533_v52  ;;  %v6342_v42 = vadd.f32 %v6341_v16, %v6329_v5 }
 0x4c9   : > { %v6304_v13 = vpop.f32.mrf.mxu2  ;;  %v6317_v57 = vpop.f32.mrf.mxu3 }
 0x4cd   : > { %v6330_v1 = vpop.f32.mrf.mxu0  ;;  %v6343_v43 = vpop.f32.mrf.mxu1 }
 0x4d1   : > { %v6354_v44 = vpop.f32.mrf.mxu2  ;;  %v6367_v45 = vpop.f32.mrf.mxu3 }
 0x4d2   : > { %v6355_v46 = vadd.f32 %v6354_v44, %v6342_v42 }
 0x4d4   : > { %v6368_v47 = vadd.f32 %v6367_v45, %v6355_v46 }
 0x4d6   : > { %v6534_v48 = vrot.slane %v6368_v47, 6 }
 0x4d8   : > { %v6541_v20 = vsel %vm6540_vm14, %v6539_v53, %v6534_v48 }
 0x4d9   : > { %v6356_v22 = vpop.f32.mrf.mxu2  ;;  %v6369_v49 = vpop.f32.mrf.mxu3 }
 0x4e5   : > { %v6380_v58 = vpop.f32.mrf.mxu0  ;;  %v6393_v55 = vpop.f32.mrf.mxu1 }
 0x4e6   : > { %v6381_v59 = vadd.f32 %v6380_v58, %v6206_v56 }
 0x4e8   : > { %v6394_v0 = vadd.f32 %v6393_v55, %v6381_v59 }
 0x4ed   : > { %v6382_v30 = vpop.f32.mrf.mxu0  ;;  %v6395_v41 = vpop.f32.mrf.mxu1 }
 0x4f1   : > { %v6406_v60 = vpop.f32.mrf.mxu2  ;;  %v6419_v7 = vpop.f32.mrf.mxu3 }
 0x4f2   : > { %v6407_v31 = vadd.f32 %v6406_v60, %v6394_v0 }
 0x4f4   : > { %v6420_v36 = vadd.f32 %v6419_v7, %v6407_v31 }
 0x4f6   : > { %v6535_v40 = vrot.slane %v6420_v36, 5 }
 0x4f9   : > { %v6408_v63 = vpop.f32.mrf.mxu2  ;;  %v6421_v3 = vpop.f32.mrf.mxu3 }
 0x505   : > { %v6432_v6 = vpop.f32.mrf.mxu0  ;;  %v6445_v8 = vpop.f32.mrf.mxu1 }
 0x506   : > { %v6433_v23 = vadd.f32 %v6432_v6, %v6207_v21 }
 0x508   : > { %v6446_v27 = vadd.f32 %v6445_v8, %v6433_v23 }
 0x50d   : > { %v6434_v61 = vpop.f32.mrf.mxu0  ;;  %v6447_v50 = vpop.f32.mrf.mxu1 }
 0x511   : > { %v6458_v12 = vpop.f32.mrf.mxu2  ;;  %v6471_v62 = vpop.f32.mrf.mxu3 }
 0x512   : > { %v6459_v28 = vadd.f32 %v6458_v12, %v6446_v27 }
 0x514   : > { %v6472_v4 = vadd.f32 %v6471_v62, %v6459_v28 }
 0x516   : > { %v6536_v54 = vrot.slane %v6472_v4, 4 }
 0x518   : > { %v6543_v10 = vsel %vm6542_vm15, %v6535_v40, %v6536_v54 }
 0x519   : > { %v6460_v15 = vpop.f32.mrf.mxu2  ;;  %v6473_v19 = vpop.f32.mrf.mxu3 }
 0x525   : > { %v6484_v24 = vpop.f32.mrf.mxu0  ;;  %v6497_v18 = vpop.f32.mrf.mxu1 }
 0x526   : > { %v6485_v29 = vadd.f32 %v6484_v24, %v6208_v26 }
 0x528   : > { %v6498_v33 = vadd.f32 %v6497_v18, %v6485_v29 }
 0x52d   : > { %v6486_v32 = vpop.f32.mrf.mxu0  ;;  %v6499_v35 = vpop.f32.mrf.mxu1 }
 0x531   : > { %v6510_v37 = vpop.f32.mrf.mxu2  ;;  %v6523_v38 = vpop.f32.mrf.mxu3 }
 0x532   : > { %v6511_v39 = vadd.f32 %v6510_v37, %v6498_v33 }
 0x534   : > { %v6524_v14 = vadd.f32 %v6523_v38, %v6511_v39 }
 0x536   : > { %v6537_v51 = vrot.slane %v6524_v14, 3 }
 0x538   : > { %v6545_v34 = vsel %vm6544_vm0, %v6543_v10, %v6537_v51 }
 0x539   : > { %v6547_v11 = vsel %vm6546_vm1, %v6541_v20, %v6545_v34  ;;  %v6512_v9 = vpop.f32.mrf.mxu2  ;;  %v6525_v17 = vpop.f32.mrf.mxu3 }
 0x53a   : > { %6553 = vst.msk [vmem:[%s372_s26] sm:$0x3f] %vm6551_vm2, %v6547_v11 }
 0x53b   : > { %10889 = shalt.err (!%p10886_p8)
}
 0x53c   : > { %10599 = dma.vmem_to_hbm [thread:$0]  (%p11077_p4), %s6568_s7, 96, %s6570_s28, %s6555_s18  }
 0x53d PF: > { %s6581_s4 = sand.u32 1, %s10932_s21   ;;  %p11482_p10 = scmp.ge.s32.totalorder %s10944_s24, 2 }
 0x53e   : > { %s6582_s29 = scalar_lea.sflag [#allocation4], %s6581_s4 }
 0x53f   : > { %p10622_p11 = pnand %p11482_p10, %p11081_p6 }
 0x541   : > { %p10623_p13 = pneg %p10622_p11 }
 0x543   : > { %10927 = dma.done.wait (%p10623_p13), %s6582_s29, 96  }
 0x544   : > { %10929 = vsyncadd (%p10623_p13), %s6582_s29, 4294967200  ;;  %p24_p0 = scmp.ge.s32.totalorder %s11053_s14, 4   ;;  %s11483_s21 = smov %s10936_s22 }
 0x545   : > { %s11484_s22 = smov %s10940_s23  ;;  %s11485_s23 = smov %s11064_s17 }
 0x546   : > { %s11486_s24 = smov %s11053_s14  ;;  %26 = sbr.rel (!%p24_p0) target bundleno = 14 (0xe), region = 118 }
 0x54b   :  { %6588 = vsyncpa [#allocation3], 1 }
 0x54c   :  { %6590 = vsyncpa [#allocation3 + $0x1], 1 }
 0x54d   :  { %6591 = vsyncpa [#allocation6], 1 }
 0x54e   :  { %6593 = vsyncpa [#allocation6 + $0x1], 1 }
 0x54f   :  { %6594 = vsyncpa [#allocation9], 1 }
 0x550   :  { %6595 = vsyncpa [#allocation12], 1 }
 0x551   :  { %6596 = vsyncpa [#allocation4], 1 }
 0x552   :  { %6598 = vsyncpa [#allocation4 + $0x1], 1 }

</bundles_post_ra>
